<compile_context>
chip_gen: v6e
topology: v6e:2x2x1
jax: 0.10.0
libtpu: 0.0.40
codegen_flags: <defaults>
</compile_context>

<pallas_src>
import jax
import jax.numpy as jnp
from jax.experimental import pallas as pl
from jax.experimental.pallas import tpu as pltpu


def mlp_kernel(x0_ref, x1_ref, w1a_ref, w1b_ref, b1_ref, w2_ref, b2_ref,
               w3_ref, b3_ref, w4_ref, b4_ref, o_ref):
    # Layer 1: concat folded into two half-matmuls (bf16 MXU, f32 accumulate).
    h = (jnp.dot(x0_ref[...], w1a_ref[...], preferred_element_type=jnp.float32)
         + jnp.dot(x1_ref[...], w1b_ref[...], preferred_element_type=jnp.float32)
         + b1_ref[...])
    h = jnp.maximum(h, 0.0)
    # Layer 2
    h = jnp.dot(h.astype(jnp.bfloat16), w2_ref[...],
                preferred_element_type=jnp.float32) + b2_ref[...]
    h = jnp.maximum(h, 0.0)
    # Layer 3
    h = jnp.dot(h.astype(jnp.bfloat16), w3_ref[...],
                preferred_element_type=jnp.float32) + b3_ref[...]
    h = jnp.maximum(h, 0.0)
    # Layer 4 (output padded to 128 lanes; no activation)
    o_ref[...] = (jnp.dot(h.astype(jnp.bfloat16), w4_ref[...],
                          preferred_element_type=jnp.float32) + b4_ref[...])


def init_params(key, input_size, num_classes=1):
    """Deterministic synthetic init (f32). Weights (in, out); biases (1, out)."""
    dims = [(input_size * 2, 1024), (1024, 512), (512, 256), (256, num_classes)]
    params = []
    for i, (din, dout) in enumerate(dims):
        kw, kb, key = jax.random.split(jax.random.fold_in(key, i), 3)
        scale = 1.0 / jnp.sqrt(jnp.float32(din))
        w = jax.random.uniform(kw, (din, dout), jnp.float32, -scale, scale)
        b = jax.random.uniform(kb, (1, dout), jnp.float32, -scale, scale)
        params += [w, b]
    return tuple(params)


def prepare_kernel_params(params, input_size, lane_pad=128):
    """Split w1, cast weights to bf16 (biases stay f32), pad last layer to 128 lanes."""
    w1, b1, w2, b2, w3, b3, w4, b4 = params
    F = input_size
    nc = w4.shape[1]
    nc_pad = max(lane_pad, ((nc + lane_pad - 1) // lane_pad) * lane_pad)
    w4p = jnp.zeros((w4.shape[0], nc_pad), jnp.float32).at[:, :nc].set(w4)
    b4p = jnp.zeros((1, nc_pad), jnp.float32).at[:, :nc].set(b4)
    return (w1[:F].astype(jnp.bfloat16),   # w1a
            w1[F:].astype(jnp.bfloat16),   # w1b
            b1,
            w2.astype(jnp.bfloat16), b2,
            w3.astype(jnp.bfloat16), b3,
            w4p.astype(jnp.bfloat16), b4p)


def baseline_model_forward(mel_tensor_0, mel_tensor_1, kernel_params, num_classes):
    """Flatten in JAX; the full MLP (incl. concat-as-split-matmul) runs in one Pallas kernel."""
    B = mel_tensor_0.shape[0]
    flat0 = mel_tensor_0.reshape(B, -1).astype(jnp.bfloat16)
    flat1 = mel_tensor_1.reshape(B, -1).astype(jnp.bfloat16)
    F = flat0.shape[1]

    # Batch tiling: tile of 256 rows for large batches, else round B up to sublane (8).
    BT = 256 if B >= 256 else max(8, ((B + 7) // 8) * 8)
    B_pad = ((B + BT - 1) // BT) * BT
    if B_pad != B:
        pad = ((0, B_pad - B), (0, 0))
        flat0 = jnp.pad(flat0, pad)
        flat1 = jnp.pad(flat1, pad)

    w1a, w1b, b1, w2, b2, w3, b3, w4, b4 = kernel_params
    H1, H2, H3 = w1a.shape[1], w2.shape[1], w3.shape[1]
    NCP = w4.shape[1]  # lane-padded output width (multiple of 128)

    out = pl.pallas_call(
        mlp_kernel,
        out_shape=jax.ShapeDtypeStruct((B_pad, NCP), jnp.float32),
        grid=(B_pad // BT,),
        in_specs=[
            pl.BlockSpec((BT, F), lambda i: (i, 0)),       # flat0 tile
            pl.BlockSpec((BT, F), lambda i: (i, 0)),       # flat1 tile
            pl.BlockSpec((F, H1), lambda i: (0, 0)),       # w1a (resident)
            pl.BlockSpec((F, H1), lambda i: (0, 0)),       # w1b (resident)
            pl.BlockSpec((1, H1), lambda i: (0, 0)),       # b1
            pl.BlockSpec((H1, H2), lambda i: (0, 0)),      # w2 (resident)
            pl.BlockSpec((1, H2), lambda i: (0, 0)),       # b2
            pl.BlockSpec((H2, H3), lambda i: (0, 0)),      # w3 (resident)
            pl.BlockSpec((1, H3), lambda i: (0, 0)),       # b3
            pl.BlockSpec((H3, NCP), lambda i: (0, 0)),     # w4 (padded, resident)
            pl.BlockSpec((1, NCP), lambda i: (0, 0)),      # b4 (padded)
        ],
        out_specs=pl.BlockSpec((BT, NCP), lambda i: (i, 0)),
        compiler_params=pltpu.CompilerParams(
            dimension_semantics=("parallel",),
            vmem_limit_bytes=32 << 20,  # safe on v5e/v6e/v7x; working set ~4 MiB
        ),
    )(flat0, flat1, w1a, w1b, b1, w2, b2, w3, b3, w4, b4)

    return out[:B, :num_classes]


if __name__ == "__main__":
    key = jax.random.PRNGKey(0)
    k0, k1, kp = jax.random.split(key, 3)

    # Small mel-spectrogram-like inputs: (batch=2, channels=1, mels=8, frames=64)
    # -> flattened feature size F = 512 per tensor, input_size = 512.
    B, C, M, T = 2, 1, 8, 64
    input_size = C * M * T
    num_classes = 1

    mel0 = jax.random.normal(k0, (B, C, M, T), jnp.float32)
    mel1 = jax.random.normal(k1, (B, C, M, T), jnp.float32)

    params = init_params(kp, input_size, num_classes)
    kparams = prepare_kernel_params(params, input_size)

    logits = baseline_model_forward(mel0, mel1, kparams, num_classes)
    jax.block_until_ready(logits)
    assert logits.shape == (B, num_classes)

    # Reference that mirrors the kernel's dtype behavior (bf16 matmul inputs,
    # f32 accumulation, f32 bias/ReLU), computed in plain JAX.
    def bf(v):
        return v.astype(jnp.bfloat16).astype(jnp.float32)

    x = jnp.concatenate([mel0.reshape(B, -1), mel1.reshape(B, -1)], axis=1)
    w1, b1, w2, b2, w3, b3, w4, b4 = params
    hi = jax.lax.Precision.HIGHEST
    h = jnp.maximum(jnp.dot(bf(x), bf(w1), precision=hi) + b1, 0.0)
    h = jnp.maximum(jnp.dot(bf(h), bf(w2), precision=hi) + b2, 0.0)
    h = jnp.maximum(jnp.dot(bf(h), bf(w3), precision=hi) + b3, 0.0)
    ref = jnp.dot(bf(h), bf(w4), precision=hi) + b4

    assert jnp.allclose(logits, ref, atol=1e-3, rtol=1e-3)

    print("KERNEL_OK")
</pallas_src>

<mosaic_0001>
module attributes {stable_mosaic.version = 11 : i64} {
  func.func @mlp_kernel(%arg0: i32, %arg1: memref<8x512xbf16, #tpu.memory_space<vmem>>, %arg2: memref<8x512xbf16, #tpu.memory_space<vmem>>, %arg3: memref<512x1024xbf16, #tpu.memory_space<vmem>>, %arg4: memref<512x1024xbf16, #tpu.memory_space<vmem>>, %arg5: memref<1x1024xf32, #tpu.memory_space<vmem>>, %arg6: memref<1024x512xbf16, #tpu.memory_space<vmem>>, %arg7: memref<1x512xf32, #tpu.memory_space<vmem>>, %arg8: memref<512x256xbf16, #tpu.memory_space<vmem>>, %arg9: memref<1x256xf32, #tpu.memory_space<vmem>>, %arg10: memref<256x128xbf16, #tpu.memory_space<vmem>>, %arg11: memref<1x128xf32, #tpu.memory_space<vmem>>, %arg12: memref<8x128xf32, #tpu.memory_space<vmem>>) attributes {dimension_semantics = [#tpu.dimension_semantics<parallel>], iteration_bounds = array<i64: 1>, scalar_prefetch = 0 : i64, scratch_operands = 0 : i64, tpu.core_type = #tpu.core_type<tc>, window_params = [{transform_indices = @transform_0, window_bounds = array<i64: 8, 512>}, {transform_indices = @transform_1, window_bounds = array<i64: 8, 512>}, {pipeline_mode = #tpu.pipeline_mode<synchronous>, transform_indices = @transform_2, window_bounds = array<i64: 512, 1024>}, {pipeline_mode = #tpu.pipeline_mode<synchronous>, transform_indices = @transform_3, window_bounds = array<i64: 512, 1024>}, {pipeline_mode = #tpu.pipeline_mode<synchronous>, transform_indices = @transform_4, window_bounds = array<i64: 1, 1024>}, {pipeline_mode = #tpu.pipeline_mode<synchronous>, transform_indices = @transform_5, window_bounds = array<i64: 1024, 512>}, {pipeline_mode = #tpu.pipeline_mode<synchronous>, transform_indices = @transform_6, window_bounds = array<i64: 1, 512>}, {pipeline_mode = #tpu.pipeline_mode<synchronous>, transform_indices = @transform_7, window_bounds = array<i64: 512, 256>}, {pipeline_mode = #tpu.pipeline_mode<synchronous>, transform_indices = @transform_8, window_bounds = array<i64: 1, 256>}, {pipeline_mode = #tpu.pipeline_mode<synchronous>, transform_indices = @transform_9, window_bounds = array<i64: 256, 128>}, {pipeline_mode = #tpu.pipeline_mode<synchronous>, transform_indices = @transform_10, window_bounds = array<i64: 1, 128>}, {transform_indices = @transform_11, window_bounds = array<i64: 8, 128>}]} {
    %c0 = arith.constant 0 : index
    %c0_0 = arith.constant 0 : index
    %0 = vector.load %arg1[%c0, %c0_0] : memref<8x512xbf16, #tpu.memory_space<vmem>>, vector<8x512xbf16>
    %c0_1 = arith.constant 0 : index
    %c0_2 = arith.constant 0 : index
    %1 = vector.load %arg3[%c0_1, %c0_2] : memref<512x1024xbf16, #tpu.memory_space<vmem>>, vector<512x1024xbf16>
    %cst = arith.constant dense<0.000000e+00> : vector<8x1024xf32>
    %2 = tpu.matmul %0, %1, %cst {dimension_numbers = #tpu.dot_dimension_numbers<[1], [0], [0], [1], [0, 0, 1, 1], [], []>} : vector<8x512xbf16>, vector<512x1024xbf16>, vector<8x1024xf32> -> vector<8x1024xf32>
    %c0_3 = arith.constant 0 : index
    %c0_4 = arith.constant 0 : index
    %3 = vector.load %arg2[%c0_3, %c0_4] : memref<8x512xbf16, #tpu.memory_space<vmem>>, vector<8x512xbf16>
    %c0_5 = arith.constant 0 : index
    %c0_6 = arith.constant 0 : index
    %4 = vector.load %arg4[%c0_5, %c0_6] : memref<512x1024xbf16, #tpu.memory_space<vmem>>, vector<512x1024xbf16>
    %cst_7 = arith.constant dense<0.000000e+00> : vector<8x1024xf32>
    %5 = tpu.matmul %3, %4, %cst_7 {dimension_numbers = #tpu.dot_dimension_numbers<[1], [0], [0], [1], [0, 0, 1, 1], [], []>} : vector<8x512xbf16>, vector<512x1024xbf16>, vector<8x1024xf32> -> vector<8x1024xf32>
    %6 = arith.addf %2, %5 : vector<8x1024xf32>
    %c0_8 = arith.constant 0 : index
    %c0_9 = arith.constant 0 : index
    %7 = vector.load %arg5[%c0_8, %c0_9] : memref<1x1024xf32, #tpu.memory_space<vmem>>, vector<1x1024xf32>
    %8 = vector.broadcast %7 : vector<1x1024xf32> to vector<8x1024xf32>
    %9 = arith.addf %6, %8 : vector<8x1024xf32>
    %cst_10 = arith.constant 0.000000e+00 : f32
    %10 = vector.broadcast %cst_10 : f32 to vector<8x1024xf32>
    %11 = arith.maximumf %9, %10 : vector<8x1024xf32>
    %12 = arith.truncf %11 : vector<8x1024xf32> to vector<8x1024xbf16>
    %c0_11 = arith.constant 0 : index
    %c0_12 = arith.constant 0 : index
    %13 = vector.load %arg6[%c0_11, %c0_12] : memref<1024x512xbf16, #tpu.memory_space<vmem>>, vector<1024x512xbf16>
    %cst_13 = arith.constant dense<0.000000e+00> : vector<8x512xf32>
    %14 = tpu.matmul %12, %13, %cst_13 {dimension_numbers = #tpu.dot_dimension_numbers<[1], [0], [0], [1], [0, 0, 1, 1], [], []>} : vector<8x1024xbf16>, vector<1024x512xbf16>, vector<8x512xf32> -> vector<8x512xf32>
    %c0_14 = arith.constant 0 : index
    %c0_15 = arith.constant 0 : index
    %15 = vector.load %arg7[%c0_14, %c0_15] : memref<1x512xf32, #tpu.memory_space<vmem>>, vector<1x512xf32>
    %16 = vector.broadcast %15 : vector<1x512xf32> to vector<8x512xf32>
    %17 = arith.addf %14, %16 : vector<8x512xf32>
    %cst_16 = arith.constant 0.000000e+00 : f32
    %18 = vector.broadcast %cst_16 : f32 to vector<8x512xf32>
    %19 = arith.maximumf %17, %18 : vector<8x512xf32>
    %20 = arith.truncf %19 : vector<8x512xf32> to vector<8x512xbf16>
    %c0_17 = arith.constant 0 : index
    %c0_18 = arith.constant 0 : index
    %21 = vector.load %arg8[%c0_17, %c0_18] : memref<512x256xbf16, #tpu.memory_space<vmem>>, vector<512x256xbf16>
    %cst_19 = arith.constant dense<0.000000e+00> : vector<8x256xf32>
    %22 = tpu.matmul %20, %21, %cst_19 {dimension_numbers = #tpu.dot_dimension_numbers<[1], [0], [0], [1], [0, 0, 1, 1], [], []>} : vector<8x512xbf16>, vector<512x256xbf16>, vector<8x256xf32> -> vector<8x256xf32>
    %c0_20 = arith.constant 0 : index
    %c0_21 = arith.constant 0 : index
    %23 = vector.load %arg9[%c0_20, %c0_21] : memref<1x256xf32, #tpu.memory_space<vmem>>, vector<1x256xf32>
    %24 = vector.broadcast %23 : vector<1x256xf32> to vector<8x256xf32>
    %25 = arith.addf %22, %24 : vector<8x256xf32>
    %cst_22 = arith.constant 0.000000e+00 : f32
    %26 = vector.broadcast %cst_22 : f32 to vector<8x256xf32>
    %27 = arith.maximumf %25, %26 : vector<8x256xf32>
    %28 = arith.truncf %27 : vector<8x256xf32> to vector<8x256xbf16>
    %c0_23 = arith.constant 0 : index
    %c0_24 = arith.constant 0 : index
    %29 = vector.load %arg10[%c0_23, %c0_24] : memref<256x128xbf16, #tpu.memory_space<vmem>>, vector<256x128xbf16>
    %cst_25 = arith.constant dense<0.000000e+00> : vector<8x128xf32>
    %30 = tpu.matmul %28, %29, %cst_25 {dimension_numbers = #tpu.dot_dimension_numbers<[1], [0], [0], [1], [0, 0, 1, 1], [], []>} : vector<8x256xbf16>, vector<256x128xbf16>, vector<8x128xf32> -> vector<8x128xf32>
    %c0_26 = arith.constant 0 : index
    %c0_27 = arith.constant 0 : index
    %31 = vector.load %arg11[%c0_26, %c0_27] : memref<1x128xf32, #tpu.memory_space<vmem>>, vector<1x128xf32>
    %32 = vector.broadcast %31 : vector<1x128xf32> to vector<8x128xf32>
    %33 = arith.addf %30, %32 : vector<8x128xf32>
    %c0_28 = arith.constant 0 : index
    %c0_29 = arith.constant 0 : index
    %34 = vector.load %arg12[%c0_28, %c0_29] : memref<8x128xf32, #tpu.memory_space<vmem>>, vector<8x128xf32>
    tpu.vector_store %arg12[%c0_28, %c0_29], %33 {strides = array<i32>} : memref<8x128xf32, #tpu.memory_space<vmem>>, vector<8x128xf32>,
    return
  }
  func.func @transform_0(%arg0: i32) -> (i32, i32) {
    %c0_i32 = arith.constant 0 : i32
    %c0_i32_0 = arith.constant 0 : i32
    return %arg0, %c0_i32 : i32, i32
  }
  func.func @transform_1(%arg0: i32) -> (i32, i32) {
    %c0_i32 = arith.constant 0 : i32
    %c0_i32_0 = arith.constant 0 : i32
    return %arg0, %c0_i32 : i32, i32
  }
  func.func @transform_2(%arg0: i32) -> (i32, i32) {
    %c0_i32 = arith.constant 0 : i32
    %c0_i32_0 = arith.constant 0 : i32
    %c0_i32_1 = arith.constant 0 : i32
    return %c0_i32, %c0_i32_0 : i32, i32
  }
  func.func @transform_3(%arg0: i32) -> (i32, i32) {
    %c0_i32 = arith.constant 0 : i32
    %c0_i32_0 = arith.constant 0 : i32
    %c0_i32_1 = arith.constant 0 : i32
    return %c0_i32, %c0_i32_0 : i32, i32
  }
  func.func @transform_4(%arg0: i32) -> (i32, i32) {
    %c0_i32 = arith.constant 0 : i32
    %c0_i32_0 = arith.constant 0 : i32
    %c0_i32_1 = arith.constant 0 : i32
    return %c0_i32, %c0_i32_0 : i32, i32
  }
  func.func @transform_5(%arg0: i32) -> (i32, i32) {
    %c0_i32 = arith.constant 0 : i32
    %c0_i32_0 = arith.constant 0 : i32
    %c0_i32_1 = arith.constant 0 : i32
    return %c0_i32, %c0_i32_0 : i32, i32
  }
  func.func @transform_6(%arg0: i32) -> (i32, i32) {
    %c0_i32 = arith.constant 0 : i32
    %c0_i32_0 = arith.constant 0 : i32
    %c0_i32_1 = arith.constant 0 : i32
    return %c0_i32, %c0_i32_0 : i32, i32
  }
  func.func @transform_7(%arg0: i32) -> (i32, i32) {
    %c0_i32 = arith.constant 0 : i32
    %c0_i32_0 = arith.constant 0 : i32
    %c0_i32_1 = arith.constant 0 : i32
    return %c0_i32, %c0_i32_0 : i32, i32
  }
  func.func @transform_8(%arg0: i32) -> (i32, i32) {
    %c0_i32 = arith.constant 0 : i32
    %c0_i32_0 = arith.constant 0 : i32
    %c0_i32_1 = arith.constant 0 : i32
    return %c0_i32, %c0_i32_0 : i32, i32
  }
  func.func @transform_9(%arg0: i32) -> (i32, i32) {
    %c0_i32 = arith.constant 0 : i32
    %c0_i32_0 = arith.constant 0 : i32
    %c0_i32_1 = arith.constant 0 : i32
    return %c0_i32, %c0_i32_0 : i32, i32
  }
  func.func @transform_10(%arg0: i32) -> (i32, i32) {
    %c0_i32 = arith.constant 0 : i32
    %c0_i32_0 = arith.constant 0 : i32
    %c0_i32_1 = arith.constant 0 : i32
    return %c0_i32, %c0_i32_0 : i32, i32
  }
  func.func @transform_11(%arg0: i32) -> (i32, i32) {
    %c0_i32 = arith.constant 0 : i32
    %c0_i32_0 = arith.constant 0 : i32
    return %arg0, %c0_i32 : i32, i32
  }
}

</mosaic_0001>

<bundles_post_ra>
// kernel: tpu_custom_call.1
= control target key start
LH: loop header
LB: loop body
LE: loop exit
PB: predicated region body
PF: predicated region fallthrough
CT: control target
= control target key end

     0   :  { %16 = vsyncpa [#allocation3], 0  ;;  %s8438_s0 = inlined_call_operand.hbm [shape: bf16[8,512], index: 0, kind: input, shape index: {}]   ;;  %s8439_s1 = inlined_call_operand.hbm [shape: bf16[8,512], index: 1, kind: input, shape index: {}]   ;;  %s8440_s2 = inlined_call_operand.hbm [shape: bf16[512,1024], index: 2, kind: input, shape index: {}]   ;;  %s8441_s3 = inlined_call_operand.hbm [shape: bf16[512,1024], index: 3, kind: input, shape index: {}]   ;;  %s8442_s4 = inlined_call_operand.hbm [shape: f32[1,1024], index: 4, kind: input, shape index: {}]   ;;  %s8443_s5 = inlined_call_operand.hbm [shape: bf16[1024,512], index: 5, kind: input, shape index: {}]   ;;  %s8444_s6 = inlined_call_operand.vmem [shape: f32[1,512], index: 6, kind: input, shape index: {}]   ;;  %s8445_s7 = inlined_call_operand.hbm [shape: bf16[512,256], index: 7, kind: input, shape index: {}]   ;;  %s8446_s8 = inlined_call_operand.vmem [shape: f32[1,256], index: 8, kind: input, shape index: {}]   ;;  %s8447_s9 = inlined_call_operand.hbm [shape: bf16[256,128], index: 9, kind: input, shape index: {}]   ;;  %s8448_s10 = inlined_call_operand.vmem [shape: f32[1,128], index: 10, kind: input, shape index: {}]   ;;  %s8449_s11 = inlined_call_operand.hbm [shape: f32[8,128], index: 11, kind: output, shape index: {}]  }
   0x1   :  { %17 = vsyncpa [#allocation6], 0 }
   0x2   :  { %18 = vsyncpa [#allocation9], 0 }
   0x3   :  { %19 = vsyncpa [#allocation12], 0 }
   0x4   :  { %20 = vsyncpa [#allocation15], 0 }
   0x5   :  { %21 = vsyncpa [#allocation4], 0  ;;  %s8132_s17 = smov [#allocation5]  }
   0x6   :  { %s38_s18 = sshll.u32 %s8132_s17, 4  ;;  %s39_s18 = int_to_ptr.vmem [resolvable:$true] %s38_s18 }
   0x7   :  { %s7948_s19 = scalar_lea.vmem %s39_s18, 256  ;;  %p7953_p1 = scmp.lt.s32.totalorder %s39_s18, %s39_s18 }
   0x8   :  { %p7949_p0 = scmp.ne.s32.totalorder %s39_s18, %s7948_s19  ;;  %p7954_p2 = scmp.lt.s32.totalorder %s7948_s19, %s7948_s19 }
   0xa   :  { %p7955_p3 = por %p7954_p2, %p7953_p1 }
   0xc   :  { %p7956_p4 = pnand %p7955_p3, %p7949_p0 }
   0xe   :  { %7959 = shalt.err (!%p7956_p4)
}
   0xf   :  { %41 = dma.hbm_to_vmem [thread:$0]  %s8439_s1, 256, %s39_s18, [#allocation6]  }
  0x10   :  { %s8133_s22 = smov [#allocation8]   ;;  %s8134_s24 = smov [#allocation11]  }
  0x11   :  { %s59_s23 = sshll.u32 %s8133_s22, 4  ;;  %s81_s25 = sshll.u32 %s8134_s24, 4  ;;  %s60_s23 = int_to_ptr.vmem [resolvable:$true] %s59_s23  ;;  %s82_s25 = int_to_ptr.vmem [resolvable:$true] %s81_s25 }
  0x12   :  { %s7968_s26 = scalar_lea.vmem %s60_s23, 32768  ;;  %p7973_p6 = scmp.lt.s32.totalorder %s60_s23, %s60_s23 }
  0x13   :  { %p7969_p5 = scmp.ne.s32.totalorder %s60_s23, %s7968_s26  ;;  %p7974_p7 = scmp.lt.s32.totalorder %s7968_s26, %s7968_s26 }
  0x15   :  { %p7975_p8 = por %p7974_p7, %p7973_p6 }
  0x17   :  { %p7976_p9 = pnand %p7975_p8, %p7969_p5 }
  0x19   :  { %7979 = shalt.err (!%p7976_p9)
}
  0x1a   :  { %s8135_s27 = smov 512   ;;  %s8136_s28 = smov 32  }
  0x1b   :  { %65 = dma.hbm_to_vmem [thread:$0]  %s8441_s3, 32768, %s60_s23, [#allocation9], %s8135_s27, %s8135_s27, %s8136_s28  }
  0x1c   :  { %s7988_s1 = scalar_lea.vmem %s82_s25, 32768  ;;  %p7993_p11 = scmp.lt.s32.totalorder %s82_s25, %s82_s25 }
  0x1d   :  { %p7989_p10 = scmp.ne.s32.totalorder %s82_s25, %s7988_s1  ;;  %p7994_p12 = scmp.lt.s32.totalorder %s7988_s1, %s7988_s1 }
  0x1f   :  { %p7995_p13 = por %p7994_p12, %p7993_p11 }
  0x21   :  { %p7996_p0 = pnand %p7995_p13, %p7989_p10 }
  0x23   :  { %7999 = shalt.err (!%p7996_p0)
}
  0x24   :  { %s8137_s12 = smov 256   ;;  %s8138_s13 = smov 16  }
  0x25   :  { %87 = dma.hbm_to_vmem [thread:$0]  %s8443_s5, 32768, %s82_s25, [#allocation12], %s8137_s12, %s8137_s12, %s8138_s13  }
  0x26   :  { %s8139_s16 = smov [#allocation2]   ;;  %s8140_s18 = smov [#allocation7]  }
  0x27   :  { %s28_s17 = sshll.u32 %s8139_s16, 4  ;;  %s47_s19 = sshll.u32 %s8140_s18, 4  ;;  %s29_s17 = int_to_ptr.vmem [resolvable:$true] %s28_s17  ;;  %s48_s19 = int_to_ptr.vmem [resolvable:$true] %s47_s19 }
  0x28   :  { %s8008_s3 = scalar_lea.vmem %s29_s17, 256  ;;  %p8013_p2 = scmp.lt.s32.totalorder %s29_s17, %s29_s17 }
  0x29   :  { %p8009_p1 = scmp.ne.s32.totalorder %s29_s17, %s8008_s3  ;;  %p8014_p3 = scmp.lt.s32.totalorder %s8008_s3, %s8008_s3 }
  0x2b   :  { %p8015_p4 = por %p8014_p3, %p8013_p2 }
  0x2d   :  { %p8016_p5 = pnand %p8015_p4, %p8009_p1 }
  0x2f   :  { %8019 = shalt.err (!%p8016_p5)
}
  0x30   :  { %31 = dma.hbm_to_vmem [thread:$0]  %s8438_s0, 256, %s29_s17, [#allocation3]  }
  0x31   :  { %s8028_s22 = scalar_lea.vmem %s48_s19, 32768  ;;  %p8033_p7 = scmp.lt.s32.totalorder %s48_s19, %s48_s19 }
  0x32   :  { %p8029_p6 = scmp.ne.s32.totalorder %s48_s19, %s8028_s22  ;;  %p8034_p8 = scmp.lt.s32.totalorder %s8028_s22, %s8028_s22 }
  0x34   :  { %p8035_p9 = por %p8034_p8, %p8033_p7 }
  0x36   :  { %p8036_p10 = pnand %p8035_p9, %p8029_p6 }
  0x38   :  { %8039 = shalt.err (!%p8036_p10)
}
  0x39   :  { %53 = dma.hbm_to_vmem [thread:$0]  %s8440_s2, 32768, %s48_s19, [#allocation6], %s8135_s27, %s8135_s27, %s8136_s28  }
  0x3a   :  { %s8141_s24 = smov [#allocation10]   ;;  %s8142_s26 = smov [#allocation13]  }
  0x3b   :  { %s72_s25 = sshll.u32 %s8141_s24, 4  ;;  %s95_s0 = sshll.u32 %s8142_s26, 4  ;;  %s73_s25 = int_to_ptr.vmem [resolvable:$true] %s72_s25  ;;  %s96_s0 = int_to_ptr.vmem [resolvable:$true] %s95_s0 }
  0x3c   :  { %s8048_s29 = scalar_lea.vmem %s73_s25, 128  ;;  %p8053_p12 = scmp.lt.s32.totalorder %s73_s25, %s73_s25 }
  0x3d   :  { %p8049_p11 = scmp.ne.s32.totalorder %s73_s25, %s8048_s29  ;;  %p8054_p13 = scmp.lt.s32.totalorder %s8048_s29, %s8048_s29 }
  0x3f   :  { %p8055_p0 = por %p8054_p13, %p8053_p12 }
  0x41   :  { %p8056_p1 = pnand %p8055_p0, %p8049_p11 }
  0x43   :  { %8059 = shalt.err (!%p8056_p1)
}
  0x44   :  { %75 = dma.hbm_to_vmem [thread:$0]  %s8442_s4, 128, %s73_s25, [#allocation9]  }
  0x45   :  { %s8068_s12 = scalar_lea.vmem %s96_s0, 8192  ;;  %p8073_p3 = scmp.lt.s32.totalorder %s96_s0, %s96_s0 }
  0x46   :  { %p8069_p2 = scmp.ne.s32.totalorder %s96_s0, %s8068_s12  ;;  %p8074_p4 = scmp.lt.s32.totalorder %s8068_s12, %s8068_s12 }
  0x48   :  { %p8075_p5 = por %p8074_p4, %p8073_p3 }
  0x4a   :  { %p8076_p6 = pnand %p8075_p5, %p8069_p2 }
  0x4c   :  { %8079 = shalt.err (!%p8076_p6)
}
  0x4d   :  { %s8143_s2 = smov 128   ;;  %s8144_s27 = smov 8  }
  0x4e   :  { %101 = dma.hbm_to_vmem [thread:$0]  %s8445_s7, 8192, %s96_s0, [#allocation12], %s8143_s2, %s8143_s2, %s8144_s27  }
  0x4f   :  { %s8145_s14 = smov [#allocation14]  }
  0x50   :  { %s109_s15 = sshll.u32 %s8145_s14, 4  ;;  %s110_s15 = int_to_ptr.vmem [resolvable:$true] %s109_s15 }
  0x51   :  { %s8088_s16 = scalar_lea.vmem %s110_s15, 2048  ;;  %p8093_p8 = scmp.lt.s32.totalorder %s110_s15, %s110_s15 }
  0x52   :  { %p8089_p7 = scmp.ne.s32.totalorder %s110_s15, %s8088_s16  ;;  %p8094_p9 = scmp.lt.s32.totalorder %s8088_s16, %s8088_s16 }
  0x54   :  { %p8095_p10 = por %p8094_p9, %p8093_p8 }
  0x56   :  { %p8096_p11 = pnand %p8095_p10, %p8089_p7 }
  0x58   :  { %8099 = shalt.err (!%p8096_p11)
}
  0x59   :  { %s8146_s4 = smov 64   ;;  %s8147_s17 = smov 4  }
  0x5a   :  { %115 = dma.hbm_to_vmem [thread:$0]  %s8447_s9, 2048, %s110_s15, [#allocation15], %s8146_s4, %s8146_s4, %s8147_s17  }
  0x5b   :  { %8120 = dma.done.wait [#allocation3], 256  }
  0x5c   :  { %8121 = vsyncadd [#allocation3], 4294967040 }
  0x5d   :  { %8122 = dma.done.wait [#allocation6], 33024  }
  0x5e   :  { %8123 = vsyncadd [#allocation6], 4294934272 }
  0x5f   :  { %8124 = dma.done.wait [#allocation9], 32896  }
  0x60   :  { %8125 = vsyncadd [#allocation9], 4294934400 }
  0x61   :  { %8126 = dma.done.wait [#allocation12], 40960  }
  0x62   :  { %8127 = vsyncadd [#allocation12], 4294926336 }
  0x63   :  { %8128 = dma.done.wait [#allocation15], 2048  }
  0x64   :  { %8129 = vsyncadd [#allocation15], 4294965248  ;;  %v459_v0 = vld [vmem:[#allocation8 + $0x1c0] sm:$0xff]  ;;  %v8239_v53 = vld [vmem:[#allocation5] sm:$0xff]  ;;  %s8148_s21 = smov [#allocation16]  }
  0x65   :  { %v463_v1 = vld [vmem:[#allocation8 + $0x1e0] sm:$0xff]  ;;  %v8241_v54 = vld [vmem:[#allocation5 + $0x8] sm:$0xff]  ;;  %v8245_v58 = vcombine.high %v8239_v53, %v8239_v53  ;;  %s6527_s22 = sshll.u32 %s8148_s21, 4  ;;  %s6528_s22 = int_to_ptr.vmem [resolvable:$true] %s6527_s22 }
  0x66   :  { %v587_v2 = vld [vmem:[#allocation8 + $0x5c0] sm:$0xff]  ;;  %v6601_v3 = vcombine.high %v459_v0, %v463_v1  ;;  %v6600_v5 = vcombine.low %v459_v0, %v463_v1  ;;  %v8249_v59 = vcombine.high %v8241_v54, %v8241_v54  ;;  %s8100_s5 = scalar_lea.vmem %s6528_s22, 128  ;;  %p8105_p13 = scmp.lt.s32.totalorder %s6528_s22, %s6528_s22 }
  0x67   :  { %v591_v4 = vld [vmem:[#allocation8 + $0x5e0] sm:$0xff]  ;;  %1985 = vmatprep.mubr.bf16.mxu0 %v8245_v58  ;;  %p8101_p12 = scmp.ne.s32.totalorder %s6528_s22, %s8100_s5  ;;  %p8106_p0 = scmp.lt.s32.totalorder %s8100_s5, %s8100_s5 }
  0x68   :  { %v451_v6 = vld [vmem:[#allocation8 + $0x180] sm:$0xff]  ;;  %v6729_v8 = vcombine.high %v587_v2, %v591_v4  ;;  %v6728_v9 = vcombine.low %v587_v2, %v591_v4  ;;  %1953 = vmatprep.subr.bf16.mxu0 %v6601_v3  ;;  %2026 = vmatprep.mubr.bf16.mxu1 %v8249_v59 }
  0x69   :  { %v455_v7 = vld [vmem:[#allocation8 + $0x1a0] sm:$0xff]  ;;  %1954 = vmatpush1.bf16.msra.mxu0 %v6600_v5  ;;  %p8107_p1 = por %p8106_p0, %p8105_p13 }
  0x6a   :  { %v6593_v10 = vcombine.high %v451_v6, %v455_v7  ;;  %v579_v11 = vld [vmem:[#allocation8 + $0x580] sm:$0xff]  ;;  %1994 = vmatprep.subr.bf16.mxu1 %v6729_v8  ;;  %v6592_v18 = vcombine.low %v451_v6, %v455_v7 }
  0x6b   :  { %v583_v12 = vld [vmem:[#allocation8 + $0x5a0] sm:$0xff]  ;;  %1995 = vmatpush1.bf16.msra.mxu1 %v6728_v9  ;;  %p8108_p2 = pnand %p8107_p1, %p8101_p12 }
  0x6c   :  { %v443_v13 = vld [vmem:[#allocation8 + $0x140] sm:$0xff]  ;;  %v6721_v14 = vcombine.high %v579_v11, %v583_v12  ;;  %1955 = vmatprep.subr.bf16.mxu0 %v6593_v10  ;;  %v6720_v19 = vcombine.low %v579_v11, %v583_v12 }
  0x6d   :  { %v447_v15 = vld [vmem:[#allocation8 + $0x160] sm:$0xff]  ;;  %1956 = vmatpush1.bf16.msra.mxu0 %v6592_v18 }
  0x6e   :  { %v571_v16 = vld [vmem:[#allocation8 + $0x540] sm:$0xff]  ;;  %v6585_v20 = vcombine.high %v443_v13, %v447_v15  ;;  %1996 = vmatprep.subr.bf16.mxu1 %v6721_v14  ;;  %v6584_v26 = vcombine.low %v443_v13, %v447_v15 }
  0x6f   :  { %v575_v17 = vld [vmem:[#allocation8 + $0x560] sm:$0xff]  ;;  %1997 = vmatpush1.bf16.msra.mxu1 %v6720_v19 }
  0x70   :  { %v6713_v21 = vcombine.high %v571_v16, %v575_v17  ;;  %v435_v22 = vld [vmem:[#allocation8 + $0x100] sm:$0xff]  ;;  %1957 = vmatprep.subr.bf16.mxu0 %v6585_v20  ;;  %v6712_v27 = vcombine.low %v571_v16, %v575_v17 }
  0x71   :  { %v439_v23 = vld [vmem:[#allocation8 + $0x120] sm:$0xff]  ;;  %1958 = vmatpush1.bf16.msra.mxu0 %v6584_v26 }
  0x72   :  { %v563_v24 = vld [vmem:[#allocation8 + $0x500] sm:$0xff]  ;;  %v6577_v28 = vcombine.high %v435_v22, %v439_v23  ;;  %1998 = vmatprep.subr.bf16.mxu1 %v6713_v21  ;;  %v6576_v34 = vcombine.low %v435_v22, %v439_v23 }
  0x73   :  { %v567_v25 = vld [vmem:[#allocation8 + $0x520] sm:$0xff]  ;;  %1999 = vmatpush1.bf16.msra.mxu1 %v6712_v27 }
  0x74   :  { %v6705_v29 = vcombine.high %v563_v24, %v567_v25  ;;  %v427_v30 = vld [vmem:[#allocation8 + $0xc0] sm:$0xff]  ;;  %1959 = vmatprep.subr.bf16.mxu0 %v6577_v28  ;;  %v6704_v35 = vcombine.low %v563_v24, %v567_v25 }
  0x75   :  { %v431_v31 = vld [vmem:[#allocation8 + $0xe0] sm:$0xff]  ;;  %1960 = vmatpush1.bf16.msra.mxu0 %v6576_v34 }
  0x76   :  { %v555_v32 = vld [vmem:[#allocation8 + $0x4c0] sm:$0xff]  ;;  %v6569_v36 = vcombine.high %v427_v30, %v431_v31  ;;  %2000 = vmatprep.subr.bf16.mxu1 %v6705_v29  ;;  %v6568_v42 = vcombine.low %v427_v30, %v431_v31 }
  0x77   :  { %v559_v33 = vld [vmem:[#allocation8 + $0x4e0] sm:$0xff]  ;;  %2001 = vmatpush1.bf16.msra.mxu1 %v6704_v35 }
  0x78   :  { %v6697_v37 = vcombine.high %v555_v32, %v559_v33  ;;  %v419_v38 = vld [vmem:[#allocation8 + $0x80] sm:$0xff]  ;;  %1961 = vmatprep.subr.bf16.mxu0 %v6569_v36  ;;  %v6696_v43 = vcombine.low %v555_v32, %v559_v33 }
  0x79   :  { %v423_v39 = vld [vmem:[#allocation8 + $0xa0] sm:$0xff]  ;;  %1962 = vmatpush1.bf16.msra.mxu0 %v6568_v42 }
  0x7a   :  { %v547_v40 = vld [vmem:[#allocation8 + $0x480] sm:$0xff]  ;;  %v6561_v44 = vcombine.high %v419_v38, %v423_v39  ;;  %2002 = vmatprep.subr.bf16.mxu1 %v6697_v37  ;;  %v6560_v50 = vcombine.low %v419_v38, %v423_v39 }
  0x7b   :  { %v551_v41 = vld [vmem:[#allocation8 + $0x4a0] sm:$0xff]  ;;  %2003 = vmatpush1.bf16.msra.mxu1 %v6696_v43 }
  0x7c   :  { %v6689_v45 = vcombine.high %v547_v40, %v551_v41  ;;  %v411_v46 = vld [vmem:[#allocation8 + $0x40] sm:$0xff]  ;;  %1963 = vmatprep.subr.bf16.mxu0 %v6561_v44  ;;  %v6688_v51 = vcombine.low %v547_v40, %v551_v41 }
  0x7d   :  { %v415_v47 = vld [vmem:[#allocation8 + $0x60] sm:$0xff]  ;;  %1964 = vmatpush1.bf16.msra.mxu0 %v6560_v50 }
  0x7e   :  { %v539_v48 = vld [vmem:[#allocation8 + $0x440] sm:$0xff]  ;;  %v6553_v52 = vcombine.high %v411_v46, %v415_v47  ;;  %2004 = vmatprep.subr.bf16.mxu1 %v6689_v45  ;;  %v6552_v62 = vcombine.low %v411_v46, %v415_v47 }
  0x7f   :  { %v543_v49 = vld [vmem:[#allocation8 + $0x460] sm:$0xff]  ;;  %2005 = vmatpush1.bf16.msra.mxu1 %v6688_v51 }
  0x80   :  { %v6681_v55 = vcombine.high %v539_v48, %v543_v49  ;;  %v403_v56 = vld [vmem:[#allocation8] sm:$0xff]  ;;  %1965 = vmatprep.subr.bf16.mxu0 %v6553_v52  ;;  %v6680_v63 = vcombine.low %v539_v48, %v543_v49 }
  0x81   :  { %v407_v57 = vld [vmem:[#allocation8 + $0x20] sm:$0xff]  ;;  %1966 = vmatpush1.bf16.msra.mxu0 %v6552_v62 }
  0x82   :  { %v531_v60 = vld [vmem:[#allocation8 + $0x400] sm:$0xff]  ;;  %v6545_v0 = vcombine.high %v403_v56, %v407_v57  ;;  %2006 = vmatprep.subr.bf16.mxu1 %v6681_v55  ;;  %v6544_v6 = vcombine.low %v403_v56, %v407_v57 }
  0x83   :  { %v535_v61 = vld [vmem:[#allocation8 + $0x420] sm:$0xff]  ;;  %2007 = vmatpush1.bf16.msra.mxu1 %v6680_v63 }
  0x84   :  { %v6673_v1 = vcombine.high %v531_v60, %v535_v61  ;;  %v523_v2 = vld [vmem:[#allocation8 + $0x3c0] sm:$0xff]  ;;  %1967 = vmatprep.subr.bf16.mxu0 %v6545_v0  ;;  %v6672_v7 = vcombine.low %v531_v60, %v535_v61 }
  0x85   :  { %v527_v3 = vld [vmem:[#allocation8 + $0x3e0] sm:$0xff]  ;;  %1968 = vmatpush1.bf16.msra.mxu0 %v6544_v6  ;;  %v460_v6 = vld [vmem:[#allocation8 + $0x1c8] sm:$0xff] }
  0x86   :  { %v651_v4 = vld [vmem:[#allocation8 + $0x7c0] sm:$0xff]  ;;  %v6665_v8 = vcombine.high %v523_v2, %v527_v3  ;;  %2008 = vmatprep.subr.bf16.mxu1 %v6673_v1  ;;  %v6664_v14 = vcombine.low %v523_v2, %v527_v3 }
  0x87   :  { %v655_v5 = vld [vmem:[#allocation8 + $0x7e0] sm:$0xff]  ;;  %2009 = vmatpush1.bf16.msra.mxu1 %v6672_v7  ;;  %v464_v7 = vld [vmem:[#allocation8 + $0x1e8] sm:$0xff] }
  0x88   :  { %v6793_v9 = vcombine.high %v651_v4, %v655_v5  ;;  %v515_v10 = vld [vmem:[#allocation8 + $0x380] sm:$0xff]  ;;  %1969 = vmatprep.subr.bf16.mxu0 %v6665_v8  ;;  %v6792_v15 = vcombine.low %v651_v4, %v655_v5  ;;  %v588_v8 = vld [vmem:[#allocation8 + $0x5c8] sm:$0xff] }
  0x89   :  { %v519_v11 = vld [vmem:[#allocation8 + $0x3a0] sm:$0xff]  ;;  %1970 = vmatpush2.bf16.msra.mxu0 %v6664_v14  ;;  %v452_v14 = vld [vmem:[#allocation8 + $0x188] sm:$0xff] }
  0x8a   :  { %v643_v12 = vld [vmem:[#allocation8 + $0x780] sm:$0xff]  ;;  %v6657_v16 = vcombine.high %v515_v10, %v519_v11  ;;  %2010 = vmatprep.subr.bf16.mxu1 %v6793_v9  ;;  %v6656_v22 = vcombine.low %v515_v10, %v519_v11  ;;  %v592_v9 = vld [vmem:[#allocation8 + $0x5e8] sm:$0xff] }
  0x8b   :  { %v647_v13 = vld [vmem:[#allocation8 + $0x7a0] sm:$0xff]  ;;  %2011 = vmatpush2.bf16.msra.mxu1 %v6792_v15  ;;  %v456_v15 = vld [vmem:[#allocation8 + $0x1a8] sm:$0xff] }
  0x8c   :  { %v6785_v17 = vcombine.high %v643_v12, %v647_v13  ;;  %v507_v18 = vld [vmem:[#allocation8 + $0x340] sm:$0xff]  ;;  %1971 = vmatprep.subr.bf16.mxu0 %v6657_v16  ;;  %v6784_v23 = vcombine.low %v643_v12, %v647_v13  ;;  %v6603_v12 = vcombine.high %v460_v6, %v464_v7  ;;  %v6731_v13 = vcombine.high %v588_v8, %v592_v9 }
  0x8d   :  { %v511_v19 = vld [vmem:[#allocation8 + $0x360] sm:$0xff]  ;;  %1972 = vmatpush2.bf16.msra.mxu0 %v6656_v22  ;;  %v8255_v16 = vcombine.low %v8239_v53, %v8239_v53  ;;  %v6595_v22 = vcombine.high %v452_v14, %v456_v15  ;;  %v6594_v53 = vcombine.low %v452_v14, %v456_v15 }
  0x8e   :  { %v635_v20 = vld [vmem:[#allocation8 + $0x740] sm:$0xff]  ;;  %v6649_v24 = vcombine.high %v507_v18, %v511_v19  ;;  %2012 = vmatprep.subr.bf16.mxu1 %v6785_v17  ;;  %v6648_v30 = vcombine.low %v507_v18, %v511_v19  ;;  %v580_v17 = vld [vmem:[#allocation8 + $0x588] sm:$0xff]  ;;  %v8259_v19 = vcombine.low %v8241_v54, %v8241_v54 }
  0x8f   :  { %v639_v21 = vld [vmem:[#allocation8 + $0x760] sm:$0xff]  ;;  %2013 = vmatpush2.bf16.msra.mxu1 %v6784_v23  ;;  %v584_v18 = vld [vmem:[#allocation8 + $0x5a8] sm:$0xff] }
  0x90   :  { %v6777_v25 = vcombine.high %v635_v20, %v639_v21  ;;  %v499_v26 = vld [vmem:[#allocation8 + $0x300] sm:$0xff]  ;;  %1973 = vmatprep.subr.bf16.mxu0 %v6649_v24  ;;  %v6776_v31 = vcombine.low %v635_v20, %v639_v21  ;;  %v6602_v20 = vcombine.low %v460_v6, %v464_v7  ;;  %v6730_v21 = vcombine.low %v588_v8, %v592_v9  ;;  %v444_v23 = vld [vmem:[#allocation8 + $0x148] sm:$0xff] }
  0x91   :  { %v503_v27 = vld [vmem:[#allocation8 + $0x320] sm:$0xff]  ;;  %1974 = vmatpush2.bf16.msra.mxu0 %v6648_v30  ;;  %v448_v24 = vld [vmem:[#allocation8 + $0x168] sm:$0xff]  ;;  %v6722_v54 = vcombine.low %v580_v17, %v584_v18 }
  0x92   :  { %v627_v28 = vld [vmem:[#allocation8 + $0x700] sm:$0xff]  ;;  %v6641_v32 = vcombine.high %v499_v26, %v503_v27  ;;  %2014 = vmatprep.subr.bf16.mxu1 %v6777_v25  ;;  %v6640_v38 = vcombine.low %v499_v26, %v503_v27  ;;  %v572_v25 = vld [vmem:[#allocation8 + $0x548] sm:$0xff]  ;;  %v6723_v26 = vcombine.high %v580_v17, %v584_v18 }
  0x93   :  { %v631_v29 = vld [vmem:[#allocation8 + $0x720] sm:$0xff]  ;;  %2015 = vmatpush2.bf16.msra.mxu1 %v6776_v31  ;;  %v576_v27 = vld [vmem:[#allocation8 + $0x568] sm:$0xff] }
  0x94   :  { %v6769_v33 = vcombine.high %v627_v28, %v631_v29  ;;  %v491_v34 = vld [vmem:[#allocation8 + $0x2c0] sm:$0xff]  ;;  %1975 = vmatprep.subr.bf16.mxu0 %v6641_v32  ;;  %v6768_v39 = vcombine.low %v627_v28, %v631_v29  ;;  %v6587_v28 = vcombine.high %v444_v23, %v448_v24  ;;  %v436_v29 = vld [vmem:[#allocation8 + $0x108] sm:$0xff]  ;;  %v6715_v32 = vcombine.high %v572_v25, %v576_v27 }
  0x95   :  { %v495_v35 = vld [vmem:[#allocation8 + $0x2e0] sm:$0xff]  ;;  %1976 = vmatpush2.bf16.msra.mxu0 %v6640_v38  ;;  %v440_v30 = vld [vmem:[#allocation8 + $0x128] sm:$0xff] }
  0x96   :  { %v619_v36 = vld [vmem:[#allocation8 + $0x6c0] sm:$0xff]  ;;  %v6633_v40 = vcombine.high %v491_v34, %v495_v35  ;;  %2016 = vmatprep.subr.bf16.mxu1 %v6769_v33  ;;  %v6632_v46 = vcombine.low %v491_v34, %v495_v35  ;;  %v564_v31 = vld [vmem:[#allocation8 + $0x508] sm:$0xff]  ;;  %v6586_v34 = vcombine.low %v444_v23, %v448_v24  ;;  %v6714_v35 = vcombine.low %v572_v25, %v576_v27 }
  0x97   :  { %v623_v37 = vld [vmem:[#allocation8 + $0x6e0] sm:$0xff]  ;;  %2017 = vmatpush2.bf16.msra.mxu1 %v6768_v39  ;;  %v568_v33 = vld [vmem:[#allocation8 + $0x528] sm:$0xff] }
  0x98   :  { %v6761_v41 = vcombine.high %v619_v36, %v623_v37  ;;  %v483_v42 = vld [vmem:[#allocation8 + $0x280] sm:$0xff]  ;;  %1977 = vmatprep.subr.bf16.mxu0 %v6633_v40  ;;  %v6760_v47 = vcombine.low %v619_v36, %v623_v37  ;;  %v6579_v36 = vcombine.high %v436_v29, %v440_v30  ;;  %v428_v37 = vld [vmem:[#allocation8 + $0xc8] sm:$0xff]  ;;  %v6707_v40 = vcombine.high %v564_v31, %v568_v33 }
  0x99   :  { %v487_v43 = vld [vmem:[#allocation8 + $0x2a0] sm:$0xff]  ;;  %1978 = vmatpush2.bf16.msra.mxu0 %v6632_v46  ;;  %v432_v38 = vld [vmem:[#allocation8 + $0xe8] sm:$0xff] }
  0x9a   :  { %v611_v44 = vld [vmem:[#allocation8 + $0x680] sm:$0xff]  ;;  %v6625_v48 = vcombine.high %v483_v42, %v487_v43  ;;  %2018 = vmatprep.subr.bf16.mxu1 %v6761_v41  ;;  %v6624_v56 = vcombine.low %v483_v42, %v487_v43  ;;  %v556_v39 = vld [vmem:[#allocation8 + $0x4c8] sm:$0xff]  ;;  %v6578_v42 = vcombine.low %v436_v29, %v440_v30  ;;  %v6706_v43 = vcombine.low %v564_v31, %v568_v33 }
  0x9b   :  { %v615_v45 = vld [vmem:[#allocation8 + $0x6a0] sm:$0xff]  ;;  %2019 = vmatpush2.bf16.msra.mxu1 %v6760_v47  ;;  %v560_v41 = vld [vmem:[#allocation8 + $0x4e8] sm:$0xff] }
  0x9c   :  { %v6753_v49 = vcombine.high %v611_v44, %v615_v45  ;;  %v475_v50 = vld [vmem:[#allocation8 + $0x240] sm:$0xff]  ;;  %1979 = vmatprep.subr.bf16.mxu0 %v6625_v48  ;;  %v6752_v57 = vcombine.low %v611_v44, %v615_v45  ;;  %v6571_v44 = vcombine.high %v428_v37, %v432_v38  ;;  %v420_v45 = vld [vmem:[#allocation8 + $0x88] sm:$0xff]  ;;  %v6699_v48 = vcombine.high %v556_v39, %v560_v41 }
  0x9d   :  { %v479_v51 = vld [vmem:[#allocation8 + $0x260] sm:$0xff]  ;;  %1980 = vmatpush2.bf16.msra.mxu0 %v6624_v56  ;;  %v424_v46 = vld [vmem:[#allocation8 + $0xa8] sm:$0xff] }
  0x9e   :  { %v603_v52 = vld [vmem:[#allocation8 + $0x640] sm:$0xff]  ;;  %v6617_v60 = vcombine.high %v475_v50, %v479_v51  ;;  %2020 = vmatprep.subr.bf16.mxu1 %v6753_v49  ;;  %v6616_v2 = vcombine.low %v475_v50, %v479_v51  ;;  %v548_v47 = vld [vmem:[#allocation8 + $0x488] sm:$0xff]  ;;  %v6570_v50 = vcombine.low %v428_v37, %v432_v38  ;;  %v6698_v51 = vcombine.low %v556_v39, %v560_v41 }
  0x9f   :  { %v607_v55 = vld [vmem:[#allocation8 + $0x660] sm:$0xff]  ;;  %2021 = vmatpush2.bf16.msra.mxu1 %v6752_v57  ;;  %v552_v49 = vld [vmem:[#allocation8 + $0x4a8] sm:$0xff] }
  0xa0   :  { %v6745_v61 = vcombine.high %v603_v52, %v607_v55  ;;  %v467_v62 = vld [vmem:[#allocation8 + $0x200] sm:$0xff]  ;;  %1981 = vmatprep.subr.bf16.mxu0 %v6617_v60  ;;  %v6744_v3 = vcombine.low %v603_v52, %v607_v55  ;;  %v6563_v52 = vcombine.high %v420_v45, %v424_v46  ;;  %v412_v55 = vld [vmem:[#allocation8 + $0x48] sm:$0xff]  ;;  %v6691_v60 = vcombine.high %v548_v47, %v552_v49 }
  0xa1   :  { %v471_v63 = vld [vmem:[#allocation8 + $0x220] sm:$0xff]  ;;  %1982 = vmatpush2.bf16.msra.mxu0 %v6616_v2  ;;  %v416_v56 = vld [vmem:[#allocation8 + $0x68] sm:$0xff] }
  0xa2   :  { %v595_v0 = vld [vmem:[#allocation8 + $0x600] sm:$0xff]  ;;  %v6609_v4 = vcombine.high %v467_v62, %v471_v63  ;;  %2022 = vmatprep.subr.bf16.mxu1 %v6745_v61  ;;  %v6608_v10 = vcombine.low %v467_v62, %v471_v63  ;;  %v540_v57 = vld [vmem:[#allocation8 + $0x448] sm:$0xff]  ;;  %v6562_v62 = vcombine.low %v420_v45, %v424_v46  ;;  %v6690_v63 = vcombine.low %v548_v47, %v552_v49 }
  0xa3   :  { %v599_v1 = vld [vmem:[#allocation8 + $0x620] sm:$0xff]  ;;  %2023 = vmatpush2.bf16.msra.mxu1 %v6744_v3  ;;  %v544_v61 = vld [vmem:[#allocation8 + $0x468] sm:$0xff]  ;;  %v6554_v6 = vcombine.low %v412_v55, %v416_v56 }
  0xa4   :  { %v6737_v5 = vcombine.high %v595_v0, %v599_v1  ;;  %1983 = vmatprep.subr.bf16.mxu0 %v6609_v4  ;;  %v6736_v11 = vcombine.low %v595_v0, %v599_v1  ;;  %v6555_v0 = vcombine.high %v412_v55, %v416_v56  ;;  %v404_v1 = vld [vmem:[#allocation8 + $0x8] sm:$0xff]  ;;  %v6683_v4 = vcombine.high %v540_v57, %v544_v61 }
  0xa5   :  { %1984 = vmatpush2.bf16.msra.mxu0 %v6608_v10  ;;  %v408_v2 = vld [vmem:[#allocation8 + $0x28] sm:$0xff]  ;;  %v6682_v7 = vcombine.low %v540_v57, %v544_v61 }
  0xa6   :  { %2024 = vmatprep.subr.bf16.mxu1 %v6737_v5  ;;  %2035 = vmatprep.subr.bf16.mxu0 %v6603_v12  ;;  %v532_v3 = vld [vmem:[#allocation8 + $0x408] sm:$0xff]  ;;  %v6547_v8 = vcombine.high %v404_v1, %v408_v2  ;;  %v6546_v14 = vcombine.low %v404_v1, %v408_v2 }
  0xa7   :  { %2025 = vmatpush2.bf16.msra.mxu1 %v6736_v11  ;;  %v536_v5 = vld [vmem:[#allocation8 + $0x428] sm:$0xff] }
  0xa8   :  { %2076 = vmatprep.subr.bf16.mxu1 %v6731_v13  ;;  %1986 = vmatmul.mubr.bf16.vlgmr.msra.gmra.mxu0 %v8255_v16  ;;  %v524_v9 = vld [vmem:[#allocation8 + $0x3c8] sm:$0xff]  ;;  %v6675_v12 = vcombine.high %v532_v3, %v536_v5  ;;  %v6674_v15 = vcombine.low %v532_v3, %v536_v5 }
  0xa9   :  { %2036 = vmatpush1.bf16.msra.mxu0 %v6602_v20  ;;  %2067 = vmatprep.mubr.bf16.mxu0 %v8245_v58  ;;  %v528_v10 = vld [vmem:[#allocation8 + $0x3e8] sm:$0xff] }
  0xaa   :  { %2027 = vmatmul.mubr.bf16.vlgmr.msra.gmra.mxu1 %v8259_v19  ;;  %2037 = vmatprep.subr.bf16.mxu0 %v6595_v22  ;;  %v652_v11 = vld [vmem:[#allocation8 + $0x7c8] sm:$0xff]  ;;  %v6667_v17 = vcombine.high %v524_v9, %v528_v10  ;;  %v6666_v24 = vcombine.low %v524_v9, %v528_v10 }
  0xab   :  { %2077 = vmatpush1.bf16.msra.mxu1 %v6730_v21  ;;  %2108 = vmatprep.mubr.bf16.mxu1 %v8249_v59  ;;  %v656_v13 = vld [vmem:[#allocation8 + $0x7e8] sm:$0xff] }
  0xac   :  { %2078 = vmatprep.subr.bf16.mxu1 %v6723_v26  ;;  %v516_v18 = vld [vmem:[#allocation8 + $0x388] sm:$0xff]  ;;  %v6795_v22 = vcombine.high %v652_v11, %v656_v13  ;;  %v6794_v25 = vcombine.low %v652_v11, %v656_v13  ;;  %v461_v13 = vld [vmem:[#allocation8 + $0x1d0] sm:$0xff] }
  0xad   :  { %2038 = vmatpush1.bf16.msra.mxu0 %v6594_v53  ;;  %v520_v20 = vld [vmem:[#allocation8 + $0x3a8] sm:$0xff] }
  0xae   :  { %2039 = vmatprep.subr.bf16.mxu0 %v6587_v28  ;;  %v644_v21 = vld [vmem:[#allocation8 + $0x788] sm:$0xff]  ;;  %v6659_v26 = vcombine.high %v516_v18, %v520_v20  ;;  %v6658_v30 = vcombine.low %v516_v18, %v520_v20  ;;  %v593_v18 = vld [vmem:[#allocation8 + $0x5f0] sm:$0xff] }
  0xaf   :  { %2079 = vmatpush1.bf16.msra.mxu1 %v6722_v54  ;;  %v648_v23 = vld [vmem:[#allocation8 + $0x7a8] sm:$0xff] }
  0xb0   :  { %2080 = vmatprep.subr.bf16.mxu1 %v6715_v32  ;;  %v508_v27 = vld [vmem:[#allocation8 + $0x348] sm:$0xff]  ;;  %v6787_v28 = vcombine.high %v644_v21, %v648_v23  ;;  %v6786_v31 = vcombine.low %v644_v21, %v648_v23  ;;  %v453_v23 = vld [vmem:[#allocation8 + $0x190] sm:$0xff] }
  0xb1   :  { %2040 = vmatpush1.bf16.msra.mxu0 %v6586_v34  ;;  %v512_v53 = vld [vmem:[#allocation8 + $0x368] sm:$0xff] }
  0xb2   :  { %2041 = vmatprep.subr.bf16.mxu0 %v6579_v36  ;;  %v636_v54 = vld [vmem:[#allocation8 + $0x748] sm:$0xff]  ;;  %v6651_v32 = vcombine.high %v508_v27, %v512_v53  ;;  %v6650_v38 = vcombine.low %v508_v27, %v512_v53  ;;  %v585_v27 = vld [vmem:[#allocation8 + $0x5b0] sm:$0xff] }
  0xb3   :  { %2081 = vmatpush1.bf16.msra.mxu1 %v6714_v35  ;;  %v640_v29 = vld [vmem:[#allocation8 + $0x768] sm:$0xff] }
  0xb4   :  { %2082 = vmatprep.subr.bf16.mxu1 %v6707_v40  ;;  %v500_v33 = vld [vmem:[#allocation8 + $0x308] sm:$0xff]  ;;  %v6779_v36 = vcombine.high %v636_v54, %v640_v29  ;;  %v6778_v39 = vcombine.low %v636_v54, %v640_v29  ;;  %v445_v29 = vld [vmem:[#allocation8 + $0x150] sm:$0xff] }
  0xb5   :  { %2042 = vmatpush1.bf16.msra.mxu0 %v6578_v42  ;;  %v504_v34 = vld [vmem:[#allocation8 + $0x328] sm:$0xff] }
  0xb6   :  { %2043 = vmatprep.subr.bf16.mxu0 %v6571_v44  ;;  %v628_v35 = vld [vmem:[#allocation8 + $0x708] sm:$0xff]  ;;  %v6643_v40 = vcombine.high %v500_v33, %v504_v34  ;;  %v6642_v46 = vcombine.low %v500_v33, %v504_v34  ;;  %v577_v33 = vld [vmem:[#allocation8 + $0x570] sm:$0xff] }
  0xb7   :  { %2083 = vmatpush1.bf16.msra.mxu1 %v6706_v43  ;;  %v632_v37 = vld [vmem:[#allocation8 + $0x728] sm:$0xff] }
  0xb8   :  { %2084 = vmatprep.subr.bf16.mxu1 %v6699_v48  ;;  %v492_v41 = vld [vmem:[#allocation8 + $0x2c8] sm:$0xff]  ;;  %v6771_v44 = vcombine.high %v628_v35, %v632_v37  ;;  %v6770_v47 = vcombine.low %v628_v35, %v632_v37  ;;  %v437_v37 = vld [vmem:[#allocation8 + $0x110] sm:$0xff] }
  0xb9   :  { %2044 = vmatpush1.bf16.msra.mxu0 %v6570_v50  ;;  %v496_v42 = vld [vmem:[#allocation8 + $0x2e8] sm:$0xff] }
  0xba   :  { %2045 = vmatprep.subr.bf16.mxu0 %v6563_v52  ;;  %v620_v43 = vld [vmem:[#allocation8 + $0x6c8] sm:$0xff]  ;;  %v6635_v48 = vcombine.high %v492_v41, %v496_v42  ;;  %v6634_v56 = vcombine.low %v492_v41, %v496_v42  ;;  %v569_v41 = vld [vmem:[#allocation8 + $0x530] sm:$0xff] }
  0xbb   :  { %2085 = vmatpush1.bf16.msra.mxu1 %v6698_v51  ;;  %v624_v45 = vld [vmem:[#allocation8 + $0x6e8] sm:$0xff] }
  0xbc   :  { %2086 = vmatprep.subr.bf16.mxu1 %v6691_v60  ;;  %v484_v49 = vld [vmem:[#allocation8 + $0x288] sm:$0xff]  ;;  %v6763_v52 = vcombine.high %v620_v43, %v624_v45  ;;  %v6762_v57 = vcombine.low %v620_v43, %v624_v45  ;;  %v429_v45 = vld [vmem:[#allocation8 + $0xd0] sm:$0xff] }
  0xbd   :  { %2046 = vmatpush1.bf16.msra.mxu0 %v6562_v62  ;;  %v488_v50 = vld [vmem:[#allocation8 + $0x2a8] sm:$0xff] }
  0xbe   :  { %2047 = vmatprep.subr.bf16.mxu0 %v6555_v0  ;;  %v612_v51 = vld [vmem:[#allocation8 + $0x688] sm:$0xff]  ;;  %v6627_v60 = vcombine.high %v484_v49, %v488_v50  ;;  %v6626_v2 = vcombine.low %v484_v49, %v488_v50  ;;  %v561_v49 = vld [vmem:[#allocation8 + $0x4f0] sm:$0xff] }
  0xbf   :  { %2087 = vmatpush1.bf16.msra.mxu1 %v6690_v63  ;;  %v616_v55 = vld [vmem:[#allocation8 + $0x6a8] sm:$0xff] }
  0xc0   :  { %2088 = vmatprep.subr.bf16.mxu1 %v6683_v4  ;;  %v476_v61 = vld [vmem:[#allocation8 + $0x248] sm:$0xff]  ;;  %v6755_v0 = vcombine.high %v612_v51, %v616_v55  ;;  %v6754_v3 = vcombine.low %v612_v51, %v616_v55  ;;  %v421_v55 = vld [vmem:[#allocation8 + $0x90] sm:$0xff] }
  0xc1   :  { %2048 = vmatpush1.bf16.msra.mxu0 %v6554_v6  ;;  %v480_v62 = vld [vmem:[#allocation8 + $0x268] sm:$0xff] }
  0xc2   :  { %2049 = vmatprep.subr.bf16.mxu0 %v6547_v8  ;;  %v604_v63 = vld [vmem:[#allocation8 + $0x648] sm:$0xff]  ;;  %v6619_v4 = vcombine.high %v476_v61, %v480_v62  ;;  %v6618_v10 = vcombine.low %v476_v61, %v480_v62  ;;  %v553_v61 = vld [vmem:[#allocation8 + $0x4b0] sm:$0xff] }
  0xc3   :  { %2089 = vmatpush1.bf16.msra.mxu1 %v6682_v7  ;;  %v608_v1 = vld [vmem:[#allocation8 + $0x668] sm:$0xff] }
  0xc4   :  { %2090 = vmatprep.subr.bf16.mxu1 %v6675_v12  ;;  %v468_v5 = vld [vmem:[#allocation8 + $0x208] sm:$0xff]  ;;  %v6747_v8 = vcombine.high %v604_v63, %v608_v1  ;;  %v6746_v11 = vcombine.low %v604_v63, %v608_v1  ;;  %v413_v1 = vld [vmem:[#allocation8 + $0x50] sm:$0xff] }
  0xc5   :  { %2050 = vmatpush1.bf16.msra.mxu0 %v6546_v14  ;;  %v472_v6 = vld [vmem:[#allocation8 + $0x228] sm:$0xff]  ;;  %v465_v14 = vld [vmem:[#allocation8 + $0x1f0] sm:$0xff] }
  0xc6   :  { %2051 = vmatprep.subr.bf16.mxu0 %v6667_v17  ;;  %v596_v7 = vld [vmem:[#allocation8 + $0x608] sm:$0xff]  ;;  %v6611_v12 = vcombine.high %v468_v5, %v472_v6  ;;  %v6610_v20 = vcombine.low %v468_v5, %v472_v6  ;;  %v6604_v53 = vcombine.low %v461_v13, %v465_v14  ;;  %v545_v5 = vld [vmem:[#allocation8 + $0x470] sm:$0xff] }
  0xc7   :  { %2091 = vmatpush1.bf16.msra.mxu1 %v6674_v15  ;;  %v600_v9 = vld [vmem:[#allocation8 + $0x628] sm:$0xff]  ;;  %v589_v15 = vld [vmem:[#allocation8 + $0x5d0] sm:$0xff] }
  0xc8   :  { %2092 = vmatprep.subr.bf16.mxu1 %v6795_v22  ;;  %v6739_v17 = vcombine.high %v596_v7, %v600_v9  ;;  %v6738_v21 = vcombine.low %v596_v7, %v600_v9  ;;  %v6605_v22 = vcombine.high %v461_v13, %v465_v14  ;;  %v6732_v54 = vcombine.low %v589_v15, %v593_v18  ;;  %v405_v9 = vld [vmem:[#allocation8 + $0x10] sm:$0xff] }
  0xc9   :  { %2052 = vmatpush2.bf16.msra.mxu0 %v6666_v24  ;;  %v457_v24 = vld [vmem:[#allocation8 + $0x1b0] sm:$0xff] }
  0xca   :  { %2053 = vmatprep.subr.bf16.mxu0 %v6659_v26  ;;  %v6733_v26 = vcombine.high %v589_v15, %v593_v18  ;;  %v6596_v34 = vcombine.low %v453_v23, %v457_v24  ;;  %v537_v13 = vld [vmem:[#allocation8 + $0x430] sm:$0xff] }
  0xcb   :  { %2093 = vmatpush2.bf16.msra.mxu1 %v6794_v25  ;;  %v581_v25 = vld [vmem:[#allocation8 + $0x590] sm:$0xff] }
  0xcc   :  { %2094 = vmatprep.subr.bf16.mxu1 %v6787_v28  ;;  %v6597_v28 = vcombine.high %v453_v23, %v457_v24  ;;  %v6724_v35 = vcombine.low %v581_v25, %v585_v27  ;;  %v525_v18 = vld [vmem:[#allocation8 + $0x3d0] sm:$0xff] }
  0xcd   :  { %2054 = vmatpush2.bf16.msra.mxu0 %v6658_v30  ;;  %v449_v30 = vld [vmem:[#allocation8 + $0x170] sm:$0xff] }
  0xce   :  { %2055 = vmatprep.subr.bf16.mxu0 %v6651_v32  ;;  %v6725_v32 = vcombine.high %v581_v25, %v585_v27  ;;  %v6588_v42 = vcombine.low %v445_v29, %v449_v30  ;;  %v657_v23 = vld [vmem:[#allocation8 + $0x7f0] sm:$0xff] }
  0xcf   :  { %2095 = vmatpush2.bf16.msra.mxu1 %v6786_v31  ;;  %v573_v31 = vld [vmem:[#allocation8 + $0x550] sm:$0xff] }
  0xd0   :  { %2096 = vmatprep.subr.bf16.mxu1 %v6779_v36  ;;  %v6589_v36 = vcombine.high %v445_v29, %v449_v30  ;;  %v6716_v43 = vcombine.low %v573_v31, %v577_v33  ;;  %v517_v27 = vld [vmem:[#allocation8 + $0x390] sm:$0xff] }
  0xd1   :  { %2056 = vmatpush2.bf16.msra.mxu0 %v6650_v38  ;;  %v441_v38 = vld [vmem:[#allocation8 + $0x130] sm:$0xff] }
  0xd2   :  { %2057 = vmatprep.subr.bf16.mxu0 %v6643_v40  ;;  %v6717_v40 = vcombine.high %v573_v31, %v577_v33  ;;  %v6580_v50 = vcombine.low %v437_v37, %v441_v38  ;;  %v649_v29 = vld [vmem:[#allocation8 + $0x7b0] sm:$0xff] }
  0xd3   :  { %2097 = vmatpush2.bf16.msra.mxu1 %v6778_v39  ;;  %v565_v39 = vld [vmem:[#allocation8 + $0x510] sm:$0xff] }
  0xd4   :  { %2098 = vmatprep.subr.bf16.mxu1 %v6771_v44  ;;  %v6581_v44 = vcombine.high %v437_v37, %v441_v38  ;;  %v6708_v51 = vcombine.low %v565_v39, %v569_v41  ;;  %v509_v33 = vld [vmem:[#allocation8 + $0x350] sm:$0xff] }
  0xd5   :  { %2058 = vmatpush2.bf16.msra.mxu0 %v6642_v46  ;;  %v433_v46 = vld [vmem:[#allocation8 + $0xf0] sm:$0xff] }
  0xd6   :  { %2059 = vmatprep.subr.bf16.mxu0 %v6635_v48  ;;  %v6709_v48 = vcombine.high %v565_v39, %v569_v41  ;;  %v6572_v62 = vcombine.low %v429_v45, %v433_v46  ;;  %v641_v37 = vld [vmem:[#allocation8 + $0x770] sm:$0xff] }
  0xd7   :  { %2099 = vmatpush2.bf16.msra.mxu1 %v6770_v47  ;;  %v557_v47 = vld [vmem:[#allocation8 + $0x4d0] sm:$0xff] }
  0xd8   :  { %2100 = vmatprep.subr.bf16.mxu1 %v6763_v52  ;;  %v6573_v52 = vcombine.high %v429_v45, %v433_v46  ;;  %v6700_v63 = vcombine.low %v557_v47, %v561_v49  ;;  %v501_v41 = vld [vmem:[#allocation8 + $0x310] sm:$0xff] }
  0xd9   :  { %2060 = vmatpush2.bf16.msra.mxu0 %v6634_v56  ;;  %v425_v56 = vld [vmem:[#allocation8 + $0xb0] sm:$0xff] }
  0xda   :  { %2061 = vmatprep.subr.bf16.mxu0 %v6627_v60  ;;  %v6701_v60 = vcombine.high %v557_v47, %v561_v49  ;;  %v6564_v6 = vcombine.low %v421_v55, %v425_v56  ;;  %v633_v45 = vld [vmem:[#allocation8 + $0x730] sm:$0xff] }
  0xdb   :  { %2101 = vmatpush2.bf16.msra.mxu1 %v6762_v57  ;;  %v549_v57 = vld [vmem:[#allocation8 + $0x490] sm:$0xff] }
  0xdc   :  { %2102 = vmatprep.subr.bf16.mxu1 %v6755_v0  ;;  %v6565_v0 = vcombine.high %v421_v55, %v425_v56  ;;  %v6692_v7 = vcombine.low %v549_v57, %v553_v61  ;;  %v493_v49 = vld [vmem:[#allocation8 + $0x2d0] sm:$0xff] }
  0xdd   :  { %2062 = vmatpush2.bf16.msra.mxu0 %v6626_v2  ;;  %v417_v2 = vld [vmem:[#allocation8 + $0x70] sm:$0xff] }
  0xde   :  { %2063 = vmatprep.subr.bf16.mxu0 %v6619_v4  ;;  %v6693_v4 = vcombine.high %v549_v57, %v553_v61  ;;  %v6556_v14 = vcombine.low %v413_v1, %v417_v2  ;;  %v625_v55 = vld [vmem:[#allocation8 + $0x6f0] sm:$0xff] }
  0xdf   :  { %2103 = vmatpush2.bf16.msra.mxu1 %v6754_v3  ;;  %v541_v3 = vld [vmem:[#allocation8 + $0x450] sm:$0xff] }
  0xe0   :  { %2104 = vmatprep.subr.bf16.mxu1 %v6747_v8  ;;  %v6557_v8 = vcombine.high %v413_v1, %v417_v2  ;;  %v6684_v15 = vcombine.low %v541_v3, %v545_v5  ;;  %v485_v61 = vld [vmem:[#allocation8 + $0x290] sm:$0xff] }
  0xe1   :  { %2064 = vmatpush2.bf16.msra.mxu0 %v6618_v10  ;;  %v409_v10 = vld [vmem:[#allocation8 + $0x30] sm:$0xff] }
  0xe2   :  { %2065 = vmatprep.subr.bf16.mxu0 %v6611_v12  ;;  %v6685_v12 = vcombine.high %v541_v3, %v545_v5  ;;  %v6548_v24 = vcombine.low %v405_v9, %v409_v10  ;;  %v617_v1 = vld [vmem:[#allocation8 + $0x6b0] sm:$0xff] }
  0xe3   :  { %2105 = vmatpush2.bf16.msra.mxu1 %v6746_v11  ;;  %v533_v11 = vld [vmem:[#allocation8 + $0x410] sm:$0xff] }
  0xe4   :  { %2106 = vmatprep.subr.bf16.mxu1 %v6739_v17  ;;  %v6549_v17 = vcombine.high %v405_v9, %v409_v10  ;;  %v6676_v25 = vcombine.low %v533_v11, %v537_v13  ;;  %v477_v5 = vld [vmem:[#allocation8 + $0x250] sm:$0xff] }
  0xe5   :  { %2066 = vmatpush2.bf16.msra.mxu0 %v6610_v20  ;;  %v529_v20 = vld [vmem:[#allocation8 + $0x3f0] sm:$0xff] }
  0xe6   :  { %2117 = vmatprep.subr.bf16.mxu0 %v6605_v22  ;;  %v6677_v22 = vcombine.high %v533_v11, %v537_v13  ;;  %v6668_v30 = vcombine.low %v525_v18, %v529_v20  ;;  %v609_v9 = vld [vmem:[#allocation8 + $0x670] sm:$0xff] }
  0xe7   :  { %2107 = vmatpush2.bf16.msra.mxu1 %v6738_v21  ;;  %v653_v21 = vld [vmem:[#allocation8 + $0x7d0] sm:$0xff] }
  0xe8   :  { %2158 = vmatprep.subr.bf16.mxu1 %v6733_v26  ;;  %2068 = vmatmul.mubr.bf16.vlgmr.msra.gmra.mxu0 %v8255_v16  ;;  %v6669_v26 = vcombine.high %v525_v18, %v529_v20  ;;  %v6796_v31 = vcombine.low %v653_v21, %v657_v23  ;;  %v469_v13 = vld [vmem:[#allocation8 + $0x210] sm:$0xff] }
  0xe9   :  { %2118 = vmatpush1.bf16.msra.mxu0 %v6604_v53  ;;  %2149 = vmatprep.mubr.bf16.mxu0 %v8245_v58  ;;  %v521_v53 = vld [vmem:[#allocation8 + $0x3b0] sm:$0xff] }
  0xea   :  { %2109 = vmatmul.mubr.bf16.vlgmr.msra.gmra.mxu1 %v8259_v19  ;;  %2119 = vmatprep.subr.bf16.mxu0 %v6597_v28  ;;  %v6797_v28 = vcombine.high %v653_v21, %v657_v23  ;;  %v6660_v38 = vcombine.low %v517_v27, %v521_v53  ;;  %v601_v18 = vld [vmem:[#allocation8 + $0x630] sm:$0xff]  ;;  %v462_v23 = vld [vmem:[#allocation8 + $0x1d8] sm:$0xff] }
  0xeb   :  { %2159 = vmatpush1.bf16.msra.mxu1 %v6732_v54  ;;  %2190 = vmatprep.mubr.bf16.mxu1 %v8249_v59  ;;  %v645_v54 = vld [vmem:[#allocation8 + $0x790] sm:$0xff] }
  0xec   :  { %2160 = vmatprep.subr.bf16.mxu1 %v6725_v32  ;;  %v6661_v32 = vcombine.high %v517_v27, %v521_v53  ;;  %v6788_v39 = vcombine.low %v645_v54, %v649_v29  ;;  %v594_v27 = vld [vmem:[#allocation8 + $0x5f8] sm:$0xff] }
  0xed   :  { %2120 = vmatpush1.bf16.msra.mxu0 %v6596_v34  ;;  %v513_v34 = vld [vmem:[#allocation8 + $0x370] sm:$0xff] }
  0xee   :  { %2121 = vmatprep.subr.bf16.mxu0 %v6589_v36  ;;  %v6789_v36 = vcombine.high %v645_v54, %v649_v29  ;;  %v6652_v46 = vcombine.low %v509_v33, %v513_v34  ;;  %v454_v29 = vld [vmem:[#allocation8 + $0x198] sm:$0xff] }
  0xef   :  { %2161 = vmatpush1.bf16.msra.mxu1 %v6724_v35  ;;  %v637_v35 = vld [vmem:[#allocation8 + $0x750] sm:$0xff] }
  0xf0   :  { %2162 = vmatprep.subr.bf16.mxu1 %v6717_v40  ;;  %v6653_v40 = vcombine.high %v509_v33, %v513_v34  ;;  %v6780_v47 = vcombine.low %v637_v35, %v641_v37  ;;  %v586_v33 = vld [vmem:[#allocation8 + $0x5b8] sm:$0xff] }
  0xf1   :  { %2122 = vmatpush1.bf16.msra.mxu0 %v6588_v42  ;;  %v505_v42 = vld [vmem:[#allocation8 + $0x330] sm:$0xff] }
  0xf2   :  { %2123 = vmatprep.subr.bf16.mxu0 %v6581_v44  ;;  %v6781_v44 = vcombine.high %v637_v35, %v641_v37  ;;  %v6644_v56 = vcombine.low %v501_v41, %v505_v42  ;;  %v446_v37 = vld [vmem:[#allocation8 + $0x158] sm:$0xff] }
  0xf3   :  { %2163 = vmatpush1.bf16.msra.mxu1 %v6716_v43  ;;  %v629_v43 = vld [vmem:[#allocation8 + $0x710] sm:$0xff] }
  0xf4   :  { %2164 = vmatprep.subr.bf16.mxu1 %v6709_v48  ;;  %v6645_v48 = vcombine.high %v501_v41, %v505_v42  ;;  %v6772_v57 = vcombine.low %v629_v43, %v633_v45  ;;  %v578_v41 = vld [vmem:[#allocation8 + $0x578] sm:$0xff] }
  0xf5   :  { %2124 = vmatpush1.bf16.msra.mxu0 %v6580_v50  ;;  %v497_v50 = vld [vmem:[#allocation8 + $0x2f0] sm:$0xff] }
  0xf6   :  { %2125 = vmatprep.subr.bf16.mxu0 %v6573_v52  ;;  %v6773_v52 = vcombine.high %v629_v43, %v633_v45  ;;  %v6636_v2 = vcombine.low %v493_v49, %v497_v50  ;;  %v438_v45 = vld [vmem:[#allocation8 + $0x118] sm:$0xff] }
  0xf7   :  { %2165 = vmatpush1.bf16.msra.mxu1 %v6708_v51  ;;  %v621_v51 = vld [vmem:[#allocation8 + $0x6d0] sm:$0xff] }
  0xf8   :  { %2166 = vmatprep.subr.bf16.mxu1 %v6701_v60  ;;  %v6637_v60 = vcombine.high %v493_v49, %v497_v50  ;;  %v6764_v3 = vcombine.low %v621_v51, %v625_v55  ;;  %v570_v49 = vld [vmem:[#allocation8 + $0x538] sm:$0xff] }
  0xf9   :  { %2126 = vmatpush1.bf16.msra.mxu0 %v6572_v62  ;;  %v489_v62 = vld [vmem:[#allocation8 + $0x2b0] sm:$0xff] }
  0xfa   :  { %2127 = vmatprep.subr.bf16.mxu0 %v6565_v0  ;;  %v6765_v0 = vcombine.high %v621_v51, %v625_v55  ;;  %v6628_v10 = vcombine.low %v485_v61, %v489_v62  ;;  %v430_v55 = vld [vmem:[#allocation8 + $0xd8] sm:$0xff] }
  0xfb   :  { %2167 = vmatpush1.bf16.msra.mxu1 %v6700_v63  ;;  %v613_v63 = vld [vmem:[#allocation8 + $0x690] sm:$0xff] }
  0xfc   :  { %2168 = vmatprep.subr.bf16.mxu1 %v6693_v4  ;;  %v6629_v4 = vcombine.high %v485_v61, %v489_v62  ;;  %v6756_v11 = vcombine.low %v613_v63, %v617_v1  ;;  %v562_v61 = vld [vmem:[#allocation8 + $0x4f8] sm:$0xff] }
  0xfd   :  { %2128 = vmatpush1.bf16.msra.mxu0 %v6564_v6  ;;  %v481_v6 = vld [vmem:[#allocation8 + $0x270] sm:$0xff] }
  0xfe   :  { %2129 = vmatprep.subr.bf16.mxu0 %v6557_v8  ;;  %v6757_v8 = vcombine.high %v613_v63, %v617_v1  ;;  %v6620_v20 = vcombine.low %v477_v5, %v481_v6  ;;  %v550_v1 = vld [vmem:[#allocation8 + $0x498] sm:$0xff] }
  0xff   :  { %2169 = vmatpush1.bf16.msra.mxu1 %v6692_v7  ;;  %v605_v7 = vld [vmem:[#allocation8 + $0x650] sm:$0xff] }
 0x100   :  { %2170 = vmatprep.subr.bf16.mxu1 %v6685_v12  ;;  %v6621_v12 = vcombine.high %v477_v5, %v481_v6  ;;  %v6748_v21 = vcombine.low %v605_v7, %v609_v9 }
 0x101   :  { %2130 = vmatpush1.bf16.msra.mxu0 %v6556_v14  ;;  %v473_v14 = vld [vmem:[#allocation8 + $0x230] sm:$0xff] }
 0x102   :  { %2131 = vmatprep.subr.bf16.mxu0 %v6549_v17  ;;  %v6749_v17 = vcombine.high %v605_v7, %v609_v9  ;;  %v6612_v53 = vcombine.low %v469_v13, %v473_v14  ;;  %v414_v7 = vld [vmem:[#allocation8 + $0x58] sm:$0xff] }
 0x103   :  { %2171 = vmatpush1.bf16.msra.mxu1 %v6684_v15  ;;  %v597_v15 = vld [vmem:[#allocation8 + $0x610] sm:$0xff]  ;;  %v542_v9 = vld [vmem:[#allocation8 + $0x458] sm:$0xff] }
 0x104   :  { %2172 = vmatprep.subr.bf16.mxu1 %v6677_v22  ;;  %v6613_v22 = vcombine.high %v469_v13, %v473_v14  ;;  %v6740_v54 = vcombine.low %v597_v15, %v601_v18 }
 0x105   :  { %2132 = vmatpush1.bf16.msra.mxu0 %v6548_v24  ;;  %v466_v24 = vld [vmem:[#allocation8 + $0x1f8] sm:$0xff] }
 0x106   :  { %2133 = vmatprep.subr.bf16.mxu0 %v6669_v26  ;;  %v6741_v26 = vcombine.high %v597_v15, %v601_v18  ;;  %v6606_v34 = vcombine.low %v462_v23, %v466_v24  ;;  %v406_v15 = vld [vmem:[#allocation8 + $0x18] sm:$0xff] }
 0x107   :  { %2173 = vmatpush1.bf16.msra.mxu1 %v6676_v25  ;;  %v590_v25 = vld [vmem:[#allocation8 + $0x5d8] sm:$0xff] }
 0x108   :  { %2174 = vmatprep.subr.bf16.mxu1 %v6797_v28  ;;  %v6607_v28 = vcombine.high %v462_v23, %v466_v24  ;;  %v6734_v35 = vcombine.low %v590_v25, %v594_v27  ;;  %v534_v18 = vld [vmem:[#allocation8 + $0x418] sm:$0xff] }
 0x109   :  { %2134 = vmatpush2.bf16.msra.mxu0 %v6668_v30  ;;  %v458_v30 = vld [vmem:[#allocation8 + $0x1b8] sm:$0xff] }
 0x10a   :  { %2135 = vmatprep.subr.bf16.mxu0 %v6661_v32  ;;  %v6735_v32 = vcombine.high %v590_v25, %v594_v27  ;;  %v6598_v42 = vcombine.low %v454_v29, %v458_v30  ;;  %v526_v25 = vld [vmem:[#allocation8 + $0x3d8] sm:$0xff] }
 0x10b   :  { %2175 = vmatpush2.bf16.msra.mxu1 %v6796_v31  ;;  %v582_v31 = vld [vmem:[#allocation8 + $0x598] sm:$0xff] }
 0x10c   :  { %2176 = vmatprep.subr.bf16.mxu1 %v6789_v36  ;;  %v6599_v36 = vcombine.high %v454_v29, %v458_v30  ;;  %v6726_v43 = vcombine.low %v582_v31, %v586_v33  ;;  %v654_v27 = vld [vmem:[#allocation8 + $0x7d8] sm:$0xff] }
 0x10d   :  { %2136 = vmatpush2.bf16.msra.mxu0 %v6660_v38  ;;  %v450_v38 = vld [vmem:[#allocation8 + $0x178] sm:$0xff] }
 0x10e   :  { %2137 = vmatprep.subr.bf16.mxu0 %v6653_v40  ;;  %v6727_v40 = vcombine.high %v582_v31, %v586_v33  ;;  %v6590_v50 = vcombine.low %v446_v37, %v450_v38  ;;  %v518_v31 = vld [vmem:[#allocation8 + $0x398] sm:$0xff] }
 0x10f   :  { %2177 = vmatpush2.bf16.msra.mxu1 %v6788_v39  ;;  %v574_v39 = vld [vmem:[#allocation8 + $0x558] sm:$0xff] }
 0x110   :  { %2178 = vmatprep.subr.bf16.mxu1 %v6781_v44  ;;  %v6591_v44 = vcombine.high %v446_v37, %v450_v38  ;;  %v6718_v51 = vcombine.low %v574_v39, %v578_v41  ;;  %v646_v33 = vld [vmem:[#allocation8 + $0x798] sm:$0xff] }
 0x111   :  { %2138 = vmatpush2.bf16.msra.mxu0 %v6652_v46  ;;  %v442_v46 = vld [vmem:[#allocation8 + $0x138] sm:$0xff] }
 0x112   :  { %2139 = vmatprep.subr.bf16.mxu0 %v6645_v48  ;;  %v6719_v48 = vcombine.high %v574_v39, %v578_v41  ;;  %v6582_v62 = vcombine.low %v438_v45, %v442_v46  ;;  %v510_v39 = vld [vmem:[#allocation8 + $0x358] sm:$0xff] }
 0x113   :  { %2179 = vmatpush2.bf16.msra.mxu1 %v6780_v47  ;;  %v566_v47 = vld [vmem:[#allocation8 + $0x518] sm:$0xff] }
 0x114   :  { %2180 = vmatprep.subr.bf16.mxu1 %v6773_v52  ;;  %v6583_v52 = vcombine.high %v438_v45, %v442_v46  ;;  %v6710_v63 = vcombine.low %v566_v47, %v570_v49  ;;  %v638_v41 = vld [vmem:[#allocation8 + $0x758] sm:$0xff] }
 0x115   :  { %2140 = vmatpush2.bf16.msra.mxu0 %v6644_v56  ;;  %v434_v56 = vld [vmem:[#allocation8 + $0xf8] sm:$0xff] }
 0x116   :  { %2141 = vmatprep.subr.bf16.mxu0 %v6637_v60  ;;  %v6711_v60 = vcombine.high %v566_v47, %v570_v49  ;;  %v502_v47 = vld [vmem:[#allocation8 + $0x318] sm:$0xff] }
 0x117   :  { %2181 = vmatpush2.bf16.msra.mxu1 %v6772_v57  ;;  %v558_v57 = vld [vmem:[#allocation8 + $0x4d8] sm:$0xff] }
 0x118   :  { %2182 = vmatprep.subr.bf16.mxu1 %v6765_v0  ;;  %v422_v0 = vld [vmem:[#allocation8 + $0x98] sm:$0xff]  ;;  %v6702_v5 = vcombine.low %v558_v57, %v562_v61 }
 0x119   :  { %2142 = vmatpush2.bf16.msra.mxu0 %v6636_v2  ;;  %v6703_v2 = vcombine.high %v558_v57, %v562_v61  ;;  %v630_v49 = vld [vmem:[#allocation8 + $0x718] sm:$0xff] }
 0x11a   :  { %2143 = vmatprep.subr.bf16.mxu0 %v6629_v4  ;;  %v6574_v4 = vcombine.low %v430_v55, %v434_v56  ;;  %v494_v57 = vld [vmem:[#allocation8 + $0x2d8] sm:$0xff] }
 0x11b   :  { %2183 = vmatpush2.bf16.msra.mxu1 %v6764_v3  ;;  %v554_v3 = vld [vmem:[#allocation8 + $0x4b8] sm:$0xff] }
 0x11c   :  { %2184 = vmatprep.subr.bf16.mxu1 %v6757_v8  ;;  %v418_v8 = vld [vmem:[#allocation8 + $0x78] sm:$0xff]  ;;  %v6694_v13 = vcombine.low %v550_v1, %v554_v3 }
 0x11d   :  { %2144 = vmatpush2.bf16.msra.mxu0 %v6628_v10  ;;  %v6695_v10 = vcombine.high %v550_v1, %v554_v3  ;;  %v6559_v14 = vcombine.high %v414_v7, %v418_v8  ;;  %v622_v61 = vld [vmem:[#allocation8 + $0x6d8] sm:$0xff] }
 0x11e   :  { %2145 = vmatprep.subr.bf16.mxu0 %v6621_v12  ;;  %v486_v1 = vld [vmem:[#allocation8 + $0x298] sm:$0xff] }
 0x11f   :  { %2185 = vmatpush2.bf16.msra.mxu1 %v6756_v11  ;;  %v546_v11 = vld [vmem:[#allocation8 + $0x478] sm:$0xff] }
 0x120   :  { %2186 = vmatprep.subr.bf16.mxu1 %v6749_v17  ;;  %v410_v17 = vld [vmem:[#allocation8 + $0x38] sm:$0xff]  ;;  %v6686_v23 = vcombine.low %v542_v9, %v546_v11 }
 0x121   :  { %2146 = vmatpush2.bf16.msra.mxu0 %v6620_v20  ;;  %v6687_v20 = vcombine.high %v542_v9, %v546_v11  ;;  %v6551_v24 = vcombine.high %v406_v15, %v410_v17  ;;  %v614_v3 = vld [vmem:[#allocation8 + $0x698] sm:$0xff] }
 0x122   :  { %2147 = vmatprep.subr.bf16.mxu0 %v6613_v22  ;;  %v6558_v22 = vcombine.low %v414_v7, %v418_v8  ;;  %v482_v11 = vld [vmem:[#allocation8 + $0x278] sm:$0xff] }
 0x123   :  { %2187 = vmatpush2.bf16.msra.mxu1 %v6748_v21  ;;  %v538_v21 = vld [vmem:[#allocation8 + $0x438] sm:$0xff] }
 0x124   :  { %2188 = vmatprep.subr.bf16.mxu1 %v6741_v26  ;;  %v530_v26 = vld [vmem:[#allocation8 + $0x3f8] sm:$0xff]  ;;  %v6678_v29 = vcombine.low %v534_v18, %v538_v21 }
 0x125   :  { %2148 = vmatpush2.bf16.msra.mxu0 %v6612_v53  ;;  %v6679_v53 = vcombine.high %v534_v18, %v538_v21  ;;  %v6671_v30 = vcombine.high %v526_v25, %v530_v26  ;;  %v474_v21 = vld [vmem:[#allocation8 + $0x238] sm:$0xff] }
 0x126   :  { %2199 = vmatprep.subr.bf16.mxu0 %v6607_v28  ;;  %v6550_v28 = vcombine.low %v406_v15, %v410_v17 }
 0x127   :  { %2189 = vmatpush2.bf16.msra.mxu1 %v6740_v54  ;;  %v658_v54 = vld [vmem:[#allocation8 + $0x7f8] sm:$0xff] }
 0x128   :  { %2240 = vmatprep.subr.bf16.mxu1 %v6735_v32  ;;  %2150 = vmatmul.mubr.bf16.vlgmr.msra.gmra.mxu0 %v8255_v16  ;;  %v522_v32 = vld [vmem:[#allocation8 + $0x3b8] sm:$0xff]  ;;  %v6798_v37 = vcombine.low %v654_v27, %v658_v54 }
 0x129   :  { %2200 = vmatpush1.bf16.msra.mxu0 %v6606_v34  ;;  %2231 = vmatprep.mubr.bf16.mxu0 %v8245_v58  ;;  %v6575_v58 = vcombine.high %v430_v55, %v434_v56  ;;  %v6799_v34 = vcombine.high %v654_v27, %v658_v54  ;;  %v6663_v38 = vcombine.high %v518_v31, %v522_v32  ;;  %v205_v54 = vld [vmem:[#allocation7 + $0x1e0] sm:$0xff] }
 0x12a   :  { %2191 = vmatmul.mubr.bf16.vlgmr.msra.gmra.mxu1 %v8259_v19  ;;  %2201 = vmatprep.subr.bf16.mxu0 %v6599_v36  ;;  %v6670_v36 = vcombine.low %v526_v25, %v530_v26 }
 0x12b   :  { %2241 = vmatpush1.bf16.msra.mxu1 %v6734_v35  ;;  %2272 = vmatprep.mubr.bf16.mxu1 %v8249_v59  ;;  %v426_v59 = vld [vmem:[#allocation8 + $0xb8] sm:$0xff] }
 0x12c   :  { %2242 = vmatprep.subr.bf16.mxu1 %v6727_v40  ;;  %v6567_v6 = vcombine.high %v422_v0, %v426_v59  ;;  %v6566_v12 = vcombine.low %v422_v0, %v426_v59  ;;  %v650_v35 = vld [vmem:[#allocation8 + $0x7b8] sm:$0xff] }
 0x12d   :  { %2202 = vmatpush1.bf16.msra.mxu0 %v6598_v42  ;;  %v514_v40 = vld [vmem:[#allocation8 + $0x378] sm:$0xff]  ;;  %v6791_v42 = vcombine.high %v646_v33, %v650_v35  ;;  %v6790_v45 = vcombine.low %v646_v33, %v650_v35  ;;  %v197_v35 = vld [vmem:[#allocation7 + $0x1a0] sm:$0xff] }
 0x12e   :  { %2203 = vmatprep.subr.bf16.mxu0 %v6591_v44  ;;  %v6662_v44 = vcombine.low %v518_v31, %v522_v32  ;;  %v6655_v46 = vcombine.high %v510_v39, %v514_v40 }
 0x12f   :  { %2243 = vmatpush1.bf16.msra.mxu1 %v6726_v43  ;;  %v642_v43 = vld [vmem:[#allocation8 + $0x778] sm:$0xff] }
 0x130   :  { %2244 = vmatprep.subr.bf16.mxu1 %v6719_v48  ;;  %v506_v48 = vld [vmem:[#allocation8 + $0x338] sm:$0xff]  ;;  %v6782_v55 = vcombine.low %v638_v41, %v642_v43 }
 0x131   :  { %2204 = vmatpush1.bf16.msra.mxu0 %v6590_v50  ;;  %v6783_v50 = vcombine.high %v638_v41, %v642_v43  ;;  %v6647_v56 = vcombine.high %v502_v47, %v506_v48 }
 0x132   :  { %2205 = vmatprep.subr.bf16.mxu0 %v6583_v52  ;;  %v6654_v52 = vcombine.low %v510_v39, %v514_v40  ;;  %v8275_v40 = vld [vmem:[#allocation2 + $0x8] sm:$0xff] }
 0x133   :  { %2245 = vmatpush1.bf16.msra.mxu1 %v6718_v51  ;;  %v634_v51 = vld [vmem:[#allocation8 + $0x738] sm:$0xff] }
 0x134   :  { %2246 = vmatprep.subr.bf16.mxu1 %v6711_v60  ;;  %v498_v60 = vld [vmem:[#allocation8 + $0x2f8] sm:$0xff]  ;;  %v6774_v0 = vcombine.low %v630_v49, %v634_v51 }
 0x135   :  { %2206 = vmatpush1.bf16.msra.mxu0 %v6582_v62  ;;  %v6775_v62 = vcombine.high %v630_v49, %v634_v51  ;;  %v6639_v59 = vcombine.high %v494_v57, %v498_v60  ;;  %v317_v49 = vld [vmem:[#allocation7 + $0x560] sm:$0xff] }
 0x136   :  { %2207 = vmatprep.subr.bf16.mxu0 %v6575_v58  ;;  %v6646_v58 = vcombine.low %v502_v47, %v506_v48  ;;  %v313_v48 = vld [vmem:[#allocation7 + $0x540] sm:$0xff] }
 0x137   :  { %2247 = vmatpush1.bf16.msra.mxu1 %v6710_v63  ;;  %v626_v63 = vld [vmem:[#allocation8 + $0x6f8] sm:$0xff] }
 0x138   :  { %2248 = vmatprep.subr.bf16.mxu1 %v6703_v2  ;;  %v490_v2 = vld [vmem:[#allocation8 + $0x2b8] sm:$0xff]  ;;  %v6766_v7 = vcombine.low %v622_v61, %v626_v63 }
 0x139   :  { %2208 = vmatpush1.bf16.msra.mxu0 %v6574_v4  ;;  %v6767_v4 = vcombine.high %v622_v61, %v626_v63  ;;  %v6631_v8 = vcombine.high %v486_v1, %v490_v2  ;;  %v181_v63 = vld [vmem:[#allocation7 + $0x120] sm:$0xff] }
 0x13a   :  { %2209 = vmatprep.subr.bf16.mxu0 %v6567_v6  ;;  %v6638_v6 = vcombine.low %v494_v57, %v498_v60 }
 0x13b   :  { %2249 = vmatpush1.bf16.msra.mxu1 %v6702_v5  ;;  %v618_v5 = vld [vmem:[#allocation8 + $0x6b8] sm:$0xff] }
 0x13c   :  { %2250 = vmatprep.subr.bf16.mxu1 %v6695_v10  ;;  %v6759_v9 = vcombine.high %v614_v3, %v618_v5  ;;  %v478_v10 = vld [vmem:[#allocation8 + $0x258] sm:$0xff]  ;;  %v6758_v15 = vcombine.low %v614_v3, %v618_v5 }
 0x13d   :  { %2210 = vmatpush1.bf16.msra.mxu0 %v6566_v12  ;;  %v606_v12 = vld [vmem:[#allocation8 + $0x658] sm:$0xff]  ;;  %v6623_v17 = vcombine.high %v478_v10, %v482_v11 }
 0x13e   :  { %2211 = vmatprep.subr.bf16.mxu0 %v6559_v14  ;;  %v6630_v14 = vcombine.low %v486_v1, %v490_v2 }
 0x13f   :  { %2251 = vmatpush1.bf16.msra.mxu1 %v6694_v13  ;;  %v610_v13 = vld [vmem:[#allocation8 + $0x678] sm:$0xff] }
 0x140   :  { %2252 = vmatprep.subr.bf16.mxu1 %v6687_v20  ;;  %v6751_v18 = vcombine.high %v606_v12, %v610_v13  ;;  %v470_v20 = vld [vmem:[#allocation8 + $0x218] sm:$0xff]  ;;  %v6750_v25 = vcombine.low %v606_v12, %v610_v13 }
 0x141   :  { %2212 = vmatpush1.bf16.msra.mxu0 %v6558_v22  ;;  %v598_v22 = vld [vmem:[#allocation8 + $0x618] sm:$0xff]  ;;  %v6615_v26 = vcombine.high %v470_v20, %v474_v21 }
 0x142   :  { %2213 = vmatprep.subr.bf16.mxu0 %v6551_v24  ;;  %v6622_v24 = vcombine.low %v478_v10, %v482_v11  ;;  %v297_v10 = vld [vmem:[#allocation7 + $0x4c0] sm:$0xff] }
 0x143   :  { %2253 = vmatpush1.bf16.msra.mxu1 %v6686_v23  ;;  %v602_v23 = vld [vmem:[#allocation8 + $0x638] sm:$0xff]  ;;  %v301_v11 = vld [vmem:[#allocation7 + $0x4e0] sm:$0xff] }
 0x144   :  { %2254 = vmatprep.subr.bf16.mxu1 %v6679_v53  ;;  %v6743_v27 = vcombine.high %v598_v22, %v602_v23  ;;  %v201_v53 = vld [vmem:[#allocation7 + $0x1c0] sm:$0xff]  ;;  %v6742_v31 = vcombine.low %v598_v22, %v602_v23  ;;  %v6956_v23 = vcombine.low %v297_v10, %v301_v11 }
 0x145   :  { %2214 = vmatpush1.bf16.msra.mxu0 %v6550_v28  ;;  %v329_v28 = vld [vmem:[#allocation7 + $0x5c0] sm:$0xff]  ;;  %v6861_v32 = vcombine.high %v201_v53, %v205_v54  ;;  %v6860_v39 = vcombine.low %v201_v53, %v205_v54 }
 0x146   :  { %2215 = vmatprep.subr.bf16.mxu0 %v6671_v30  ;;  %v6614_v30 = vcombine.low %v470_v20, %v474_v21  ;;  %v289_v20 = vld [vmem:[#allocation7 + $0x480] sm:$0xff] }
 0x147   :  { %2255 = vmatpush1.bf16.msra.mxu1 %v6678_v29  ;;  %v333_v29 = vld [vmem:[#allocation7 + $0x5e0] sm:$0xff] }
 0x148   :  { %2256 = vmatprep.subr.bf16.mxu1 %v6799_v34  ;;  %v6989_v33 = vcombine.high %v329_v28, %v333_v29  ;;  %v193_v34 = vld [vmem:[#allocation7 + $0x180] sm:$0xff]  ;;  %v6988_v41 = vcombine.low %v329_v28, %v333_v29 }
 0x149   :  { %2216 = vmatpush2.bf16.msra.mxu0 %v6670_v36  ;;  %v321_v36 = vld [vmem:[#allocation7 + $0x580] sm:$0xff] }
 0x14a   :  { %2217 = vmatprep.subr.bf16.mxu0 %v6663_v38  ;;  %v8273_v38 = vld [vmem:[#allocation2] sm:$0xff] }
 0x14b   :  { %2257 = vmatpush2.bf16.msra.mxu1 %v6798_v37  ;;  %v325_v37 = vld [vmem:[#allocation7 + $0x5a0] sm:$0xff] }
 0x14c   :  { %2258 = vmatprep.subr.bf16.mxu1 %v6791_v42  ;;  %v6853_v42 = vcombine.high %v193_v34, %v197_v35  ;;  %v6981_v43 = vcombine.high %v321_v36, %v325_v37  ;;  %v6980_v57 = vcombine.low %v321_v36, %v325_v37  ;;  %v293_v21 = vld [vmem:[#allocation7 + $0x4a0] sm:$0xff] }
 0x14d   :  { %2218 = vmatpush2.bf16.msra.mxu0 %v6662_v44  ;;  %v185_v44 = vld [vmem:[#allocation7 + $0x140] sm:$0xff]  ;;  %v6948_v29 = vcombine.low %v289_v20, %v293_v21 }
 0x14e   :  { %2219 = vmatprep.subr.bf16.mxu0 %v6655_v46  ;;  %v8279_v46 = vcombine.high %v8273_v38, %v8273_v38  ;;  %v281_v53 = vld [vmem:[#allocation7 + $0x440] sm:$0xff] }
 0x14f   :  { %2259 = vmatpush2.bf16.msra.mxu1 %v6790_v45  ;;  %v189_v45 = vld [vmem:[#allocation7 + $0x160] sm:$0xff] }
 0x150   :  { %2260 = vmatprep.subr.bf16.mxu1 %v6783_v50  ;;  %v8284_v50 = vcombine.high %v8275_v40, %v8275_v40  ;;  %v6845_v60 = vcombine.high %v185_v44, %v189_v45  ;;  %v6844_v2 = vcombine.low %v185_v44, %v189_v45  ;;  %v285_v54 = vld [vmem:[#allocation7 + $0x460] sm:$0xff] }
 0x151   :  { %2220 = vmatpush2.bf16.msra.mxu0 %v6654_v52  ;;  %v6852_v52 = vcombine.low %v193_v34, %v197_v35  ;;  %v273_v34 = vld [vmem:[#allocation7 + $0x400] sm:$0xff]  ;;  %v6940_v37 = vcombine.low %v281_v53, %v285_v54 }
 0x152   :  { %2221 = vmatprep.subr.bf16.mxu0 %v6647_v56  ;;  %v277_v35 = vld [vmem:[#allocation7 + $0x420] sm:$0xff] }
 0x153   :  { %2261 = vmatpush2.bf16.msra.mxu1 %v6782_v55  ;;  %v393_v44 = vld [vmem:[#allocation7 + $0x7c0] sm:$0xff] }
 0x154   :  { %2262 = vmatprep.subr.bf16.mxu1 %v6775_v62  ;;  %v177_v62 = vld [vmem:[#allocation7 + $0x100] sm:$0xff] }
 0x155   :  { %2222 = vmatpush2.bf16.msra.mxu0 %v6646_v58  ;;  %v6837_v5 = vcombine.high %v177_v62, %v181_v63  ;;  %v6836_v12 = vcombine.low %v177_v62, %v181_v63  ;;  %v397_v45 = vld [vmem:[#allocation7 + $0x7e0] sm:$0xff] }
 0x156   :  { %2223 = vmatprep.subr.bf16.mxu0 %v6639_v59  ;;  %v309_v59 = vld [vmem:[#allocation7 + $0x520] sm:$0xff] }
 0x157   :  { %2263 = vmatpush2.bf16.msra.mxu1 %v6774_v0 }
 0x158   :  { %2264 = vmatprep.subr.bf16.mxu1 %v6767_v4  ;;  %v6972_v4 = vcombine.low %v313_v48, %v317_v49 }
 0x159   :  { %2224 = vmatpush2.bf16.msra.mxu0 %v6638_v6 }
 0x15a   :  { %2225 = vmatprep.subr.bf16.mxu0 %v6631_v8  ;;  %v169_v8 = vld [vmem:[#allocation7 + $0xc0] sm:$0xff] }
 0x15b   :  { %2265 = vmatpush2.bf16.msra.mxu1 %v6766_v7 }
 0x15c   :  { %2266 = vmatprep.subr.bf16.mxu1 %v6759_v9  ;;  %v173_v9 = vld [vmem:[#allocation7 + $0xe0] sm:$0xff] }
 0x15d   :  { %2226 = vmatpush2.bf16.msra.mxu0 %v6630_v14  ;;  %v6829_v14 = vcombine.high %v169_v8, %v173_v9  ;;  %v6828_v22 = vcombine.low %v169_v8, %v173_v9  ;;  %v369_v8 = vld [vmem:[#allocation7 + $0x700] sm:$0xff] }
 0x15e   :  { %2227 = vmatprep.subr.bf16.mxu0 %v6623_v17  ;;  %v161_v17 = vld [vmem:[#allocation7 + $0x80] sm:$0xff] }
 0x15f   :  { %2267 = vmatpush2.bf16.msra.mxu1 %v6758_v15  ;;  %v6957_v15 = vcombine.high %v297_v10, %v301_v11  ;;  %v373_v9 = vld [vmem:[#allocation7 + $0x720] sm:$0xff] }
 0x160   :  { %2268 = vmatprep.subr.bf16.mxu1 %v6751_v18  ;;  %v165_v18 = vld [vmem:[#allocation7 + $0xa0] sm:$0xff] }
 0x161   :  { %2228 = vmatpush2.bf16.msra.mxu0 %v6622_v24  ;;  %v6821_v24 = vcombine.high %v161_v17, %v165_v18  ;;  %v6820_v28 = vcombine.low %v161_v17, %v165_v18  ;;  %v361_v17 = vld [vmem:[#allocation7 + $0x6c0] sm:$0xff] }
 0x162   :  { %2229 = vmatprep.subr.bf16.mxu0 %v6615_v26  ;;  %v153_v26 = vld [vmem:[#allocation7 + $0x40] sm:$0xff] }
 0x163   :  { %2269 = vmatpush2.bf16.msra.mxu1 %v6750_v25  ;;  %v6949_v25 = vcombine.high %v289_v20, %v293_v21  ;;  %v365_v18 = vld [vmem:[#allocation7 + $0x6e0] sm:$0xff]  ;;  %v7028_v21 = vcombine.low %v369_v8, %v373_v9 }
 0x164   :  { %2270 = vmatprep.subr.bf16.mxu1 %v6743_v27  ;;  %v157_v27 = vld [vmem:[#allocation7 + $0x60] sm:$0xff] }
 0x165   :  { %2230 = vmatpush2.bf16.msra.mxu0 %v6614_v30  ;;  %v6813_v30 = vcombine.high %v153_v26, %v157_v27  ;;  %v6812_v36 = vcombine.low %v153_v26, %v157_v27  ;;  %v353_v26 = vld [vmem:[#allocation7 + $0x680] sm:$0xff] }
 0x166   :  { %3575 = vmatprep.subr.bf16.mxu0 %v6861_v32  ;;  %v145_v32 = vld [vmem:[#allocation7] sm:$0xff] }
 0x167   :  { %2271 = vmatpush2.bf16.msra.mxu1 %v6742_v31  ;;  %v6941_v31 = vcombine.high %v281_v53, %v285_v54  ;;  %v357_v27 = vld [vmem:[#allocation7 + $0x6a0] sm:$0xff]  ;;  %v7020_v54 = vcombine.low %v361_v17, %v365_v18 }
 0x168   :  { %3616 = vmatprep.subr.bf16.mxu1 %v6989_v33  ;;  %v1987_v47 = vpop.f32.mrf.mxu0  ;;  %2232 = vmatmul.mubr.bf16.vlgmr.msra.gmra.mxu0 %v8255_v16  ;;  %v6973_v16 = vcombine.high %v313_v48, %v317_v49  ;;  %v149_v33 = vld [vmem:[#allocation7 + $0x20] sm:$0xff]  ;;  %v6932_v48 = vcombine.low %v273_v34, %v277_v35 }
 0x169   :  { %3576 = vmatpush1.bf16.msra.mxu0 %v6860_v39  ;;  %3607 = vmatprep.mubr.bf16.mxu0 %v8279_v46  ;;  %v6805_v39 = vcombine.high %v145_v32, %v149_v33 }
 0x16a   :  { %v2028_v51 = vpop.f32.mrf.mxu1  ;;  %2273 = vmatmul.mubr.bf16.vlgmr.msra.gmra.mxu1 %v8259_v19  ;;  %v1989_v56 = vpop.f32.mrf.mxu0  ;;  %3577 = vmatprep.subr.bf16.mxu0 %v6853_v42  ;;  %v305_v19 = vld [vmem:[#allocation7 + $0x500] sm:$0xff] }
 0x16b   :  { %v8287_v55 = vadd.f32 %v2028_v51, %v1987_v47  ;;  %3617 = vmatpush1.bf16.msra.mxu1 %v6988_v41  ;;  %3648 = vmatprep.mubr.bf16.mxu1 %v8284_v50  ;;  %v6965_v7 = vcombine.high %v305_v19, %v309_v59  ;;  %v6964_v13 = vcombine.low %v305_v19, %v309_v59  ;;  %v265_v42 = vld [vmem:[#allocation7 + $0x3c0] sm:$0xff] }
 0x16c   :  { %v2030_v61 = vpop.f32.mrf.mxu1  ;;  %3618 = vmatprep.subr.bf16.mxu1 %v6981_v43  ;;  %v1991_v0 = vpop.f32.mrf.mxu0  ;;  %v6933_v41 = vcombine.high %v273_v34, %v277_v35  ;;  %v269_v43 = vld [vmem:[#allocation7 + $0x3e0] sm:$0xff]  ;;  %v6804_v47 = vcombine.low %v145_v32, %v149_v33  ;;  %v7053_v51 = vcombine.high %v393_v44, %v397_v45  ;;  %v7012_v35 = vcombine.low %v353_v26, %v357_v27 }
 0x16d   :  { %v8290_v58 = vadd.f32 %v2030_v61, %v1989_v56  ;;  %3578 = vmatpush1.bf16.msra.mxu0 %v6852_v52  ;;  %v6925_v49 = vcombine.high %v265_v42, %v269_v43  ;;  %v257_v52 = vld [vmem:[#allocation7 + $0x380] sm:$0xff]  ;;  %v6924_v61 = vcombine.low %v265_v42, %v269_v43 }
 0x16e   :  { %v2032_v1 = vpop.f32.mrf.mxu1  ;;  %v1992_v3 = vpop.f32.mrf.mxu0  ;;  %3579 = vmatprep.subr.bf16.mxu0 %v6845_v60  ;;  %v261_v56 = vld [vmem:[#allocation7 + $0x3a0] sm:$0xff] }
 0x16f   :  { %3619 = vmatpush1.bf16.msra.mxu1 %v6980_v57  ;;  %v385_v57 = vld [vmem:[#allocation7 + $0x780] sm:$0xff]  ;;  %v6917_v62 = vcombine.high %v257_v52, %v261_v56 }
 0x170   :  { %v2033_v6 = vpop.f32.mrf.mxu1  ;;  %3620 = vmatprep.subr.bf16.mxu1 %v6973_v16  ;;  %v389_v60 = vld [vmem:[#allocation7 + $0x7a0] sm:$0xff]  ;;  %v7052_v16 = vcombine.low %v393_v44, %v397_v45 }
 0x171   :  { %3580 = vmatpush1.bf16.msra.mxu0 %v6844_v2  ;;  %v7045_v63 = vcombine.high %v385_v57, %v389_v60  ;;  %v249_v0 = vld [vmem:[#allocation7 + $0x340] sm:$0xff]  ;;  %v6916_v2 = vcombine.low %v257_v52, %v261_v56  ;;  %v7044_v3 = vcombine.low %v385_v57, %v389_v60  ;;  %v330_v52 = vld [vmem:[#allocation7 + $0x5c8] sm:$0xff] }
 0x172   :  { %3581 = vmatprep.subr.bf16.mxu0 %v6837_v5  ;;  %v253_v19 = vld [vmem:[#allocation7 + $0x360] sm:$0xff]  ;;  %v334_v56 = vld [vmem:[#allocation7 + $0x5e8] sm:$0xff] }
 0x173   :  { %3621 = vmatpush1.bf16.msra.mxu1 %v6972_v4  ;;  %v377_v59 = vld [vmem:[#allocation7 + $0x740] sm:$0xff]  ;;  %v6909_v4 = vcombine.high %v249_v0, %v253_v19  ;;  %v6908_v10 = vcombine.low %v249_v0, %v253_v19  ;;  %v8295_v0 = vcombine.low %v8273_v38, %v8273_v38  ;;  %v322_v19 = vld [vmem:[#allocation7 + $0x588] sm:$0xff] }
 0x174   :  { %3622 = vmatprep.subr.bf16.mxu1 %v6965_v7  ;;  %v381_v1 = vld [vmem:[#allocation7 + $0x760] sm:$0xff]  ;;  %v314_v38 = vld [vmem:[#allocation7 + $0x548] sm:$0xff] }
 0x175   :  { %3582 = vmatpush1.bf16.msra.mxu0 %v6836_v12  ;;  %v7037_v5 = vcombine.high %v377_v59, %v381_v1  ;;  %v241_v6 = vld [vmem:[#allocation7 + $0x300] sm:$0xff]  ;;  %v7036_v11 = vcombine.low %v377_v59, %v381_v1  ;;  %v326_v59 = vld [vmem:[#allocation7 + $0x5a8] sm:$0xff]  ;;  %v8299_v1 = vcombine.low %v8275_v40, %v8275_v40 }
 0x176   :  { %3583 = vmatprep.subr.bf16.mxu0 %v6829_v14  ;;  %v245_v7 = vld [vmem:[#allocation7 + $0x320] sm:$0xff] }
 0x177   :  { %3623 = vmatpush1.bf16.msra.mxu1 %v6964_v13  ;;  %v6901_v12 = vcombine.high %v241_v6, %v245_v7  ;;  %v7029_v13 = vcombine.high %v369_v8, %v373_v9  ;;  %v233_v14 = vld [vmem:[#allocation7 + $0x2c0] sm:$0xff]  ;;  %v6900_v20 = vcombine.low %v241_v6, %v245_v7  ;;  %v186_v6 = vld [vmem:[#allocation7 + $0x148] sm:$0xff] }
 0x178   :  { %3624 = vmatprep.subr.bf16.mxu1 %v6957_v15  ;;  %v237_v15 = vld [vmem:[#allocation7 + $0x2e0] sm:$0xff]  ;;  %v190_v7 = vld [vmem:[#allocation7 + $0x168] sm:$0xff] }
 0x179   :  { %3584 = vmatpush1.bf16.msra.mxu0 %v6828_v22  ;;  %v6893_v22 = vcombine.high %v233_v14, %v237_v15  ;;  %v6892_v53 = vcombine.low %v233_v14, %v237_v15  ;;  %v345_v32 = vld [vmem:[#allocation7 + $0x640] sm:$0xff]  ;;  %v318_v9 = vld [vmem:[#allocation7 + $0x568] sm:$0xff]  ;;  %v6847_v14 = vcombine.high %v186_v6, %v190_v7 }
 0x17a   :  { %3585 = vmatprep.subr.bf16.mxu0 %v6821_v24  ;;  %v225_v24 = vld [vmem:[#allocation7 + $0x280] sm:$0xff] }
 0x17b   :  { %3625 = vmatpush1.bf16.msra.mxu1 %v6956_v23  ;;  %v7021_v23 = vcombine.high %v361_v17, %v365_v18  ;;  %v349_v33 = vld [vmem:[#allocation7 + $0x660] sm:$0xff]  ;;  %v6975_v17 = vcombine.high %v314_v38, %v318_v9  ;;  %v178_v18 = vld [vmem:[#allocation7 + $0x108] sm:$0xff] }
 0x17c   :  { %3626 = vmatprep.subr.bf16.mxu1 %v6949_v25  ;;  %v229_v25 = vld [vmem:[#allocation7 + $0x2a0] sm:$0xff]  ;;  %v7004_v45 = vcombine.low %v345_v32, %v349_v33 }
 0x17d   :  { %3586 = vmatpush1.bf16.msra.mxu0 %v6820_v28  ;;  %v6885_v28 = vcombine.high %v225_v24, %v229_v25  ;;  %v6884_v34 = vcombine.low %v225_v24, %v229_v25  ;;  %v337_v42 = vld [vmem:[#allocation7 + $0x600] sm:$0xff]  ;;  %v310_v24 = vld [vmem:[#allocation7 + $0x528] sm:$0xff] }
 0x17e   :  { %3587 = vmatprep.subr.bf16.mxu0 %v6813_v30  ;;  %v217_v30 = vld [vmem:[#allocation7 + $0x240] sm:$0xff] }
 0x17f   :  { %3627 = vmatpush1.bf16.msra.mxu1 %v6948_v29  ;;  %v7013_v29 = vcombine.high %v353_v26, %v357_v27  ;;  %v341_v43 = vld [vmem:[#allocation7 + $0x620] sm:$0xff]  ;;  %v6846_v26 = vcombine.low %v186_v6, %v190_v7  ;;  %v266_v6 = vld [vmem:[#allocation7 + $0x3c8] sm:$0xff] }
 0x180   :  { %3628 = vmatprep.subr.bf16.mxu1 %v6941_v31  ;;  %v221_v31 = vld [vmem:[#allocation7 + $0x260] sm:$0xff]  ;;  %v6996_v60 = vcombine.low %v337_v42, %v341_v43  ;;  %v270_v7 = vld [vmem:[#allocation7 + $0x3e8] sm:$0xff] }
 0x181   :  { %3588 = vmatpush1.bf16.msra.mxu0 %v6812_v36  ;;  %v6877_v36 = vcombine.high %v217_v30, %v221_v31  ;;  %v6876_v44 = vcombine.low %v217_v30, %v221_v31  ;;  %v170_v30 = vld [vmem:[#allocation7 + $0xc8] sm:$0xff] }
 0x182   :  { %3589 = vmatprep.subr.bf16.mxu0 %v6805_v39  ;;  %v209_v39 = vld [vmem:[#allocation7 + $0x200] sm:$0xff]  ;;  %v174_v31 = vld [vmem:[#allocation7 + $0xe8] sm:$0xff] }
 0x183   :  { %3629 = vmatpush1.bf16.msra.mxu1 %v6940_v37  ;;  %v7005_v37 = vcombine.high %v345_v32, %v349_v33  ;;  %v298_v32 = vld [vmem:[#allocation7 + $0x4c8] sm:$0xff] }
 0x184   :  { %3630 = vmatprep.subr.bf16.mxu1 %v6933_v41  ;;  %v213_v41 = vld [vmem:[#allocation7 + $0x220] sm:$0xff]  ;;  %v302_v33 = vld [vmem:[#allocation7 + $0x4e8] sm:$0xff] }
 0x185   :  { %3590 = vmatpush1.bf16.msra.mxu0 %v6804_v47  ;;  %v6869_v47 = vcombine.high %v209_v39, %v213_v41  ;;  %v6868_v57 = vcombine.low %v209_v39, %v213_v41  ;;  %v162_v39 = vld [vmem:[#allocation7 + $0x88] sm:$0xff] }
 0x186   :  { %3591 = vmatprep.subr.bf16.mxu0 %v6925_v49  ;;  %v202_v49 = vld [vmem:[#allocation7 + $0x1c8] sm:$0xff] }
 0x187   :  { %3631 = vmatpush1.bf16.msra.mxu1 %v6932_v48  ;;  %v6997_v48 = vcombine.high %v337_v42, %v341_v43  ;;  %v166_v41 = vld [vmem:[#allocation7 + $0xa8] sm:$0xff] }
 0x188   :  { %3632 = vmatprep.subr.bf16.mxu1 %v7053_v51  ;;  %v206_v51 = vld [vmem:[#allocation7 + $0x1e8] sm:$0xff] }
 0x189   :  { %3592 = vmatpush2.bf16.msra.mxu0 %v6924_v61  ;;  %v6863_v61 = vcombine.high %v202_v49, %v206_v51  ;;  %v290_v42 = vld [vmem:[#allocation7 + $0x488] sm:$0xff] }
 0x18a   :  { %3593 = vmatprep.subr.bf16.mxu0 %v6917_v62  ;;  %v194_v62 = vld [vmem:[#allocation7 + $0x188] sm:$0xff] }
 0x18b   :  { %3633 = vmatpush2.bf16.msra.mxu1 %v7052_v16  ;;  %v6991_v16 = vcombine.high %v330_v52, %v334_v56  ;;  %v294_v43 = vld [vmem:[#allocation7 + $0x4a8] sm:$0xff] }
 0x18c   :  { %3634 = vmatprep.subr.bf16.mxu1 %v7045_v63  ;;  %v198_v63 = vld [vmem:[#allocation7 + $0x1a8] sm:$0xff] }
 0x18d   :  { %3594 = vmatpush2.bf16.msra.mxu0 %v6916_v2  ;;  %v6862_v2 = vcombine.low %v202_v49, %v206_v51  ;;  %v6854_v40 = vcombine.low %v194_v62, %v198_v63  ;;  %v154_v49 = vld [vmem:[#allocation7 + $0x48] sm:$0xff] }
 0x18e   :  { %3595 = vmatprep.subr.bf16.mxu0 %v6909_v4  ;;  %v6855_v4 = vcombine.high %v194_v62, %v198_v63  ;;  %v158_v51 = vld [vmem:[#allocation7 + $0x68] sm:$0xff] }
 0x18f   :  { %3635 = vmatpush2.bf16.msra.mxu1 %v7044_v3  ;;  %v6990_v3 = vcombine.low %v330_v52, %v334_v56  ;;  %v282_v52 = vld [vmem:[#allocation7 + $0x448] sm:$0xff] }
 0x190   :  { %3636 = vmatprep.subr.bf16.mxu1 %v7037_v5  ;;  %v6983_v5 = vcombine.high %v322_v19, %v326_v59  ;;  %v286_v56 = vld [vmem:[#allocation7 + $0x468] sm:$0xff] }
 0x191   :  { %3596 = vmatpush2.bf16.msra.mxu0 %v6908_v10  ;;  %v146_v62 = vld [vmem:[#allocation7 + $0x8] sm:$0xff] }
 0x192   :  { %3597 = vmatprep.subr.bf16.mxu0 %v6901_v12  ;;  %v150_v63 = vld [vmem:[#allocation7 + $0x28] sm:$0xff] }
 0x193   :  { %3637 = vmatpush2.bf16.msra.mxu1 %v7036_v11 }
 0x194   :  { %3638 = vmatprep.subr.bf16.mxu1 %v7029_v13  ;;  %v6982_v13 = vcombine.low %v322_v19, %v326_v59  ;;  %v274_v19 = vld [vmem:[#allocation7 + $0x408] sm:$0xff] }
 0x195   :  { %3598 = vmatpush2.bf16.msra.mxu0 %v6900_v20  ;;  %v182_v20 = vld [vmem:[#allocation7 + $0x128] sm:$0xff] }
 0x196   :  { %3599 = vmatprep.subr.bf16.mxu0 %v6893_v22  ;;  %v278_v59 = vld [vmem:[#allocation7 + $0x428] sm:$0xff] }
 0x197   :  { %3639 = vmatpush2.bf16.msra.mxu1 %v7028_v21 }
 0x198   :  { %3640 = vmatprep.subr.bf16.mxu1 %v7021_v23  ;;  %v306_v23 = vld [vmem:[#allocation7 + $0x508] sm:$0xff] }
 0x199   :  { %3600 = vmatpush2.bf16.msra.mxu0 %v6892_v53  ;;  %v6974_v53 = vcombine.low %v314_v38, %v318_v9  ;;  %v398_v38 = vld [vmem:[#allocation7 + $0x7e8] sm:$0xff]  ;;  %v6806_v9 = vcombine.low %v146_v62, %v150_v63 }
 0x19a   :  { %3601 = vmatprep.subr.bf16.mxu0 %v6885_v28 }
 0x19b   :  { %3641 = vmatpush2.bf16.msra.mxu1 %v7020_v54  ;;  %v6839_v54 = vcombine.high %v178_v18, %v182_v20 }
 0x19c   :  { %3642 = vmatprep.subr.bf16.mxu1 %v7013_v29  ;;  %v6967_v29 = vcombine.high %v306_v23, %v310_v24 }
 0x19d   :  { %3602 = vmatpush2.bf16.msra.mxu0 %v6884_v34  ;;  %v6838_v34 = vcombine.low %v178_v18, %v182_v20  ;;  %v6926_v18 = vcombine.low %v266_v6, %v270_v7 }
 0x19e   :  { %3603 = vmatprep.subr.bf16.mxu0 %v6877_v36  ;;  %v6831_v36 = vcombine.high %v170_v30, %v174_v31 }
 0x19f   :  { %3643 = vmatpush2.bf16.msra.mxu1 %v7012_v35  ;;  %v6966_v35 = vcombine.low %v306_v23, %v310_v24  ;;  %v250_v24 = vld [vmem:[#allocation7 + $0x348] sm:$0xff] }
 0x1a0   :  { %3644 = vmatprep.subr.bf16.mxu1 %v7005_v37  ;;  %v6959_v37 = vcombine.high %v298_v32, %v302_v33 }
 0x1a1   :  { %3604 = vmatpush2.bf16.msra.mxu0 %v6876_v44  ;;  %v6830_v44 = vcombine.low %v170_v30, %v174_v31  ;;  %v242_v30 = vld [vmem:[#allocation7 + $0x308] sm:$0xff] }
 0x1a2   :  { %3605 = vmatprep.subr.bf16.mxu0 %v6869_v47  ;;  %v6823_v47 = vcombine.high %v162_v39, %v166_v41  ;;  %v246_v31 = vld [vmem:[#allocation7 + $0x328] sm:$0xff] }
 0x1a3   :  { %3645 = vmatpush2.bf16.msra.mxu1 %v7004_v45  ;;  %v6958_v45 = vcombine.low %v298_v32, %v302_v33  ;;  %v370_v32 = vld [vmem:[#allocation7 + $0x708] sm:$0xff] }
 0x1a4   :  { %3646 = vmatprep.subr.bf16.mxu1 %v6997_v48  ;;  %v6951_v48 = vcombine.high %v290_v42, %v294_v43  ;;  %v374_v33 = vld [vmem:[#allocation7 + $0x728] sm:$0xff] }
 0x1a5   :  { %3606 = vmatpush2.bf16.msra.mxu0 %v6868_v57  ;;  %v6822_v57 = vcombine.low %v162_v39, %v166_v41  ;;  %v234_v39 = vld [vmem:[#allocation7 + $0x2c8] sm:$0xff] }
 0x1a6   :  { %3657 = vmatprep.subr.bf16.mxu0 %v6863_v61  ;;  %v6815_v61 = vcombine.high %v154_v49, %v158_v51  ;;  %v238_v41 = vld [vmem:[#allocation7 + $0x2e8] sm:$0xff] }
 0x1a7   :  { %3647 = vmatpush2.bf16.msra.mxu1 %v6996_v60  ;;  %v6950_v60 = vcombine.low %v290_v42, %v294_v43  ;;  %v362_v42 = vld [vmem:[#allocation7 + $0x6c8] sm:$0xff] }
 0x1a8   :  { %3698 = vmatprep.subr.bf16.mxu1 %v6991_v16  ;;  %v2069_v8 = vpop.f32.mrf.mxu0  ;;  %3608 = vmatmul.mubr.bf16.vlgmr.msra.gmra.mxu0 %v8295_v0  ;;  %v6943_v16 = vcombine.high %v282_v52, %v286_v56  ;;  %v366_v43 = vld [vmem:[#allocation7 + $0x6e8] sm:$0xff] }
 0x1a9   :  { %3658 = vmatpush1.bf16.msra.mxu0 %v6862_v2  ;;  %3689 = vmatprep.mubr.bf16.mxu0 %v8279_v46  ;;  %v6814_v2 = vcombine.low %v154_v49, %v158_v51  ;;  %v226_v49 = vld [vmem:[#allocation7 + $0x288] sm:$0xff] }
 0x1aa   :  { %v2110_v10 = vpop.f32.mrf.mxu1  ;;  %3649 = vmatmul.mubr.bf16.vlgmr.msra.gmra.mxu1 %v8299_v1  ;;  %v2071_v12 = vpop.f32.mrf.mxu0  ;;  %3659 = vmatprep.subr.bf16.mxu0 %v6855_v4  ;;  %v6807_v4 = vcombine.high %v146_v62, %v150_v63  ;;  %v230_v51 = vld [vmem:[#allocation7 + $0x2a8] sm:$0xff] }
 0x1ab   :  { %v8303_v11 = vadd.f32 %v2110_v10, %v2069_v8  ;;  %3699 = vmatpush1.bf16.msra.mxu1 %v6990_v3  ;;  %3730 = vmatprep.mubr.bf16.mxu1 %v8284_v50  ;;  %v6942_v3 = vcombine.low %v282_v52, %v286_v56  ;;  %v394_v8 = vld [vmem:[#allocation7 + $0x7c8] sm:$0xff]  ;;  %v6934_v10 = vcombine.low %v274_v19, %v278_v59 }
 0x1ac   :  { %v2112_v15 = vpop.f32.mrf.mxu1  ;;  %3700 = vmatprep.subr.bf16.mxu1 %v6983_v5  ;;  %v2073_v22 = vpop.f32.mrf.mxu0  ;;  %v6935_v5 = vcombine.high %v274_v19, %v278_v59  ;;  %v7054_v20 = vcombine.low %v394_v8, %v398_v38  ;;  %v354_v52 = vld [vmem:[#allocation7 + $0x688] sm:$0xff] }
 0x1ad   :  { %v8306_v21 = vadd.f32 %v2112_v15, %v2071_v12  ;;  %3660 = vmatpush1.bf16.msra.mxu0 %v6854_v40  ;;  %v6927_v40 = vcombine.high %v266_v6, %v270_v7  ;;  %v7055_v12 = vcombine.high %v394_v8, %v398_v38  ;;  %v386_v15 = vld [vmem:[#allocation7 + $0x788] sm:$0xff] }
 0x1ae   :  { %v2114_v25 = vpop.f32.mrf.mxu1  ;;  %v2074_v27 = vpop.f32.mrf.mxu0  ;;  %3661 = vmatprep.subr.bf16.mxu0 %v6847_v14  ;;  %v262_v14 = vld [vmem:[#allocation7 + $0x3a8] sm:$0xff] }
 0x1af   :  { %3701 = vmatpush1.bf16.msra.mxu1 %v6982_v13  ;;  %v258_v13 = vld [vmem:[#allocation7 + $0x388] sm:$0xff] }
 0x1b0   :  { %v2115_v28 = vpop.f32.mrf.mxu1  ;;  %3702 = vmatprep.subr.bf16.mxu1 %v6975_v17  ;;  %v390_v17 = vld [vmem:[#allocation7 + $0x7a8] sm:$0xff]  ;;  %v6919_v22 = vcombine.high %v258_v13, %v262_v14 }
 0x1b1   :  { %3662 = vmatpush1.bf16.msra.mxu0 %v6846_v26  ;;  %v7047_v23 = vcombine.high %v386_v15, %v390_v17  ;;  %v254_v25 = vld [vmem:[#allocation7 + $0x368] sm:$0xff] }
 0x1b2   :  { %3663 = vmatprep.subr.bf16.mxu0 %v6839_v54  ;;  %v378_v26 = vld [vmem:[#allocation7 + $0x748] sm:$0xff]  ;;  %v7046_v54 = vcombine.low %v386_v15, %v390_v17  ;;  %v6911_v28 = vcombine.high %v250_v24, %v254_v25  ;;  %v331_v15 = vld [vmem:[#allocation7 + $0x5d0] sm:$0xff] }
 0x1b3   :  { %3703 = vmatpush1.bf16.msra.mxu1 %v6974_v53  ;;  %v382_v27 = vld [vmem:[#allocation7 + $0x768] sm:$0xff]  ;;  %v6918_v53 = vcombine.low %v258_v13, %v262_v14  ;;  %v203_v13 = vld [vmem:[#allocation7 + $0x1d0] sm:$0xff] }
 0x1b4   :  { %3704 = vmatprep.subr.bf16.mxu1 %v6967_v29  ;;  %v7039_v29 = vcombine.high %v378_v26, %v382_v27  ;;  %v358_v56 = vld [vmem:[#allocation7 + $0x6a8] sm:$0xff]  ;;  %v207_v14 = vld [vmem:[#allocation7 + $0x1f0] sm:$0xff] }
 0x1b5   :  { %3664 = vmatpush1.bf16.msra.mxu0 %v6838_v34  ;;  %v6910_v34 = vcombine.low %v250_v24, %v254_v25  ;;  %v218_v62 = vld [vmem:[#allocation7 + $0x248] sm:$0xff]  ;;  %v335_v17 = vld [vmem:[#allocation7 + $0x5f0] sm:$0xff] }
 0x1b6   :  { %3665 = vmatprep.subr.bf16.mxu0 %v6831_v36  ;;  %v6903_v36 = vcombine.high %v242_v30, %v246_v31  ;;  %v222_v63 = vld [vmem:[#allocation7 + $0x268] sm:$0xff]  ;;  %v195_v24 = vld [vmem:[#allocation7 + $0x190] sm:$0xff] }
 0x1b7   :  { %3705 = vmatpush1.bf16.msra.mxu1 %v6966_v35  ;;  %v7038_v35 = vcombine.low %v378_v26, %v382_v27  ;;  %v346_v19 = vld [vmem:[#allocation7 + $0x648] sm:$0xff]  ;;  %v199_v25 = vld [vmem:[#allocation7 + $0x1b0] sm:$0xff] }
 0x1b8   :  { %3706 = vmatprep.subr.bf16.mxu1 %v6959_v37  ;;  %v7031_v37 = vcombine.high %v370_v32, %v374_v33  ;;  %v350_v59 = vld [vmem:[#allocation7 + $0x668] sm:$0xff]  ;;  %v323_v26 = vld [vmem:[#allocation7 + $0x590] sm:$0xff] }
 0x1b9   :  { %3666 = vmatpush1.bf16.msra.mxu0 %v6830_v44  ;;  %v6902_v44 = vcombine.low %v242_v30, %v246_v31  ;;  %v210_v6 = vld [vmem:[#allocation7 + $0x208] sm:$0xff]  ;;  %v327_v27 = vld [vmem:[#allocation7 + $0x5b0] sm:$0xff] }
 0x1ba   :  { %3667 = vmatprep.subr.bf16.mxu0 %v6823_v47  ;;  %v6895_v47 = vcombine.high %v234_v39, %v238_v41  ;;  %v214_v7 = vld [vmem:[#allocation7 + $0x228] sm:$0xff]  ;;  %v187_v30 = vld [vmem:[#allocation7 + $0x150] sm:$0xff] }
 0x1bb   :  { %3707 = vmatpush1.bf16.msra.mxu1 %v6958_v45  ;;  %v7030_v45 = vcombine.low %v370_v32, %v374_v33  ;;  %v338_v8 = vld [vmem:[#allocation7 + $0x608] sm:$0xff]  ;;  %v191_v31 = vld [vmem:[#allocation7 + $0x170] sm:$0xff] }
 0x1bc   :  { %3708 = vmatprep.subr.bf16.mxu1 %v6951_v48  ;;  %v7023_v48 = vcombine.high %v362_v42, %v366_v43  ;;  %v342_v38 = vld [vmem:[#allocation7 + $0x628] sm:$0xff]  ;;  %v315_v33 = vld [vmem:[#allocation7 + $0x550] sm:$0xff] }
 0x1bd   :  { %3668 = vmatpush1.bf16.msra.mxu0 %v6822_v57  ;;  %v6894_v57 = vcombine.low %v234_v39, %v238_v41  ;;  %v6984_v41 = vcombine.low %v323_v26, %v327_v27 }
 0x1be   :  { %3669 = vmatprep.subr.bf16.mxu0 %v6815_v61  ;;  %v6887_v61 = vcombine.high %v226_v49, %v230_v51 }
 0x1bf   :  { %3709 = vmatpush1.bf16.msra.mxu1 %v6950_v60  ;;  %v7022_v60 = vcombine.low %v362_v42, %v366_v43  ;;  %v6849_v42 = vcombine.high %v187_v30, %v191_v31 }
 0x1c0   :  { %3710 = vmatprep.subr.bf16.mxu1 %v6943_v16  ;;  %v7015_v16 = vcombine.high %v354_v52, %v358_v56 }
 0x1c1   :  { %3670 = vmatpush1.bf16.msra.mxu0 %v6814_v2  ;;  %v6886_v2 = vcombine.low %v226_v49, %v230_v51  ;;  %v307_v51 = vld [vmem:[#allocation7 + $0x510] sm:$0xff] }
 0x1c2   :  { %3671 = vmatprep.subr.bf16.mxu0 %v6807_v4  ;;  %v6879_v4 = vcombine.high %v218_v62, %v222_v63 }
 0x1c3   :  { %3711 = vmatpush1.bf16.msra.mxu1 %v6942_v3  ;;  %v7014_v3 = vcombine.low %v354_v52, %v358_v56  ;;  %v311_v52 = vld [vmem:[#allocation7 + $0x530] sm:$0xff] }
 0x1c4   :  { %3712 = vmatprep.subr.bf16.mxu1 %v6935_v5  ;;  %v7007_v5 = vcombine.high %v346_v19, %v350_v59 }
 0x1c5   :  { %3672 = vmatpush1.bf16.msra.mxu0 %v6806_v9  ;;  %v6878_v9 = vcombine.low %v218_v62, %v222_v63  ;;  %v6969_v63 = vcombine.high %v307_v51, %v311_v52 }
 0x1c6   :  { %3673 = vmatprep.subr.bf16.mxu0 %v6927_v40  ;;  %v6871_v40 = vcombine.high %v210_v6, %v214_v7 }
 0x1c7   :  { %3713 = vmatpush1.bf16.msra.mxu1 %v6934_v10  ;;  %v7006_v10 = vcombine.low %v346_v19, %v350_v59  ;;  %v171_v19 = vld [vmem:[#allocation7 + $0xd0] sm:$0xff] }
 0x1c8   :  { %3714 = vmatprep.subr.bf16.mxu1 %v7055_v12  ;;  %v6999_v12 = vcombine.high %v338_v8, %v342_v38  ;;  %v175_v59 = vld [vmem:[#allocation7 + $0xf0] sm:$0xff] }
 0x1c9   :  { %3674 = vmatpush2.bf16.msra.mxu0 %v6926_v18  ;;  %v6870_v18 = vcombine.low %v210_v6, %v214_v7  ;;  %v6833_v6 = vcombine.high %v171_v19, %v175_v59 }
 0x1ca   :  { %3675 = vmatprep.subr.bf16.mxu0 %v6919_v22  ;;  %v6865_v22 = vcombine.high %v203_v13, %v207_v14 }
 0x1cb   :  { %3715 = vmatpush2.bf16.msra.mxu1 %v7054_v20  ;;  %v6998_v20 = vcombine.low %v338_v8, %v342_v38  ;;  %v163_v8 = vld [vmem:[#allocation7 + $0x90] sm:$0xff] }
 0x1cc   :  { %3716 = vmatprep.subr.bf16.mxu1 %v7047_v23  ;;  %v6993_v23 = vcombine.high %v331_v15, %v335_v17  ;;  %v167_v38 = vld [vmem:[#allocation7 + $0xb0] sm:$0xff] }
 0x1cd   :  { %3676 = vmatpush2.bf16.msra.mxu0 %v6918_v53  ;;  %v6864_v53 = vcombine.low %v203_v13, %v207_v14  ;;  %v6825_v13 = vcombine.high %v163_v8, %v167_v38 }
 0x1ce   :  { %3677 = vmatprep.subr.bf16.mxu0 %v6911_v28  ;;  %v6857_v28 = vcombine.high %v195_v24, %v199_v25 }
 0x1cf   :  { %3717 = vmatpush2.bf16.msra.mxu1 %v7046_v54  ;;  %v6992_v54 = vcombine.low %v331_v15, %v335_v17  ;;  %v155_v15 = vld [vmem:[#allocation7 + $0x50] sm:$0xff] }
 0x1d0   :  { %3718 = vmatprep.subr.bf16.mxu1 %v7039_v29  ;;  %v6985_v29 = vcombine.high %v323_v26, %v327_v27  ;;  %v159_v17 = vld [vmem:[#allocation7 + $0x70] sm:$0xff] }
 0x1d1   :  { %3678 = vmatpush2.bf16.msra.mxu0 %v6910_v34  ;;  %v319_v34 = vld [vmem:[#allocation7 + $0x570] sm:$0xff] }
 0x1d2   :  { %3679 = vmatprep.subr.bf16.mxu0 %v6903_v36  ;;  %v6856_v36 = vcombine.low %v195_v24, %v199_v25  ;;  %v6817_v24 = vcombine.high %v155_v15, %v159_v17  ;;  %v147_v26 = vld [vmem:[#allocation7 + $0x10] sm:$0xff] }
 0x1d3   :  { %3719 = vmatpush2.bf16.msra.mxu1 %v7038_v35  ;;  %v151_v27 = vld [vmem:[#allocation7 + $0x30] sm:$0xff] }
 0x1d4   :  { %3720 = vmatprep.subr.bf16.mxu1 %v7031_v37 }
 0x1d5   :  { %3680 = vmatpush2.bf16.msra.mxu0 %v6902_v44  ;;  %v6977_v44 = vcombine.high %v315_v33, %v319_v34 }
 0x1d6   :  { %3681 = vmatprep.subr.bf16.mxu0 %v6895_v47  ;;  %v183_v47 = vld [vmem:[#allocation7 + $0x130] sm:$0xff] }
 0x1d7   :  { %3721 = vmatpush2.bf16.msra.mxu1 %v7030_v45  ;;  %v179_v45 = vld [vmem:[#allocation7 + $0x110] sm:$0xff] }
 0x1d8   :  { %3722 = vmatprep.subr.bf16.mxu1 %v7023_v48 }
 0x1d9   :  { %3682 = vmatpush2.bf16.msra.mxu0 %v6894_v57  ;;  %v6848_v57 = vcombine.low %v187_v30, %v191_v31  ;;  %v6809_v30 = vcombine.high %v147_v26, %v151_v27 }
 0x1da   :  { %3683 = vmatprep.subr.bf16.mxu0 %v6887_v61  ;;  %v6976_v61 = vcombine.low %v315_v33, %v319_v34  ;;  %v271_v33 = vld [vmem:[#allocation7 + $0x3f0] sm:$0xff] }
 0x1db   :  { %3723 = vmatpush2.bf16.msra.mxu1 %v7022_v60  ;;  %v395_v34 = vld [vmem:[#allocation7 + $0x7d0] sm:$0xff] }
 0x1dc   :  { %3724 = vmatprep.subr.bf16.mxu1 %v7015_v16  ;;  %v6841_v16 = vcombine.high %v179_v45, %v183_v47 }
 0x1dd   :  { %3684 = vmatpush2.bf16.msra.mxu0 %v6886_v2  ;;  %v299_v2 = vld [vmem:[#allocation7 + $0x4d0] sm:$0xff] }
 0x1de   :  { %3685 = vmatprep.subr.bf16.mxu0 %v6879_v4  ;;  %v6840_v4 = vcombine.low %v179_v45, %v183_v47  ;;  %v387_v45 = vld [vmem:[#allocation7 + $0x790] sm:$0xff] }
 0x1df   :  { %3725 = vmatpush2.bf16.msra.mxu1 %v7014_v3  ;;  %v303_v3 = vld [vmem:[#allocation7 + $0x4f0] sm:$0xff] }
 0x1e0   :  { %3726 = vmatprep.subr.bf16.mxu1 %v7007_v5  ;;  %v6968_v5 = vcombine.low %v307_v51, %v311_v52  ;;  %v6961_v7 = vcombine.high %v299_v2, %v303_v3  ;;  %v391_v47 = vld [vmem:[#allocation7 + $0x7b0] sm:$0xff] }
 0x1e1   :  { %3686 = vmatpush2.bf16.msra.mxu0 %v6878_v9  ;;  %v291_v9 = vld [vmem:[#allocation7 + $0x490] sm:$0xff] }
 0x1e2   :  { %3687 = vmatprep.subr.bf16.mxu0 %v6871_v40  ;;  %v6832_v40 = vcombine.low %v171_v19, %v175_v59 }
 0x1e3   :  { %3727 = vmatpush2.bf16.msra.mxu1 %v7006_v10  ;;  %v295_v10 = vld [vmem:[#allocation7 + $0x4b0] sm:$0xff] }
 0x1e4   :  { %3728 = vmatprep.subr.bf16.mxu1 %v6999_v12  ;;  %v6960_v12 = vcombine.low %v299_v2, %v303_v3  ;;  %v6953_v14 = vcombine.high %v291_v9, %v295_v10  ;;  %v243_v2 = vld [vmem:[#allocation7 + $0x310] sm:$0xff] }
 0x1e5   :  { %3688 = vmatpush2.bf16.msra.mxu0 %v6870_v18  ;;  %v283_v18 = vld [vmem:[#allocation7 + $0x450] sm:$0xff] }
 0x1e6   :  { %3739 = vmatprep.subr.bf16.mxu0 %v6865_v22  ;;  %v6824_v22 = vcombine.low %v163_v8, %v167_v38  ;;  %v247_v3 = vld [vmem:[#allocation7 + $0x330] sm:$0xff] }
 0x1e7   :  { %3729 = vmatpush2.bf16.msra.mxu1 %v6998_v20  ;;  %v287_v20 = vld [vmem:[#allocation7 + $0x470] sm:$0xff]  ;;  %v6905_v8 = vcombine.high %v243_v2, %v247_v3 }
 0x1e8   :  { %3780 = vmatprep.subr.bf16.mxu1 %v6993_v23  ;;  %v2151_v32 = vpop.f32.mrf.mxu0  ;;  %3690 = vmatmul.mubr.bf16.vlgmr.msra.gmra.mxu0 %v8295_v0  ;;  %v6952_v23 = vcombine.low %v291_v9, %v295_v10  ;;  %v6945_v25 = vcombine.high %v283_v18, %v287_v20  ;;  %v235_v9 = vld [vmem:[#allocation7 + $0x2d0] sm:$0xff] }
 0x1e9   :  { %3740 = vmatpush1.bf16.msra.mxu0 %v6864_v53  ;;  %3771 = vmatprep.mubr.bf16.mxu0 %v8279_v46  ;;  %v275_v53 = vld [vmem:[#allocation7 + $0x410] sm:$0xff] }
 0x1ea   :  { %v2192_v35 = vpop.f32.mrf.mxu1  ;;  %3731 = vmatmul.mubr.bf16.vlgmr.msra.gmra.mxu1 %v8299_v1  ;;  %v2153_v39 = vpop.f32.mrf.mxu0  ;;  %3741 = vmatprep.subr.bf16.mxu0 %v6857_v28  ;;  %v6816_v28 = vcombine.low %v155_v15, %v159_v17  ;;  %v239_v10 = vld [vmem:[#allocation7 + $0x2f0] sm:$0xff] }
 0x1eb   :  { %v8311_v37 = vadd.f32 %v2192_v35, %v2151_v32  ;;  %3781 = vmatpush1.bf16.msra.mxu1 %v6992_v54  ;;  %3812 = vmatprep.mubr.bf16.mxu1 %v8284_v50  ;;  %v279_v54 = vld [vmem:[#allocation7 + $0x430] sm:$0xff]  ;;  %v6897_v15 = vcombine.high %v235_v9, %v239_v10 }
 0x1ec   :  { %v2194_v43 = vpop.f32.mrf.mxu1  ;;  %3782 = vmatprep.subr.bf16.mxu1 %v6985_v29  ;;  %v2155_v49 = vpop.f32.mrf.mxu0  ;;  %v6944_v29 = vcombine.low %v283_v18, %v287_v20  ;;  %v6937_v31 = vcombine.high %v275_v53, %v279_v54  ;;  %v267_v32 = vld [vmem:[#allocation7 + $0x3d0] sm:$0xff] }
 0x1ed   :  { %v8314_v48 = vadd.f32 %v2194_v43, %v2153_v39  ;;  %3742 = vmatpush1.bf16.msra.mxu0 %v6856_v36  ;;  %v399_v35 = vld [vmem:[#allocation7 + $0x7f0] sm:$0xff]  ;;  %v6808_v36 = vcombine.low %v147_v26, %v151_v27  ;;  %v6936_v39 = vcombine.low %v275_v53, %v279_v54  ;;  %v6928_v49 = vcombine.low %v267_v32, %v271_v33 }
 0x1ee   :  { %v2196_v56 = vpop.f32.mrf.mxu1  ;;  %v2156_v60 = vpop.f32.mrf.mxu0  ;;  %3743 = vmatprep.subr.bf16.mxu0 %v6849_v42  ;;  %v7057_v42 = vcombine.high %v395_v34, %v399_v35  ;;  %v259_v43 = vld [vmem:[#allocation7 + $0x390] sm:$0xff]  ;;  %v7056_v51 = vcombine.low %v395_v34, %v399_v35 }
 0x1ef   :  { %3783 = vmatpush1.bf16.msra.mxu1 %v6984_v41  ;;  %v6929_v41 = vcombine.high %v267_v32, %v271_v33  ;;  %v7049_v56 = vcombine.high %v387_v45, %v391_v47  ;;  %v255_v60 = vld [vmem:[#allocation7 + $0x370] sm:$0xff] }
 0x1f0   :  { %v2197_v62 = vpop.f32.mrf.mxu1  ;;  %3784 = vmatprep.subr.bf16.mxu1 %v6977_v44  ;;  %v263_v44 = vld [vmem:[#allocation7 + $0x3b0] sm:$0xff] }
 0x1f1   :  { %3744 = vmatpush1.bf16.msra.mxu0 %v6848_v57  ;;  %v6921_v52 = vcombine.high %v259_v43, %v263_v44  ;;  %v251_v57 = vld [vmem:[#allocation7 + $0x350] sm:$0xff]  ;;  %v6920_v62 = vcombine.low %v259_v43, %v263_v44 }
 0x1f2   :  { %3745 = vmatprep.subr.bf16.mxu0 %v6841_v16  ;;  %v383_v16 = vld [vmem:[#allocation7 + $0x770] sm:$0xff]  ;;  %v6913_v19 = vcombine.high %v251_v57, %v255_v60 }
 0x1f3   :  { %3785 = vmatpush1.bf16.msra.mxu1 %v6976_v61  ;;  %v379_v61 = vld [vmem:[#allocation7 + $0x750] sm:$0xff] }
 0x1f4   :  { %3786 = vmatprep.subr.bf16.mxu1 %v6969_v63  ;;  %v7048_v63 = vcombine.low %v387_v45, %v391_v47  ;;  %v7041_v59 = vcombine.high %v379_v61, %v383_v16  ;;  %v227_v18 = vld [vmem:[#allocation7 + $0x290] sm:$0xff]  ;;  %v204_v45 = vld [vmem:[#allocation7 + $0x1d8] sm:$0xff] }
 0x1f5   :  { %3746 = vmatpush1.bf16.msra.mxu0 %v6840_v4  ;;  %v371_v4 = vld [vmem:[#allocation7 + $0x710] sm:$0xff]  ;;  %v208_v47 = vld [vmem:[#allocation7 + $0x1f8] sm:$0xff] }
 0x1f6   :  { %3747 = vmatprep.subr.bf16.mxu0 %v6833_v6  ;;  %v6912_v6 = vcombine.low %v251_v57, %v255_v60  ;;  %v231_v20 = vld [vmem:[#allocation7 + $0x2b0] sm:$0xff]  ;;  %v6867_v57 = vcombine.high %v204_v45, %v208_v47 }
 0x1f7   :  { %3787 = vmatpush1.bf16.msra.mxu1 %v6968_v5  ;;  %v375_v5 = vld [vmem:[#allocation7 + $0x730] sm:$0xff]  ;;  %v6889_v26 = vcombine.high %v227_v18, %v231_v20 }
 0x1f8   :  { %3788 = vmatprep.subr.bf16.mxu1 %v6961_v7  ;;  %v7040_v7 = vcombine.low %v379_v61, %v383_v16  ;;  %v7033_v38 = vcombine.high %v371_v4, %v375_v5  ;;  %v219_v53 = vld [vmem:[#allocation7 + $0x250] sm:$0xff]  ;;  %v196_v61 = vld [vmem:[#allocation7 + $0x198] sm:$0xff] }
 0x1f9   :  { %3748 = vmatpush1.bf16.msra.mxu0 %v6832_v40  ;;  %v363_v40 = vld [vmem:[#allocation7 + $0x6d0] sm:$0xff]  ;;  %v200_v16 = vld [vmem:[#allocation7 + $0x1b8] sm:$0xff] }
 0x1fa   :  { %3749 = vmatprep.subr.bf16.mxu0 %v6825_v13  ;;  %v6904_v13 = vcombine.low %v243_v2, %v247_v3  ;;  %v223_v54 = vld [vmem:[#allocation7 + $0x270] sm:$0xff]  ;;  %v6859_v2 = vcombine.high %v196_v61, %v200_v16 }
 0x1fb   :  { %3789 = vmatpush1.bf16.msra.mxu1 %v6960_v12  ;;  %v367_v12 = vld [vmem:[#allocation7 + $0x6f0] sm:$0xff]  ;;  %v6881_v32 = vcombine.high %v219_v53, %v223_v54 }
 0x1fc   :  { %3790 = vmatprep.subr.bf16.mxu1 %v6953_v14  ;;  %v7032_v14 = vcombine.low %v371_v4, %v375_v5  ;;  %v7025_v17 = vcombine.high %v363_v40, %v367_v12  ;;  %v211_v34 = vld [vmem:[#allocation7 + $0x210] sm:$0xff]  ;;  %v188_v4 = vld [vmem:[#allocation7 + $0x158] sm:$0xff] }
 0x1fd   :  { %3750 = vmatpush1.bf16.msra.mxu0 %v6824_v22  ;;  %v355_v22 = vld [vmem:[#allocation7 + $0x690] sm:$0xff]  ;;  %v192_v5 = vld [vmem:[#allocation7 + $0x178] sm:$0xff] }
 0x1fe   :  { %3751 = vmatprep.subr.bf16.mxu0 %v6817_v24  ;;  %v6896_v24 = vcombine.low %v235_v9, %v239_v10  ;;  %v215_v35 = vld [vmem:[#allocation7 + $0x230] sm:$0xff]  ;;  %v6858_v9 = vcombine.low %v196_v61, %v200_v16 }
 0x1ff   :  { %3791 = vmatpush1.bf16.msra.mxu1 %v6952_v23  ;;  %v359_v23 = vld [vmem:[#allocation7 + $0x6b0] sm:$0xff]  ;;  %v6873_v43 = vcombine.high %v211_v34, %v215_v35 }
 0x200   :  { %3792 = vmatprep.subr.bf16.mxu1 %v6945_v25  ;;  %v7024_v25 = vcombine.low %v363_v40, %v367_v12  ;;  %v7017_v27 = vcombine.high %v355_v22, %v359_v23 }
 0x201   :  { %3752 = vmatpush1.bf16.msra.mxu0 %v6816_v28  ;;  %v347_v28 = vld [vmem:[#allocation7 + $0x650] sm:$0xff] }
 0x202   :  { %3753 = vmatprep.subr.bf16.mxu0 %v6809_v30  ;;  %v6888_v30 = vcombine.low %v227_v18, %v231_v20  ;;  %v184_v18 = vld [vmem:[#allocation7 + $0x138] sm:$0xff] }
 0x203   :  { %3793 = vmatpush1.bf16.msra.mxu1 %v6944_v29  ;;  %v351_v29 = vld [vmem:[#allocation7 + $0x670] sm:$0xff] }
 0x204   :  { %3794 = vmatprep.subr.bf16.mxu1 %v6937_v31  ;;  %v7016_v31 = vcombine.low %v355_v22, %v359_v23  ;;  %v7009_v33 = vcombine.high %v347_v28, %v351_v29  ;;  %v308_v23 = vld [vmem:[#allocation7 + $0x518] sm:$0xff] }
 0x205   :  { %3754 = vmatpush1.bf16.msra.mxu0 %v6808_v36  ;;  %v339_v36 = vld [vmem:[#allocation7 + $0x610] sm:$0xff] }
 0x206   :  { %3755 = vmatprep.subr.bf16.mxu0 %v6929_v41  ;;  %v6880_v41 = vcombine.low %v219_v53, %v223_v54 }
 0x207   :  { %3795 = vmatpush1.bf16.msra.mxu1 %v6936_v39  ;;  %v343_v39 = vld [vmem:[#allocation7 + $0x630] sm:$0xff] }
 0x208   :  { %3796 = vmatprep.subr.bf16.mxu1 %v7057_v42  ;;  %v7008_v42 = vcombine.low %v347_v28, %v351_v29  ;;  %v7001_v44 = vcombine.high %v339_v36, %v343_v39 }
 0x209   :  { %3756 = vmatpush2.bf16.msra.mxu0 %v6928_v49  ;;  %v332_v49 = vld [vmem:[#allocation7 + $0x5d8] sm:$0xff] }
 0x20a   :  { %3757 = vmatprep.subr.bf16.mxu0 %v6921_v52  ;;  %v6872_v52 = vcombine.low %v211_v34, %v215_v35 }
 0x20b   :  { %3797 = vmatpush2.bf16.msra.mxu1 %v7056_v51  ;;  %v336_v51 = vld [vmem:[#allocation7 + $0x5f8] sm:$0xff] }
 0x20c   :  { %3798 = vmatprep.subr.bf16.mxu1 %v7049_v56  ;;  %v7000_v56 = vcombine.low %v339_v36, %v343_v39  ;;  %v6995_v60 = vcombine.high %v332_v49, %v336_v51  ;;  %v164_v36 = vld [vmem:[#allocation7 + $0x98] sm:$0xff] }
 0x20d   :  { %3758 = vmatpush2.bf16.msra.mxu0 %v6920_v62  ;;  %v324_v62 = vld [vmem:[#allocation7 + $0x598] sm:$0xff] }
 0x20e   :  { %3759 = vmatprep.subr.bf16.mxu0 %v6913_v19  ;;  %v6866_v19 = vcombine.low %v204_v45, %v208_v47  ;;  %v168_v39 = vld [vmem:[#allocation7 + $0xb8] sm:$0xff] }
 0x20f   :  { %3799 = vmatpush2.bf16.msra.mxu1 %v7048_v63  ;;  %v328_v63 = vld [vmem:[#allocation7 + $0x5b8] sm:$0xff]  ;;  %v6827_v45 = vcombine.high %v164_v36, %v168_v39 }
 0x210   :  { %3800 = vmatprep.subr.bf16.mxu1 %v7041_v59  ;;  %v6994_v59 = vcombine.low %v332_v49, %v336_v51  ;;  %v6987_v3 = vcombine.high %v324_v62, %v328_v63  ;;  %v6986_v12 = vcombine.low %v324_v62, %v328_v63  ;;  %v156_v49 = vld [vmem:[#allocation7 + $0x58] sm:$0xff] }
 0x211   :  { %3760 = vmatpush2.bf16.msra.mxu0 %v6912_v6  ;;  %v160_v51 = vld [vmem:[#allocation7 + $0x78] sm:$0xff] }
 0x212   :  { %3761 = vmatprep.subr.bf16.mxu0 %v6905_v8  ;;  %v320_v8 = vld [vmem:[#allocation7 + $0x578] sm:$0xff]  ;;  %v6819_v61 = vcombine.high %v156_v49, %v160_v51 }
 0x213   :  { %3801 = vmatpush2.bf16.msra.mxu1 %v7040_v7  ;;  %v316_v7 = vld [vmem:[#allocation7 + $0x558] sm:$0xff] }
 0x214   :  { %3802 = vmatprep.subr.bf16.mxu1 %v7033_v38  ;;  %v6978_v53 = vcombine.low %v316_v7, %v320_v8  ;;  %v148_v62 = vld [vmem:[#allocation7 + $0x18] sm:$0xff] }
 0x215   :  { %3762 = vmatpush2.bf16.msra.mxu0 %v6904_v13  ;;  %v6851_v13 = vcombine.high %v188_v4, %v192_v5  ;;  %v152_v63 = vld [vmem:[#allocation7 + $0x38] sm:$0xff] }
 0x216   :  { %3763 = vmatprep.subr.bf16.mxu0 %v6897_v15  ;;  %v6979_v15 = vcombine.high %v316_v7, %v320_v8  ;;  %v272_v7 = vld [vmem:[#allocation7 + $0x3f8] sm:$0xff] }
 0x217   :  { %3803 = vmatpush2.bf16.msra.mxu1 %v7032_v14  ;;  %v396_v8 = vld [vmem:[#allocation7 + $0x7d8] sm:$0xff] }
 0x218   :  { %3804 = vmatprep.subr.bf16.mxu1 %v7025_v17  ;;  %v180_v17 = vld [vmem:[#allocation7 + $0x118] sm:$0xff] }
 0x219   :  { %3764 = vmatpush2.bf16.msra.mxu0 %v6896_v24  ;;  %v312_v24 = vld [vmem:[#allocation7 + $0x538] sm:$0xff]  ;;  %v6843_v54 = vcombine.high %v180_v17, %v184_v18 }
 0x21a   :  { %3765 = vmatprep.subr.bf16.mxu0 %v6889_v26  ;;  %v6850_v26 = vcombine.low %v188_v4, %v192_v5  ;;  %v6971_v29 = vcombine.high %v308_v23, %v312_v24  ;;  %v6811_v4 = vcombine.high %v148_v62, %v152_v63 }
 0x21b   :  { %3805 = vmatpush2.bf16.msra.mxu1 %v7024_v25 }
 0x21c   :  { %3806 = vmatprep.subr.bf16.mxu1 %v7017_v27 }
 0x21d   :  { %3766 = vmatpush2.bf16.msra.mxu0 %v6888_v30  ;;  %v172_v30 = vld [vmem:[#allocation7 + $0xd8] sm:$0xff] }
 0x21e   :  { %3767 = vmatprep.subr.bf16.mxu0 %v6881_v32  ;;  %v304_v32 = vld [vmem:[#allocation7 + $0x4f8] sm:$0xff] }
 0x21f   :  { %3807 = vmatpush2.bf16.msra.mxu1 %v7016_v31  ;;  %v300_v31 = vld [vmem:[#allocation7 + $0x4d8] sm:$0xff] }
 0x220   :  { %3808 = vmatprep.subr.bf16.mxu1 %v7009_v33  ;;  %v6842_v33 = vcombine.low %v180_v17, %v184_v18  ;;  %v6963_v35 = vcombine.high %v300_v31, %v304_v32  ;;  %v388_v17 = vld [vmem:[#allocation7 + $0x798] sm:$0xff] }
 0x221   :  { %3768 = vmatpush2.bf16.msra.mxu0 %v6880_v41  ;;  %v292_v41 = vld [vmem:[#allocation7 + $0x498] sm:$0xff] }
 0x222   :  { %3769 = vmatprep.subr.bf16.mxu0 %v6873_v43  ;;  %v392_v18 = vld [vmem:[#allocation7 + $0x7b8] sm:$0xff] }
 0x223   :  { %3809 = vmatpush2.bf16.msra.mxu1 %v7008_v42  ;;  %v296_v42 = vld [vmem:[#allocation7 + $0x4b8] sm:$0xff] }
 0x224   :  { %3810 = vmatprep.subr.bf16.mxu1 %v7001_v44  ;;  %v6962_v44 = vcombine.low %v300_v31, %v304_v32  ;;  %v6955_v47 = vcombine.high %v292_v41, %v296_v42  ;;  %v244_v31 = vld [vmem:[#allocation7 + $0x318] sm:$0xff] }
 0x225   :  { %3770 = vmatpush2.bf16.msra.mxu0 %v6872_v52  ;;  %v284_v52 = vld [vmem:[#allocation7 + $0x458] sm:$0xff] }
 0x226   :  { %3821 = vmatprep.subr.bf16.mxu0 %v6867_v57  ;;  %v6826_v57 = vcombine.low %v164_v36, %v168_v39  ;;  %v248_v32 = vld [vmem:[#allocation7 + $0x338] sm:$0xff] }
 0x227   :  { %3811 = vmatpush2.bf16.msra.mxu1 %v7000_v56  ;;  %v288_v56 = vld [vmem:[#allocation7 + $0x478] sm:$0xff]  ;;  %v6907_v36 = vcombine.high %v244_v31, %v248_v32 }
 0x228   :  { %3862 = vmatprep.subr.bf16.mxu1 %v6995_v60  ;;  %v2233_v6 = vpop.f32.mrf.mxu0  ;;  %3772 = vmatmul.mubr.bf16.vlgmr.msra.gmra.mxu0 %v8295_v0  ;;  %v6954_v60 = vcombine.low %v292_v41, %v296_v42  ;;  %v6947_v16 = vcombine.high %v284_v52, %v288_v56  ;;  %v236_v41 = vld [vmem:[#allocation7 + $0x2d8] sm:$0xff] }
 0x229   :  { %3822 = vmatpush1.bf16.msra.mxu0 %v6866_v19  ;;  %3853 = vmatprep.mubr.bf16.mxu0 %v8279_v46  ;;  %v176_v46 = vld [vmem:[#allocation7 + $0xf8] sm:$0xff] }
 0x22a   :  { %v2274_v38 = vpop.f32.mrf.mxu1  ;;  %3813 = vmatmul.mubr.bf16.vlgmr.msra.gmra.mxu1 %v8299_v1  ;;  %v2235_v40 = vpop.f32.mrf.mxu0  ;;  %3823 = vmatprep.subr.bf16.mxu0 %v6859_v2  ;;  %v6835_v34 = vcombine.high %v172_v30, %v176_v46  ;;  %v6834_v43 = vcombine.low %v172_v30, %v176_v46  ;;  %v276_v19 = vld [vmem:[#allocation7 + $0x418] sm:$0xff]  ;;  %v6818_v2 = vcombine.low %v156_v49, %v160_v51 }
 0x22b   :  { %v8319_v10 = vadd.f32 %v2274_v38, %v2233_v6  ;;  %3863 = vmatpush1.bf16.msra.mxu1 %v6994_v59  ;;  %3894 = vmatprep.mubr.bf16.mxu1 %v8284_v50  ;;  %v6970_v50 = vcombine.low %v308_v23, %v312_v24  ;;  %v280_v59 = vld [vmem:[#allocation7 + $0x438] sm:$0xff] }
 0x22c   :  { %v2276_v14 = vpop.f32.mrf.mxu1  ;;  %3864 = vmatprep.subr.bf16.mxu1 %v6987_v3  ;;  %v2237_v22 = vpop.f32.mrf.mxu0  ;;  %v6946_v3 = vcombine.low %v284_v52, %v288_v56  ;;  %v6939_v5 = vcombine.high %v276_v19, %v280_v59  ;;  %v268_v6 = vld [vmem:[#allocation7 + $0x3d8] sm:$0xff] }
 0x22d   :  { %v8322_v20 = vadd.f32 %v2276_v14, %v2235_v40  ;;  %3824 = vmatpush1.bf16.msra.mxu0 %v6858_v9  ;;  %v400_v38 = vld [vmem:[#allocation7 + $0x7f8] sm:$0xff]  ;;  %v6810_v9 = vcombine.low %v148_v62, %v152_v63  ;;  %v6938_v40 = vcombine.low %v276_v19, %v280_v59  ;;  %v6930_v22 = vcombine.low %v268_v6, %v272_v7 }
 0x22e   :  { %v2278_v25 = vpop.f32.mrf.mxu1  ;;  %v2238_v27 = vpop.f32.mrf.mxu0  ;;  %3825 = vmatprep.subr.bf16.mxu0 %v6851_v13  ;;  %v7059_v13 = vcombine.high %v396_v8, %v400_v38  ;;  %v260_v14 = vld [vmem:[#allocation7 + $0x398] sm:$0xff]  ;;  %v7058_v23 = vcombine.low %v396_v8, %v400_v38 }
 0x22f   :  { %3865 = vmatpush1.bf16.msra.mxu1 %v6986_v12  ;;  %v6931_v12 = vcombine.high %v268_v6, %v272_v7  ;;  %v7051_v25 = vcombine.high %v388_v17, %v392_v18  ;;  %v256_v27 = vld [vmem:[#allocation7 + $0x378] sm:$0xff] }
 0x230   :  { %v2279_v28 = vpop.f32.mrf.mxu1  ;;  %3866 = vmatprep.subr.bf16.mxu1 %v6979_v15  ;;  %v264_v15 = vld [vmem:[#allocation7 + $0x3b8] sm:$0xff] }
 0x231   :  { %3826 = vmatpush1.bf16.msra.mxu0 %v6850_v26  ;;  %v6923_v24 = vcombine.high %v260_v14, %v264_v15  ;;  %v252_v26 = vld [vmem:[#allocation7 + $0x358] sm:$0xff]  ;;  %v6922_v28 = vcombine.low %v260_v14, %v264_v15 }
 0x232   :  { %3827 = vmatprep.subr.bf16.mxu0 %v6843_v54  ;;  %v384_v54 = vld [vmem:[#allocation7 + $0x778] sm:$0xff]  ;;  %v6915_v30 = vcombine.high %v252_v26, %v256_v27 }
 0x233   :  { %3867 = vmatpush1.bf16.msra.mxu1 %v6978_v53  ;;  %v380_v53 = vld [vmem:[#allocation7 + $0x758] sm:$0xff] }
 0x234   :  { %3868 = vmatprep.subr.bf16.mxu1 %v6971_v29  ;;  %v7050_v29 = vcombine.low %v388_v17, %v392_v18  ;;  %v7043_v46 = vcombine.high %v380_v53, %v384_v54  ;;  %v240_v42 = vld [vmem:[#allocation7 + $0x2f8] sm:$0xff]  ;;  %v3905_v18 = vlaneseq }
 0x235   :  { %3828 = vmatpush1.bf16.msra.mxu0 %v6842_v33  ;;  %v372_v33 = vld [vmem:[#allocation7 + $0x718] sm:$0xff]  ;;  %v6899_v49 = vcombine.high %v236_v41, %v240_v42 }
 0x236   :  { %3829 = vmatprep.subr.bf16.mxu0 %v6835_v34  ;;  %v6914_v34 = vcombine.low %v252_v26, %v256_v27  ;;  %v228_v52 = vld [vmem:[#allocation7 + $0x298] sm:$0xff] }
 0x237   :  { %3869 = vmatpush1.bf16.msra.mxu1 %v6970_v50  ;;  %v376_v50 = vld [vmem:[#allocation7 + $0x738] sm:$0xff] }
 0x238   :  { %3870 = vmatprep.subr.bf16.mxu1 %v6963_v35  ;;  %v7042_v35 = vcombine.low %v380_v53, %v384_v54  ;;  %v7035_v39 = vcombine.high %v372_v33, %v376_v50  ;;  %v232_v56 = vld [vmem:[#allocation7 + $0x2b8] sm:$0xff] }
 0x239   :  { %3830 = vmatpush1.bf16.msra.mxu0 %v6834_v43  ;;  %v364_v43 = vld [vmem:[#allocation7 + $0x6d8] sm:$0xff]  ;;  %v6891_v62 = vcombine.high %v228_v52, %v232_v56 }
 0x23a   :  { %3831 = vmatprep.subr.bf16.mxu0 %v6827_v45  ;;  %v6906_v45 = vcombine.low %v244_v31, %v248_v32  ;;  %v220_v19 = vld [vmem:[#allocation7 + $0x258] sm:$0xff]  ;;  %v8336_v31 = vld [vmem:[#allocation10] sm:$0xff] }
 0x23b   :  { %3871 = vmatpush1.bf16.msra.mxu1 %v6962_v44  ;;  %v368_v44 = vld [vmem:[#allocation7 + $0x6f8] sm:$0xff] }
 0x23c   :  { %3872 = vmatprep.subr.bf16.mxu1 %v6955_v47  ;;  %v7034_v47 = vcombine.low %v372_v33, %v376_v50  ;;  %v7027_v51 = vcombine.high %v364_v43, %v368_v44  ;;  %v224_v59 = vld [vmem:[#allocation7 + $0x278] sm:$0xff] }
 0x23d   :  { %3832 = vmatpush1.bf16.msra.mxu0 %v6826_v57  ;;  %v356_v57 = vld [vmem:[#allocation7 + $0x698] sm:$0xff]  ;;  %v6883_v6 = vcombine.high %v220_v19, %v224_v59 }
 0x23e   :  { %3833 = vmatprep.subr.bf16.mxu0 %v6819_v61  ;;  %v6898_v61 = vcombine.low %v236_v41, %v240_v42  ;;  %v212_v8 = vld [vmem:[#allocation7 + $0x218] sm:$0xff] }
 0x23f   :  { %3873 = vmatpush1.bf16.msra.mxu1 %v6954_v60  ;;  %v360_v60 = vld [vmem:[#allocation7 + $0x6b8] sm:$0xff] }
 0x240   :  { %3874 = vmatprep.subr.bf16.mxu1 %v6947_v16  ;;  %v7026_v16 = vcombine.low %v364_v43, %v368_v44  ;;  %v7019_v63 = vcombine.high %v356_v57, %v360_v60  ;;  %v216_v38 = vld [vmem:[#allocation7 + $0x238] sm:$0xff] }
 0x241   :  { %3834 = vmatpush1.bf16.msra.mxu0 %v6818_v2  ;;  %v348_v2 = vld [vmem:[#allocation7 + $0x658] sm:$0xff]  ;;  %v6875_v14 = vcombine.high %v212_v8, %v216_v38  ;;  %v6874_v17 = vcombine.low %v212_v8, %v216_v38 }
 0x242   :  { %3835 = vmatprep.subr.bf16.mxu0 %v6811_v4  ;;  %v6890_v4 = vcombine.low %v228_v52, %v232_v56  ;;  %v7444_v26 = vld [vmem:[#allocation11 + $0xe0] ss:$16 sps:$4 sm:$0xff]   ;;  %v7449_v27 = vld [vmem:[#allocation11 + $0xc4] ss:$16 sps:$4 sm:$0xff]  }
 0x243   :  { %3875 = vmatpush1.bf16.msra.mxu1 %v6946_v3  ;;  %v352_v3 = vld [vmem:[#allocation7 + $0x678] sm:$0xff] }
 0x244   :  { %3876 = vmatprep.subr.bf16.mxu1 %v6939_v5  ;;  %v7018_v5 = vcombine.low %v356_v57, %v360_v60  ;;  %v7011_v7 = vcombine.high %v348_v2, %v352_v3  ;;  %v7456_v53 = vld [vmem:[#allocation11 + $0x2e0] ss:$16 sps:$4 sm:$0xff]   ;;  %v7452_v33 = vld [vmem:[#allocation11 + $0xa4] ss:$16 sps:$4 sm:$0xff]  }
 0x245   :  { %3836 = vmatpush1.bf16.msra.mxu0 %v6810_v9  ;;  %v340_v9 = vld [vmem:[#allocation7 + $0x618] sm:$0xff] }
 0x246   :  { %3837 = vmatprep.subr.bf16.mxu0 %v6931_v12  ;;  %v6882_v12 = vcombine.low %v220_v19, %v224_v59  ;;  %v7462_v50 = vld [vmem:[#allocation11 + $0x2c0] ss:$16 sps:$4 sm:$0xff]   ;;  %v7455_v44 = vld [vmem:[#allocation11 + $0x84] ss:$16 sps:$4 sm:$0xff]  }
 0x247   :  { %3877 = vmatpush1.bf16.msra.mxu1 %v6938_v40  ;;  %v344_v40 = vld [vmem:[#allocation7 + $0x638] sm:$0xff] }
 0x248   :  { %3878 = vmatprep.subr.bf16.mxu1 %v7059_v13  ;;  %v7010_v13 = vcombine.low %v348_v2, %v352_v3  ;;  %v7003_v15 = vcombine.high %v340_v9, %v344_v40  ;;  %v7450_v42 = vld [vmem:[#allocation11 + $0xa0] ss:$16 sps:$4 sm:$0xff]   ;;  %v7461_v56 = vld [vmem:[#allocation11 + $0x64] ss:$16 sps:$4 sm:$0xff]  }
 0x249   :  { %3838 = vmatpush2.bf16.msra.mxu0 %v6930_v22  ;;  %v7002_v22 = vcombine.low %v340_v9, %v344_v40  ;;  %v7453_v52 = vld [vmem:[#allocation11 + $0x80] ss:$16 sps:$4 sm:$0xff]   ;;  %v7488_v19 = vld [vmem:[#allocation11 + $0x244] ss:$16 sps:$4 sm:$0xff]  }
 0x24a   :  { %3839 = vmatprep.subr.bf16.mxu0 %v6923_v24  ;;  %v7458_v24 = vld [vmem:[#allocation11 + $0x2e4] ss:$16 sps:$4 sm:$0xff]   ;;  %v7474_v57 = vld [vmem:[#allocation11 + $0x280] ss:$16 sps:$4 sm:$0xff]  }
 0x24b   :  { %3879 = vmatpush2.bf16.msra.mxu1 %v7058_v23  ;;  %v7446_v23 = vld [vmem:[#allocation11 + $0xe4] ss:$16 sps:$4 sm:$0xff]   ;;  %v7465_v59 = vld [vmem:[#allocation11 + $0x40] ss:$16 sps:$4 sm:$0xff]  }
 0x24c   :  { %3880 = vmatprep.subr.bf16.mxu1 %v7051_v25  ;;  %v8325_v25 = vshrl.u32 %v3905_v18, 7  ;;  %v7473_v2 = vld [vmem:[#allocation11 + $0x24] ss:$16 sps:$4 sm:$0xff]   ;;  %v7486_v3 = vld [vmem:[#allocation11 + $0x240] ss:$16 sps:$4 sm:$0xff]  }
 0x24d   :  { %3840 = vmatpush2.bf16.msra.mxu0 %v6922_v28  ;;  %v7464_v28 = vld [vmem:[#allocation11 + $0x2c4] ss:$16 sps:$4 sm:$0xff]   ;;  %v7477_v38 = vld [vmem:[#allocation11] ss:$16 sps:$4 sm:$0xff]  }
 0x24e   :  { %3841 = vmatprep.subr.bf16.mxu0 %v6915_v30  ;;  %v8328_v54 = vsub.s32 1, %v8325_v25  ;;  %v7500_v8 = vld [vmem:[#allocation11 + $0x204] ss:$16 sps:$4 sm:$0xff]   ;;  %v7498_v40 = vld [vmem:[#allocation11 + $0x200] ss:$16 sps:$4 sm:$0xff]  }
 0x24f   :  { %3881 = vmatpush2.bf16.msra.mxu1 %v7050_v29  ;;  %v7485_v9 = vld [vmem:[#allocation11 + $0x1e4] ss:$16 sps:$4 sm:$0xff]   ;;  %v7489_v18 = vld [vmem:[#allocation11 + $0x1c0] ss:$16 sps:$4 sm:$0xff]  }
 0x250   :  { %3882 = vmatprep.subr.bf16.mxu1 %v7043_v46  ;;  %v7447_v46 = vld [vmem:[#allocation11 + $0xc0] ss:$16 sps:$4 sm:$0xff]  }
 0x251   :  { %3842 = vmatpush2.bf16.msra.mxu0 %v6914_v34 }
 0x252   :  { %3843 = vmatprep.subr.bf16.mxu0 %v6907_v36  ;;  %v3912_v36 = vrot.slane %v8336_v31, %v8328_v54 }
 0x253   :  { %3883 = vmatpush2.bf16.msra.mxu1 %v7042_v35 }
 0x254   :  { %3884 = vmatprep.subr.bf16.mxu1 %v7035_v39 }
 0x255   :  { %3844 = vmatpush2.bf16.msra.mxu0 %v6906_v45  ;;  %v7468_v45 = vld [vmem:[#allocation11 + $0x2a0] ss:$16 sps:$4 sm:$0xff]  }
 0x256   :  { %3845 = vmatprep.subr.bf16.mxu0 %v6899_v49 }
 0x257   :  { %3885 = vmatpush2.bf16.msra.mxu1 %v7034_v47 }
 0x258   :  { %3886 = vmatprep.subr.bf16.mxu1 %v7027_v51 }
 0x259   :  { %3846 = vmatpush2.bf16.msra.mxu0 %v6898_v61  ;;  %v7482_v61 = vld [vmem:[#allocation11 + $0x264] ss:$16 sps:$4 sm:$0xff]  }
 0x25a   :  { %3847 = vmatprep.subr.bf16.mxu0 %v6891_v62  ;;  %v7467_v62 = vld [vmem:[#allocation11 + $0x44] ss:$16 sps:$4 sm:$0xff]  }
 0x25b   :  { %3887 = vmatpush2.bf16.msra.mxu1 %v7026_v16  ;;  %v7459_v16 = vld [vmem:[#allocation11 + $0x60] ss:$16 sps:$4 sm:$0xff]  }
 0x25c   :  { %3888 = vmatprep.subr.bf16.mxu1 %v7019_v63  ;;  %v7480_v63 = vld [vmem:[#allocation11 + $0x260] ss:$16 sps:$4 sm:$0xff]  }
 0x25d   :  { %3848 = vmatpush2.bf16.msra.mxu0 %v6890_v4  ;;  %v7494_v4 = vld [vmem:[#allocation11 + $0x224] ss:$16 sps:$4 sm:$0xff]  }
 0x25e   :  { %3849 = vmatprep.subr.bf16.mxu0 %v6883_v6  ;;  %v7479_v6 = vld [vmem:[#allocation11 + $0x4] ss:$16 sps:$4 sm:$0xff]  }
 0x25f   :  { %3889 = vmatpush2.bf16.msra.mxu1 %v7018_v5  ;;  %v7471_v5 = vld [vmem:[#allocation11 + $0x20] ss:$16 sps:$4 sm:$0xff]  }
 0x260   :  { %3890 = vmatprep.subr.bf16.mxu1 %v7011_v7  ;;  %v7492_v7 = vld [vmem:[#allocation11 + $0x220] ss:$16 sps:$4 sm:$0xff]  }
 0x261   :  { %3850 = vmatpush2.bf16.msra.mxu0 %v6882_v12  ;;  %v7506_v12 = vld [vmem:[#allocation11 + $0x3e4] ss:$16 sps:$4 sm:$0xff]  }
 0x262   :  { %3851 = vmatprep.subr.bf16.mxu0 %v6875_v14  ;;  %v7491_v14 = vld [vmem:[#allocation11 + $0x1c4] ss:$16 sps:$4 sm:$0xff]  }
 0x263   :  { %3891 = vmatpush2.bf16.msra.mxu1 %v7010_v13  ;;  %v7483_v13 = vld [vmem:[#allocation11 + $0x1e0] ss:$16 sps:$4 sm:$0xff]  }
 0x264   :  { %3892 = vmatprep.subr.bf16.mxu1 %v7003_v15  ;;  %v7504_v15 = vld [vmem:[#allocation11 + $0x3e0] ss:$16 sps:$4 sm:$0xff]  }
 0x265   :  { %3852 = vmatpush2.bf16.msra.mxu0 %v6874_v17  ;;  %v7512_v17 = vld [vmem:[#allocation11 + $0x3c4] ss:$16 sps:$4 sm:$0xff]  }
 0x266   :  { %5527 = vmatprep.subr.bf16.mxu0 %v7446_v23  ;;  %v7510_v23 = vld [vmem:[#allocation11 + $0x3c0] ss:$16 sps:$4 sm:$0xff]  }
 0x267   :  { %3893 = vmatpush2.bf16.msra.mxu1 %v7002_v22  ;;  %v7497_v22 = vld [vmem:[#allocation11 + $0x1a4] ss:$16 sps:$4 sm:$0xff]  }
 0x268   :  { %5568 = vmatprep.subr.bf16.mxu1 %v7458_v24  ;;  %v8330_v29 = vpop.f32.mrf.mxu0  ;;  %3854 = vmatmul.mubr.bf16.vlgmr.msra.gmra.mxu0 %v8295_v0  ;;  %v7470_v0 = vld [vmem:[#allocation11 + $0x2a4] ss:$16 sps:$4 sm:$0xff]  }
 0x269   :  { %5528 = vmatpush1.bf16.msra.mxu0 %v7444_v26  ;;  %v7518_v24 = vld [vmem:[#allocation11 + $0x3a4] ss:$16 sps:$4 sm:$0xff]   ;;  %v7495_v26 = vld [vmem:[#allocation11 + $0x1a0] ss:$16 sps:$4 sm:$0xff]  }
 0x26a   :  { %v8333_v30 = vpop.f32.mrf.mxu1  ;;  %3895 = vmatmul.mubr.bf16.vlgmr.msra.gmra.mxu1 %v8299_v1  ;;  %v3611_v32 = vpop.f32.mrf.mxu0  ;;  %5529 = vmatprep.subr.bf16.mxu0 %v7449_v27  ;;  %v7503_v27 = vld [vmem:[#allocation11 + $0x184] ss:$16 sps:$4 sm:$0xff]  }
 0x26b   :  { %5569 = vmatpush1.bf16.msra.mxu1 %v7456_v53  ;;  %v3612_v34 = vadd.f32 %v3611_v32, %v8290_v58  ;;  %v7476_v58 = vld [vmem:[#allocation11 + $0x284] ss:$16 sps:$4 sm:$0xff]   ;;  %v7516_v53 = vld [vmem:[#allocation11 + $0x3a0] ss:$16 sps:$4 sm:$0xff]  }
 0x26c   :  { %v3652_v35 = vpop.f32.mrf.mxu1  ;;  %5570 = vmatprep.subr.bf16.mxu1 %v7464_v28  ;;  %v3613_v39 = vpop.f32.mrf.mxu0  ;;  %v7524_v28 = vld [vmem:[#allocation11 + $0x384] ss:$16 sps:$4 sm:$0xff]  }
 0x26d   :  { %v3653_v41 = vadd.f32 %v3652_v35, %v3612_v34  ;;  %5530 = vmatpush1.bf16.msra.mxu0 %v7447_v46  ;;  %v7501_v46 = vld [vmem:[#allocation11 + $0x180] ss:$16 sps:$4 sm:$0xff]   ;;  %v7509_v32 = vld [vmem:[#allocation11 + $0x164] ss:$16 sps:$4 sm:$0xff]   ;;  %v3610_v35 = vadd.f32 %v8330_v29, %v8287_v55 }
 0x26e   :  { %v3654_v1 = vpop.f32.mrf.mxu1  ;;  %v3614_v43 = vpop.f32.mrf.mxu0  ;;  %5531 = vmatprep.subr.bf16.mxu0 %v7452_v33  ;;  %v7522_v33 = vld [vmem:[#allocation11 + $0x380] ss:$16 sps:$4 sm:$0xff]   ;;  %v7536_v29 = vld [vmem:[#allocation11 + $0x324] ss:$16 sps:$4 sm:$0xff]  }
 0x26f   :  { %5571 = vmatpush1.bf16.msra.mxu1 %v7462_v50  ;;  %v3946_v47 = vadd.f32 %v3912_v36, %v3653_v41  ;;  %v7530_v50 = vld [vmem:[#allocation11 + $0x364] ss:$16 sps:$4 sm:$0xff]   ;;  %v7507_v34 = vld [vmem:[#allocation11 + $0x160] ss:$16 sps:$4 sm:$0xff]   ;;  %v8347_v36 = vsub.s32 0, %v8325_v25 }
 0x270   :  { %v3655_v49 = vpop.f32.mrf.mxu1  ;;  %5572 = vmatprep.subr.bf16.mxu1 %v7470_v0  ;;  %v7515_v0 = vld [vmem:[#allocation11 + $0x144] ss:$16 sps:$4 sm:$0xff]   ;;  %v7528_v39 = vld [vmem:[#allocation11 + $0x360] ss:$16 sps:$4 sm:$0xff]  }
 0x271   :  { %v3954_v51 = vmax.f32 %v3946_v47, 0.0  ;;  %5532 = vmatpush1.bf16.msra.mxu0 %v7450_v42  ;;  %v7533_v41 = vld [vmem:[#allocation11 + $0x344] ss:$16 sps:$4 sm:$0xff]   ;;  %v7513_v1 = vld [vmem:[#allocation11 + $0x140] ss:$16 sps:$4 sm:$0xff]   ;;  %v3651_v42 = vadd.f32 %v8333_v30, %v3610_v35  ;;  %v3908_v43 = vrot.slane %v8336_v31, %v8347_v36 }
 0x272   :  { %5533 = vmatprep.subr.bf16.mxu0 %v7455_v44  ;;  %v7521_v44 = vld [vmem:[#allocation11 + $0x124] ss:$16 sps:$4 sm:$0xff]   ;;  %v7531_v55 = vld [vmem:[#allocation11 + $0x340] ss:$16 sps:$4 sm:$0xff]  }
 0x273   :  { %5573 = vmatpush1.bf16.msra.mxu1 %v7468_v45  ;;  %v8341_v60 = vpack.c.bf16 %v3954_v51, %v3954_v51  ;;  %v7519_v45 = vld [vmem:[#allocation11 + $0x120] ss:$16 sps:$4 sm:$0xff]   ;;  %v3945_v47 = vadd.f32 %v3908_v43, %v3651_v42  ;;  %v7527_v49 = vld [vmem:[#allocation11 + $0x104] ss:$16 sps:$4 sm:$0xff]  }
 0x274   :  { %5574 = vmatprep.subr.bf16.mxu1 %v7476_v58  ;;  %v7534_v58 = vld [vmem:[#allocation11 + $0x320] ss:$16 sps:$4 sm:$0xff]   ;;  %v7539_v51 = vld [vmem:[#allocation11 + $0x304] ss:$16 sps:$4 sm:$0xff]  }
 0x275   :  { %5534 = vmatpush1.bf16.msra.mxu0 %v7453_v52  ;;  %5559 = vmatprep.mubr.bf16.mxu0 %v8341_v60  ;;  %v7525_v30 = vld [vmem:[#allocation11 + $0x100] ss:$16 sps:$4 sm:$0xff]   ;;  %v3953_v52 = vmax.f32 %v3945_v47, 0.0  ;;  %v7608_v42 = vld [vmem:[#allocation11 + $0x684] ss:$16 sps:$4 sm:$0xff]  }
 0x276   :  { %5535 = vmatprep.subr.bf16.mxu0 %v7461_v56  ;;  %v7537_v56 = vld [vmem:[#allocation11 + $0x300] ss:$16 sps:$4 sm:$0xff]   ;;  %v7566_v47 = vld [vmem:[#allocation11 + $0x5e4] ss:$16 sps:$4 sm:$0xff]  }
 0x277   :  { %5575 = vmatpush1.bf16.msra.mxu1 %v7474_v57  ;;  %v7542_v57 = vld [vmem:[#allocation11 + $0x4e4] ss:$16 sps:$4 sm:$0xff]   ;;  %v7594_v35 = vld [vmem:[#allocation11 + $0x6c0] ss:$16 sps:$4 sm:$0xff]  }
 0x278   :  { %5576 = vmatprep.subr.bf16.mxu1 %v7482_v61  ;;  %v7590_v61 = vld [vmem:[#allocation11 + $0x6e4] ss:$16 sps:$4 sm:$0xff]   ;;  %v7558_v43 = vld [vmem:[#allocation11 + $0x420] ss:$16 sps:$4 sm:$0xff]  }
 0x279   :  { %5536 = vmatpush1.bf16.msra.mxu0 %v7459_v16  ;;  %v3915_v16 = vsub.s32 2, %v8325_v25 }
 0x27a   :  { %5537 = vmatprep.subr.bf16.mxu0 %v7467_v62  ;;  %v7540_v62 = vld [vmem:[#allocation11 + $0x4e0] ss:$16 sps:$4 sm:$0xff]  }
 0x27b   :  { %5577 = vmatpush1.bf16.msra.mxu1 %v7480_v63  ;;  %v8353_v63 = vpack.c.bf16 %v3953_v52, %v3953_v52  ;;  %v7618_v52 = vld [vmem:[#allocation11 + $0x640] ss:$16 sps:$4 sm:$0xff]  }
 0x27c   :  { %5578 = vmatprep.subr.bf16.mxu1 %v7488_v19  ;;  %v7545_v19 = vld [vmem:[#allocation11 + $0x4c4] ss:$16 sps:$4 sm:$0xff]  }
 0x27d   :  { %5538 = vmatpush1.bf16.msra.mxu0 %v7465_v59  ;;  %v3919_v59 = vsub.s32 3, %v8325_v25 }
 0x27e   :  { %5539 = vmatprep.subr.bf16.mxu0 %v7473_v2 }
 0x27f   :  { %5579 = vmatpush1.bf16.msra.mxu1 %v7486_v3 }
 0x280   :  { %5580 = vmatprep.subr.bf16.mxu1 %v7494_v4 }
 0x281   :  { %5540 = vmatpush1.bf16.msra.mxu0 %v7471_v5  ;;  %v3916_v5 = vrot.slane %v8336_v31, %v3915_v16 }
 0x282   :  { %5541 = vmatprep.subr.bf16.mxu0 %v7479_v6  ;;  %v7543_v6 = vld [vmem:[#allocation11 + $0x4c0] ss:$16 sps:$4 sm:$0xff]  }
 0x283   :  { %5581 = vmatpush1.bf16.msra.mxu1 %v7492_v7 }
 0x284   :  { %5582 = vmatprep.subr.bf16.mxu1 %v7500_v8  ;;  %v7548_v8 = vld [vmem:[#allocation11 + $0x4a4] ss:$16 sps:$4 sm:$0xff]  }
 0x285   :  { %5542 = vmatpush1.bf16.msra.mxu0 %v7477_v38 }
 0x286   :  { %5543 = vmatprep.subr.bf16.mxu0 %v7485_v9 }
 0x287   :  { %5583 = vmatpush1.bf16.msra.mxu1 %v7498_v40 }
 0x288   :  { %5584 = vmatprep.subr.bf16.mxu1 %v7506_v12  ;;  %v3920_v12 = vrot.slane %v8336_v31, %v3919_v59 }
 0x289   :  { %5544 = vmatpush2.bf16.msra.mxu0 %v7483_v13 }
 0x28a   :  { %5545 = vmatprep.subr.bf16.mxu0 %v7491_v14 }
 0x28b   :  { %5585 = vmatpush2.bf16.msra.mxu1 %v7504_v15 }
 0x28c   :  { %5586 = vmatprep.subr.bf16.mxu1 %v7512_v17  ;;  %v7546_v17 = vld [vmem:[#allocation11 + $0x4a0] ss:$16 sps:$4 sm:$0xff]  }
 0x28d   :  { %5546 = vmatpush2.bf16.msra.mxu0 %v7489_v18 }
 0x28e   :  { %5547 = vmatprep.subr.bf16.mxu0 %v7497_v22  ;;  %v7551_v22 = vld [vmem:[#allocation11 + $0x484] ss:$16 sps:$4 sm:$0xff]  }
 0x28f   :  { %5587 = vmatpush2.bf16.msra.mxu1 %v7510_v23 }
 0x290   :  { %5588 = vmatprep.subr.bf16.mxu1 %v7518_v24 }
 0x291   :  { %5548 = vmatpush2.bf16.msra.mxu0 %v7495_v26 }
 0x292   :  { %5549 = vmatprep.subr.bf16.mxu0 %v7503_v27 }
 0x293   :  { %5589 = vmatpush2.bf16.msra.mxu1 %v7516_v53  ;;  %v7554_v53 = vld [vmem:[#allocation11 + $0x464] ss:$16 sps:$4 sm:$0xff]  }
 0x294   :  { %5590 = vmatprep.subr.bf16.mxu1 %v7524_v28 }
 0x295   :  { %5550 = vmatpush2.bf16.msra.mxu0 %v7501_v46  ;;  %v7588_v46 = vld [vmem:[#allocation11 + $0x6e0] ss:$16 sps:$4 sm:$0xff]  }
 0x296   :  { %5551 = vmatprep.subr.bf16.mxu0 %v7509_v32 }
 0x297   :  { %5591 = vmatpush2.bf16.msra.mxu1 %v7522_v33  ;;  %v7596_v33 = vld [vmem:[#allocation11 + $0x6c4] ss:$16 sps:$4 sm:$0xff]  }
 0x298   :  { %5592 = vmatprep.subr.bf16.mxu1 %v7530_v50  ;;  %v7552_v50 = vld [vmem:[#allocation11 + $0x460] ss:$16 sps:$4 sm:$0xff]  }
 0x299   :  { %5552 = vmatpush2.bf16.msra.mxu0 %v7507_v34  ;;  %v7557_v34 = vld [vmem:[#allocation11 + $0x444] ss:$16 sps:$4 sm:$0xff]  }
 0x29a   :  { %5553 = vmatprep.subr.bf16.mxu0 %v7515_v0  ;;  %v7602_v0 = vld [vmem:[#allocation11 + $0x6a4] ss:$16 sps:$4 sm:$0xff]  }
 0x29b   :  { %5593 = vmatpush2.bf16.msra.mxu1 %v7528_v39  ;;  %v7555_v39 = vld [vmem:[#allocation11 + $0x440] ss:$16 sps:$4 sm:$0xff]  }
 0x29c   :  { %5594 = vmatprep.subr.bf16.mxu1 %v7533_v41  ;;  %v7560_v41 = vld [vmem:[#allocation11 + $0x424] ss:$16 sps:$4 sm:$0xff]  }
 0x29d   :  { %5554 = vmatpush2.bf16.msra.mxu0 %v7513_v1  ;;  %v7600_v1 = vld [vmem:[#allocation11 + $0x6a0] ss:$16 sps:$4 sm:$0xff]  }
 0x29e   :  { %5555 = vmatprep.subr.bf16.mxu0 %v7521_v44  ;;  %v7563_v44 = vld [vmem:[#allocation11 + $0x404] ss:$16 sps:$4 sm:$0xff]  }
 0x29f   :  { %5595 = vmatpush2.bf16.msra.mxu1 %v7531_v55  ;;  %v7606_v55 = vld [vmem:[#allocation11 + $0x680] ss:$16 sps:$4 sm:$0xff]  }
 0x2a0   :  { %5596 = vmatprep.subr.bf16.mxu1 %v7536_v29  ;;  %v7614_v29 = vld [vmem:[#allocation11 + $0x664] ss:$16 sps:$4 sm:$0xff]  }
 0x2a1   :  { %5556 = vmatpush2.bf16.msra.mxu0 %v7519_v45  ;;  %v7561_v45 = vld [vmem:[#allocation11 + $0x400] ss:$16 sps:$4 sm:$0xff]  }
 0x2a2   :  { %5557 = vmatprep.subr.bf16.mxu0 %v7527_v49  ;;  %v7612_v49 = vld [vmem:[#allocation11 + $0x660] ss:$16 sps:$4 sm:$0xff]  }
 0x2a3   :  { %5597 = vmatpush2.bf16.msra.mxu1 %v7534_v58  ;;  %v7620_v58 = vld [vmem:[#allocation11 + $0x644] ss:$16 sps:$4 sm:$0xff]  }
 0x2a4   :  { %5598 = vmatprep.subr.bf16.mxu1 %v7539_v51  ;;  %v7564_v51 = vld [vmem:[#allocation11 + $0x5e0] ss:$16 sps:$4 sm:$0xff]  }
 0x2a5   :  { %5558 = vmatpush2.bf16.msra.mxu0 %v7525_v30  ;;  %v7569_v30 = vld [vmem:[#allocation11 + $0x5c4] ss:$16 sps:$4 sm:$0xff]  }
 0x2a6   :  { %5609 = vmatprep.subr.bf16.mxu0 %v7542_v57  ;;  %v7567_v57 = vld [vmem:[#allocation11 + $0x5c0] ss:$16 sps:$4 sm:$0xff]  }
 0x2a7   :  { %5599 = vmatpush2.bf16.msra.mxu1 %v7537_v56  ;;  %v7626_v56 = vld [vmem:[#allocation11 + $0x624] ss:$16 sps:$4 sm:$0xff]  }
 0x2a8   :  { %5650 = vmatprep.subr.bf16.mxu1 %v7590_v61  ;;  %v3691_v2 = vpop.f32.mrf.mxu0  ;;  %5560 = vmatmul.mubr.bf16.vlgmr.msra.gmra.mxu0 %v8353_v63  ;;  %v7572_v61 = vld [vmem:[#allocation11 + $0x5a4] ss:$16 sps:$4 sm:$0xff]  }
 0x2a9   :  { %v3692_v3 = vadd.f32 %v3691_v2, %v8303_v11  ;;  %5610 = vmatpush1.bf16.msra.mxu0 %v7540_v62  ;;  %v7624_v62 = vld [vmem:[#allocation11 + $0x620] ss:$16 sps:$4 sm:$0xff]  }
 0x2aa   :  { %v3732_v4 = vpop.f32.mrf.mxu1  ;;  %v3693_v7 = vpop.f32.mrf.mxu0  ;;  %5611 = vmatprep.subr.bf16.mxu0 %v7545_v19  ;;  %v7632_v19 = vld [vmem:[#allocation11 + $0x604] ss:$16 sps:$4 sm:$0xff]   ;;  %v7570_v2 = vld [vmem:[#allocation11 + $0x5a0] ss:$16 sps:$4 sm:$0xff]  }
 0x2ab   :  { %v3733_v38 = vadd.f32 %v3732_v4, %v3692_v3  ;;  %v3694_v9 = vadd.f32 %v3693_v7, %v8306_v21  ;;  %v7549_v21 = vld [vmem:[#allocation11 + $0x480] ss:$16 sps:$4 sm:$0xff]   ;;  %v7575_v3 = vld [vmem:[#allocation11 + $0x584] ss:$16 sps:$4 sm:$0xff]  }
 0x2ac   :  { %v3734_v40 = vpop.f32.mrf.mxu1  ;;  %v3695_v13 = vpop.f32.mrf.mxu0  ;;  %v7630_v4 = vld [vmem:[#allocation11 + $0x600] ss:$16 sps:$4 sm:$0xff]   ;;  %v7578_v7 = vld [vmem:[#allocation11 + $0x564] ss:$16 sps:$4 sm:$0xff]  }
 0x2ad   :  { %v3947_v11 = vadd.f32 %v3916_v5, %v3733_v38  ;;  %v3735_v14 = vadd.f32 %v3734_v40, %v3694_v9  ;;  %5612 = vmatpush1.bf16.msra.mxu0 %v7543_v6  ;;  %v7638_v5 = vld [vmem:[#allocation11 + $0x7e4] ss:$16 sps:$4 sm:$0xff]   ;;  %v7573_v6 = vld [vmem:[#allocation11 + $0x580] ss:$16 sps:$4 sm:$0xff]  }
 0x2ae   :  { %v3736_v15 = vpop.f32.mrf.mxu1  ;;  %v3696_v18 = vpop.f32.mrf.mxu0  ;;  %5613 = vmatprep.subr.bf16.mxu0 %v7548_v8  ;;  %v7636_v8 = vld [vmem:[#allocation11 + $0x7e0] ss:$16 sps:$4 sm:$0xff]   ;;  %v7644_v38 = vld [vmem:[#allocation11 + $0x7c4] ss:$16 sps:$4 sm:$0xff]  }
 0x2af   :  { %v3948_v23 = vadd.f32 %v3920_v12, %v3735_v14  ;;  %v3955_v26 = vmax.f32 %v3947_v11, 0.0  ;;  %v7576_v9 = vld [vmem:[#allocation11 + $0x560] ss:$16 sps:$4 sm:$0xff]   ;;  %v7581_v40 = vld [vmem:[#allocation11 + $0x544] ss:$16 sps:$4 sm:$0xff]  }
 0x2b0   :  { %v3737_v24 = vpop.f32.mrf.mxu1  ;;  %v7642_v12 = vld [vmem:[#allocation11 + $0x7c0] ss:$16 sps:$4 sm:$0xff]   ;;  %v7650_v13 = vld [vmem:[#allocation11 + $0x7a4] ss:$16 sps:$4 sm:$0xff]  }
 0x2b1   :  { %v3956_v27 = vmax.f32 %v3948_v23, 0.0  ;;  %5614 = vmatpush1.bf16.msra.mxu0 %v7546_v17  ;;  %v8367_v32 = vpack.c.bf16 %v3955_v26, %v3955_v26  ;;  %v7579_v11 = vld [vmem:[#allocation11 + $0x540] ss:$16 sps:$4 sm:$0xff]   ;;  %v7584_v14 = vld [vmem:[#allocation11 + $0x524] ss:$16 sps:$4 sm:$0xff]  }
 0x2b2   :  { %5615 = vmatprep.subr.bf16.mxu0 %v7551_v22  ;;  %v7648_v15 = vld [vmem:[#allocation11 + $0x7a0] ss:$16 sps:$4 sm:$0xff]   ;;  %v7656_v17 = vld [vmem:[#allocation11 + $0x784] ss:$16 sps:$4 sm:$0xff]  }
 0x2b3   :  { %v8365_v28 = vpack.c.bf16 %v3956_v27, %v3956_v27  ;;  %v7582_v18 = vld [vmem:[#allocation11 + $0x520] ss:$16 sps:$4 sm:$0xff]   ;;  %v7587_v22 = vld [vmem:[#allocation11 + $0x504] ss:$16 sps:$4 sm:$0xff]   ;;  %v7593_v27 = vld [vmem:[#allocation11 + $0xec] ss:$16 sps:$4 sm:$0xff]  }
 0x2b4   :  { %v7654_v23 = vld [vmem:[#allocation11 + $0x780] ss:$16 sps:$4 sm:$0xff]   ;;  %v7662_v24 = vld [vmem:[#allocation11 + $0x764] ss:$16 sps:$4 sm:$0xff]  }
 0x2b5   :  { %5600 = vmatprep.mubr.bf16.mxu1 %v8365_v28  ;;  %5616 = vmatpush1.bf16.msra.mxu0 %v7549_v21  ;;  %v7585_v26 = vld [vmem:[#allocation11 + $0x500] ss:$16 sps:$4 sm:$0xff]  }
 0x2b6   :  { %5601 = vmatmul.mubr.bf16.vlgmr.msra.gmra.mxu1 %v8367_v32  ;;  %5617 = vmatprep.subr.bf16.mxu0 %v7554_v53  ;;  %v7660_v21 = vld [vmem:[#allocation11 + $0x760] ss:$16 sps:$4 sm:$0xff]   ;;  %v7668_v53 = vld [vmem:[#allocation11 + $0x744] ss:$16 sps:$4 sm:$0xff]  }
 0x2b7   :  { %5651 = vmatpush1.bf16.msra.mxu1 %v7588_v46  ;;  %v3923_v46 = vsub.s32 4, %v8325_v25 }
 0x2b8   :  { %5652 = vmatprep.subr.bf16.mxu1 %v7596_v33  ;;  %v3927_v33 = vsub.s32 5, %v8325_v25 }
 0x2b9   :  { %5618 = vmatpush1.bf16.msra.mxu0 %v7552_v50  ;;  %v7666_v50 = vld [vmem:[#allocation11 + $0x740] ss:$16 sps:$4 sm:$0xff]  }
 0x2ba   :  { %5619 = vmatprep.subr.bf16.mxu0 %v7557_v34 }
 0x2bb   :  { %5653 = vmatpush1.bf16.msra.mxu1 %v7594_v35  ;;  %v7674_v35 = vld [vmem:[#allocation11 + $0x724] ss:$16 sps:$4 sm:$0xff]  }
 0x2bc   :  { %5654 = vmatprep.subr.bf16.mxu1 %v7602_v0 }
 0x2bd   :  { %5620 = vmatpush1.bf16.msra.mxu0 %v7555_v39 }
 0x2be   :  { %5621 = vmatprep.subr.bf16.mxu0 %v7560_v41  ;;  %v3924_v41 = vrot.slane %v8336_v31, %v3923_v46  ;;  %v7671_v46 = vld [vmem:[#allocation11 + $0x14c] ss:$16 sps:$4 sm:$0xff]  }
 0x2bf   :  { %5655 = vmatpush1.bf16.msra.mxu1 %v7600_v1 }
 0x2c0   :  { %5656 = vmatprep.subr.bf16.mxu1 %v7608_v42 }
 0x2c1   :  { %5622 = vmatpush1.bf16.msra.mxu0 %v7558_v43 }
 0x2c2   :  { %5623 = vmatprep.subr.bf16.mxu0 %v7563_v44 }
 0x2c3   :  { %5657 = vmatpush1.bf16.msra.mxu1 %v7606_v55  ;;  %v3928_v55 = vrot.slane %v8336_v31, %v3927_v33  ;;  %v3931_v33 = vsub.s32 6, %v8325_v25 }
 0x2c4   :  { %5658 = vmatprep.subr.bf16.mxu1 %v7614_v29  ;;  %v7672_v29 = vld [vmem:[#allocation11 + $0x720] ss:$16 sps:$4 sm:$0xff]  }
 0x2c5   :  { %5624 = vmatpush1.bf16.msra.mxu0 %v7561_v45 }
 0x2c6   :  { %5625 = vmatprep.subr.bf16.mxu0 %v7566_v47  ;;  %v7680_v47 = vld [vmem:[#allocation11 + $0x704] ss:$16 sps:$4 sm:$0xff]  }
 0x2c7   :  { %5659 = vmatpush1.bf16.msra.mxu1 %v7612_v49 }
 0x2c8   :  { %5660 = vmatprep.subr.bf16.mxu1 %v7620_v58 }
 0x2c9   :  { %5626 = vmatpush2.bf16.msra.mxu0 %v7564_v51 }
 0x2ca   :  { %5627 = vmatprep.subr.bf16.mxu0 %v7569_v30 }
 0x2cb   :  { %5661 = vmatpush1.bf16.msra.mxu1 %v7618_v52 }
 0x2cc   :  { %5662 = vmatprep.subr.bf16.mxu1 %v7626_v56  ;;  %v7678_v56 = vld [vmem:[#allocation11 + $0x700] ss:$16 sps:$4 sm:$0xff]  }
 0x2cd   :  { %5628 = vmatpush2.bf16.msra.mxu0 %v7567_v57 }
 0x2ce   :  { %5629 = vmatprep.subr.bf16.mxu0 %v7572_v61  ;;  %v7686_v61 = vld [vmem:[#allocation11 + $0x2ec] ss:$16 sps:$4 sm:$0xff]  }
 0x2cf   :  { %5663 = vmatpush1.bf16.msra.mxu1 %v7624_v62 }
 0x2d0   :  { %5664 = vmatprep.subr.bf16.mxu1 %v7632_v19  ;;  %v7591_v19 = vld [vmem:[#allocation11 + $0xe8] ss:$16 sps:$4 sm:$0xff]  }
 0x2d1   :  { %5630 = vmatpush2.bf16.msra.mxu0 %v7570_v2 }
 0x2d2   :  { %5631 = vmatprep.subr.bf16.mxu0 %v7575_v3  ;;  %v7599_v3 = vld [vmem:[#allocation11 + $0xcc] ss:$16 sps:$4 sm:$0xff]  }
 0x2d3   :  { %5665 = vmatpush1.bf16.msra.mxu1 %v7630_v4  ;;  %v7597_v4 = vld [vmem:[#allocation11 + $0xc8] ss:$16 sps:$4 sm:$0xff]  }
 0x2d4   :  { %5666 = vmatprep.subr.bf16.mxu1 %v7638_v5  ;;  %v7605_v5 = vld [vmem:[#allocation11 + $0xac] ss:$16 sps:$4 sm:$0xff]  }
 0x2d5   :  { %5632 = vmatpush2.bf16.msra.mxu0 %v7573_v6  ;;  %v7603_v6 = vld [vmem:[#allocation11 + $0xa8] ss:$16 sps:$4 sm:$0xff]  }
 0x2d6   :  { %5633 = vmatprep.subr.bf16.mxu0 %v7578_v7  ;;  %v7611_v7 = vld [vmem:[#allocation11 + $0x8c] ss:$16 sps:$4 sm:$0xff]  }
 0x2d7   :  { %5667 = vmatpush2.bf16.msra.mxu1 %v7636_v8  ;;  %v7609_v8 = vld [vmem:[#allocation11 + $0x88] ss:$16 sps:$4 sm:$0xff]  }
 0x2d8   :  { %5668 = vmatprep.subr.bf16.mxu1 %v7644_v38  ;;  %v7617_v38 = vld [vmem:[#allocation11 + $0x6c] ss:$16 sps:$4 sm:$0xff]  }
 0x2d9   :  { %5634 = vmatpush2.bf16.msra.mxu0 %v7576_v9  ;;  %v7615_v9 = vld [vmem:[#allocation11 + $0x68] ss:$16 sps:$4 sm:$0xff]  }
 0x2da   :  { %5635 = vmatprep.subr.bf16.mxu0 %v7581_v40  ;;  %v7623_v40 = vld [vmem:[#allocation11 + $0x4c] ss:$16 sps:$4 sm:$0xff]  }
 0x2db   :  { %5669 = vmatpush2.bf16.msra.mxu1 %v7642_v12  ;;  %v7621_v12 = vld [vmem:[#allocation11 + $0x48] ss:$16 sps:$4 sm:$0xff]  }
 0x2dc   :  { %5670 = vmatprep.subr.bf16.mxu1 %v7650_v13  ;;  %v7629_v13 = vld [vmem:[#allocation11 + $0x2c] ss:$16 sps:$4 sm:$0xff]  }
 0x2dd   :  { %5636 = vmatpush2.bf16.msra.mxu0 %v7579_v11  ;;  %v7635_v11 = vld [vmem:[#allocation11 + $0xc] ss:$16 sps:$4 sm:$0xff]  }
 0x2de   :  { %5637 = vmatprep.subr.bf16.mxu0 %v7584_v14  ;;  %v7633_v14 = vld [vmem:[#allocation11 + $0x8] ss:$16 sps:$4 sm:$0xff]  }
 0x2df   :  { %5671 = vmatpush2.bf16.msra.mxu1 %v7648_v15  ;;  %v7641_v15 = vld [vmem:[#allocation11 + $0x1ec] ss:$16 sps:$4 sm:$0xff]  }
 0x2e0   :  { %5672 = vmatprep.subr.bf16.mxu1 %v7656_v17  ;;  %v7639_v17 = vld [vmem:[#allocation11 + $0x1e8] ss:$16 sps:$4 sm:$0xff]  }
 0x2e1   :  { %5638 = vmatpush2.bf16.msra.mxu0 %v7582_v18  ;;  %v7647_v18 = vld [vmem:[#allocation11 + $0x1cc] ss:$16 sps:$4 sm:$0xff]  }
 0x2e2   :  { %5639 = vmatprep.subr.bf16.mxu0 %v7587_v22  ;;  %v7645_v22 = vld [vmem:[#allocation11 + $0x1c8] ss:$16 sps:$4 sm:$0xff]  }
 0x2e3   :  { %5673 = vmatpush2.bf16.msra.mxu1 %v7654_v23  ;;  %v7653_v23 = vld [vmem:[#allocation11 + $0x1ac] ss:$16 sps:$4 sm:$0xff]  }
 0x2e4   :  { %5674 = vmatprep.subr.bf16.mxu1 %v7662_v24  ;;  %v7651_v24 = vld [vmem:[#allocation11 + $0x1a8] ss:$16 sps:$4 sm:$0xff]  }
 0x2e5   :  { %5640 = vmatpush2.bf16.msra.mxu0 %v7585_v26  ;;  %v7659_v26 = vld [vmem:[#allocation11 + $0x18c] ss:$16 sps:$4 sm:$0xff]  }
 0x2e6   :  { %5691 = vmatprep.subr.bf16.mxu0 %v7593_v27  ;;  %v7657_v27 = vld [vmem:[#allocation11 + $0x188] ss:$16 sps:$4 sm:$0xff]  }
 0x2e7   :  { %5675 = vmatpush2.bf16.msra.mxu1 %v7660_v21  ;;  %v7665_v21 = vld [vmem:[#allocation11 + $0x16c] ss:$16 sps:$4 sm:$0xff]  }
 0x2e8   :  { %v3773_v34 = vpop.f32.mrf.mxu0  ;;  %5676 = vmatprep.subr.bf16.mxu1 %v7668_v53  ;;  %v7663_v53 = vld [vmem:[#allocation11 + $0x168] ss:$16 sps:$4 sm:$0xff]  }
 0x2e9   :  { %v3774_v0 = vadd.f32 %v3773_v34, %v8311_v37  ;;  %v3935_v34 = vsub.s32 7, %v8325_v25 }
 0x2ea   :  { %v3814_v39 = vpop.f32.mrf.mxu1  ;;  %v3775_v1 = vpop.f32.mrf.mxu0 }
 0x2eb   :  { %v3815_v42 = vadd.f32 %v3814_v39, %v3774_v0  ;;  %v3776_v43 = vadd.f32 %v3775_v1, %v8314_v48  ;;  %5677 = vmatpush2.bf16.msra.mxu1 %v7666_v50  ;;  %v7669_v50 = vld [vmem:[#allocation11 + $0x148] ss:$16 sps:$4 sm:$0xff]   ;;  %v7677_v0 = vld [vmem:[#allocation11 + $0x12c] ss:$16 sps:$4 sm:$0xff]   ;;  %v3932_v1 = vrot.slane %v8336_v31, %v3931_v33 }
 0x2ec   :  { %v3816_v44 = vpop.f32.mrf.mxu1  ;;  %v3777_v45 = vpop.f32.mrf.mxu0  ;;  %5678 = vmatprep.subr.bf16.mxu1 %v7674_v35  ;;  %v7729_v33 = vld [vmem:[#allocation11 + $0x408] ss:$16 sps:$4 sm:$0xff]  }
 0x2ed   :  { %v3949_v49 = vadd.f32 %v3924_v41, %v3815_v42  ;;  %v3817_v58 = vadd.f32 %v3816_v44, %v3776_v43  ;;  %v7675_v45 = vld [vmem:[#allocation11 + $0x128] ss:$16 sps:$4 sm:$0xff]  }
 0x2ee   :  { %v3818_v51 = vpop.f32.mrf.mxu1  ;;  %v3778_v30 = vpop.f32.mrf.mxu0 }
 0x2ef   :  { %v3950_v37 = vadd.f32 %v3928_v55, %v3817_v58  ;;  %5679 = vmatpush2.bf16.msra.mxu1 %v7672_v29  ;;  %v3957_v57 = vmax.f32 %v3949_v49, 0.0  ;;  %v3936_v29 = vrot.slane %v8336_v31, %v3935_v34  ;;  %v7683_v49 = vld [vmem:[#allocation11 + $0x10c] ss:$16 sps:$4 sm:$0xff]   ;;  %v7684_v31 = vld [vmem:[#allocation11 + $0x2e8] ss:$16 sps:$4 sm:$0xff]  }
 0x2f0   :  { %v3819_v52 = vpop.f32.mrf.mxu1  ;;  %5680 = vmatprep.subr.bf16.mxu1 %v7680_v47  ;;  %v7737_v34 = vld [vmem:[#allocation11 + $0x5ec] ss:$16 sps:$4 sm:$0xff]  }
 0x2f1   :  { %v3958_v48 = vmax.f32 %v3950_v37, 0.0  ;;  %v8379_v2 = vpack.c.bf16 %v3957_v57, %v3957_v57 }
 0x2f3   :  { %v8377_v62 = vpack.c.bf16 %v3958_v48, %v3958_v48  ;;  %5681 = vmatpush2.bf16.msra.mxu1 %v7678_v56  ;;  %v7681_v56 = vld [vmem:[#allocation11 + $0x108] ss:$16 sps:$4 sm:$0xff]  }
 0x2f4   :  { %5732 = vmatprep.subr.bf16.mxu1 %v7686_v61  ;;  %v7689_v61 = vld [vmem:[#allocation11 + $0x4ec] ss:$16 sps:$4 sm:$0xff]  }
 0x2f5   :  { %5641 = vmatprep.mubr.bf16.mxu0 %v8377_v62 }
 0x2f6   :  { %5642 = vmatmul.mubr.bf16.vlgmr.msra.gmra.mxu0 %v8379_v2 }
 0x2f7   :  { %5692 = vmatpush1.bf16.msra.mxu0 %v7591_v19  ;;  %5723 = vmatprep.mubr.bf16.mxu0 %v8341_v60  ;;  %v7627_v60 = vld [vmem:[#allocation11 + $0x28] ss:$16 sps:$4 sm:$0xff]  }
 0x2f8   :  { %5693 = vmatprep.subr.bf16.mxu0 %v7599_v3  ;;  %v7687_v19 = vld [vmem:[#allocation11 + $0x4e8] ss:$16 sps:$4 sm:$0xff]  }
 0x2fb   :  { %5694 = vmatpush1.bf16.msra.mxu0 %v7597_v4  ;;  %v7692_v4 = vld [vmem:[#allocation11 + $0x2cc] ss:$16 sps:$4 sm:$0xff]  }
 0x2fc   :  { %5695 = vmatprep.subr.bf16.mxu0 %v7605_v5  ;;  %v7695_v5 = vld [vmem:[#allocation11 + $0x4cc] ss:$16 sps:$4 sm:$0xff]  }
 0x2ff   :  { %5696 = vmatpush1.bf16.msra.mxu0 %v7603_v6  ;;  %v7690_v6 = vld [vmem:[#allocation11 + $0x2c8] ss:$16 sps:$4 sm:$0xff]  }
 0x300   :  { %5697 = vmatprep.subr.bf16.mxu0 %v7611_v7  ;;  %v7693_v7 = vld [vmem:[#allocation11 + $0x4c8] ss:$16 sps:$4 sm:$0xff]  }
 0x303   :  { %5698 = vmatpush1.bf16.msra.mxu0 %v7609_v8  ;;  %v7698_v8 = vld [vmem:[#allocation11 + $0x2ac] ss:$16 sps:$4 sm:$0xff]  }
 0x304   :  { %5699 = vmatprep.subr.bf16.mxu0 %v7617_v38  ;;  %v7701_v38 = vld [vmem:[#allocation11 + $0x4ac] ss:$16 sps:$4 sm:$0xff]  }
 0x307   :  { %5700 = vmatpush1.bf16.msra.mxu0 %v7615_v9  ;;  %v7696_v9 = vld [vmem:[#allocation11 + $0x2a8] ss:$16 sps:$4 sm:$0xff]  }
 0x308   :  { %5701 = vmatprep.subr.bf16.mxu0 %v7623_v40  ;;  %v7699_v40 = vld [vmem:[#allocation11 + $0x4a8] ss:$16 sps:$4 sm:$0xff]  }
 0x30b   :  { %5702 = vmatpush1.bf16.msra.mxu0 %v7621_v12  ;;  %v7707_v12 = vld [vmem:[#allocation11 + $0x48c] ss:$16 sps:$4 sm:$0xff]  }
 0x30c   :  { %5703 = vmatprep.subr.bf16.mxu0 %v7629_v13  ;;  %v7702_v13 = vld [vmem:[#allocation11 + $0x288] ss:$16 sps:$4 sm:$0xff]  }
 0x30f   :  { %5704 = vmatpush1.bf16.msra.mxu0 %v7627_v60  ;;  %v7705_v60 = vld [vmem:[#allocation11 + $0x488] ss:$16 sps:$4 sm:$0xff]  }
 0x310   :  { %5705 = vmatprep.subr.bf16.mxu0 %v7635_v11  ;;  %v7708_v11 = vld [vmem:[#allocation11 + $0x268] ss:$16 sps:$4 sm:$0xff]  }
 0x313   :  { %5706 = vmatpush1.bf16.msra.mxu0 %v7633_v14  ;;  %v7711_v14 = vld [vmem:[#allocation11 + $0x468] ss:$16 sps:$4 sm:$0xff]  }
 0x314   :  { %5707 = vmatprep.subr.bf16.mxu0 %v7641_v15  ;;  %v7716_v15 = vld [vmem:[#allocation11 + $0x24c] ss:$16 sps:$4 sm:$0xff]  }
 0x317   :  { %5708 = vmatpush2.bf16.msra.mxu0 %v7639_v17  ;;  %v7719_v17 = vld [vmem:[#allocation11 + $0x44c] ss:$16 sps:$4 sm:$0xff]  }
 0x318   :  { %5709 = vmatprep.subr.bf16.mxu0 %v7647_v18  ;;  %v7714_v18 = vld [vmem:[#allocation11 + $0x248] ss:$16 sps:$4 sm:$0xff]  }
 0x31b   :  { %5710 = vmatpush2.bf16.msra.mxu0 %v7645_v22  ;;  %v7717_v22 = vld [vmem:[#allocation11 + $0x448] ss:$16 sps:$4 sm:$0xff]  }
 0x31c   :  { %5711 = vmatprep.subr.bf16.mxu0 %v7653_v23  ;;  %v7722_v23 = vld [vmem:[#allocation11 + $0x22c] ss:$16 sps:$4 sm:$0xff]  }
 0x31f   :  { %5712 = vmatpush2.bf16.msra.mxu0 %v7651_v24  ;;  %v7725_v24 = vld [vmem:[#allocation11 + $0x42c] ss:$16 sps:$4 sm:$0xff]  }
 0x320   :  { %5713 = vmatprep.subr.bf16.mxu0 %v7659_v26  ;;  %v7720_v26 = vld [vmem:[#allocation11 + $0x228] ss:$16 sps:$4 sm:$0xff]  }
 0x323   :  { %5714 = vmatpush2.bf16.msra.mxu0 %v7657_v27  ;;  %v7723_v27 = vld [vmem:[#allocation11 + $0x428] ss:$16 sps:$4 sm:$0xff]  }
 0x324   :  { %5715 = vmatprep.subr.bf16.mxu0 %v7665_v21  ;;  %v7728_v21 = vld [vmem:[#allocation11 + $0x20c] ss:$16 sps:$4 sm:$0xff]  }
 0x327   :  { %5716 = vmatpush2.bf16.msra.mxu0 %v7663_v53  ;;  %v7731_v53 = vld [vmem:[#allocation11 + $0x40c] ss:$16 sps:$4 sm:$0xff]  }
 0x328   :  { %v3855_v35 = vpop.f32.mrf.mxu0  ;;  %5717 = vmatprep.subr.bf16.mxu0 %v7671_v46  ;;  %v7726_v46 = vld [vmem:[#allocation11 + $0x208] ss:$16 sps:$4 sm:$0xff]  }
 0x329   :  { %v3856_v39 = vadd.f32 %v3855_v35, %v8319_v10  ;;  %v7732_v35 = vld [vmem:[#allocation11 + $0x3e8] ss:$16 sps:$4 sm:$0xff]  }
 0x32a   :  { %v3896_v41 = vpop.f32.mrf.mxu1  ;;  %v3857_v42 = vpop.f32.mrf.mxu0 }
 0x32b   :  { %v3897_v43 = vadd.f32 %v3896_v41, %v3856_v39  ;;  %v3858_v44 = vadd.f32 %v3857_v42, %v8322_v20  ;;  %5718 = vmatpush2.bf16.msra.mxu0 %v7669_v50  ;;  %v7734_v50 = vld [vmem:[#allocation11 + $0x3ec] ss:$16 sps:$4 sm:$0xff]   ;;  %v7741_v42 = vld [vmem:[#allocation11 + $0x5c8] ss:$16 sps:$4 sm:$0xff]  }
 0x32c   :  { %v3898_v55 = vpop.f32.mrf.mxu1  ;;  %v3859_v47 = vpop.f32.mrf.mxu0  ;;  %5719 = vmatprep.subr.bf16.mxu0 %v7677_v0  ;;  %v7735_v0 = vld [vmem:[#allocation11 + $0x5e8] ss:$16 sps:$4 sm:$0xff]   ;;  %v7740_v39 = vld [vmem:[#allocation11 + $0x3cc] ss:$16 sps:$4 sm:$0xff]  }
 0x32d   :  { %v3951_v58 = vadd.f32 %v3932_v1, %v3897_v43  ;;  %v3899_v51 = vadd.f32 %v3898_v55, %v3858_v44  ;;  %v7743_v41 = vld [vmem:[#allocation11 + $0x5cc] ss:$16 sps:$4 sm:$0xff]   ;;  %v7738_v1 = vld [vmem:[#allocation11 + $0x3c8] ss:$16 sps:$4 sm:$0xff]  }
 0x32e   :  { %v3900_v30 = vpop.f32.mrf.mxu1  ;;  %v3860_v37 = vpop.f32.mrf.mxu0  ;;  %v7746_v43 = vld [vmem:[#allocation11 + $0x3ac] ss:$16 sps:$4 sm:$0xff]   ;;  %v7744_v55 = vld [vmem:[#allocation11 + $0x3a8] ss:$16 sps:$4 sm:$0xff]  }
 0x32f   :  { %v3952_v10 = vadd.f32 %v3936_v29, %v3899_v51  ;;  %5720 = vmatpush2.bf16.msra.mxu0 %v7675_v45  ;;  %v3959_v57 = vmax.f32 %v3951_v58, 0.0  ;;  %v7749_v44 = vld [vmem:[#allocation11 + $0x5ac] ss:$16 sps:$4 sm:$0xff]   ;;  %v7747_v29 = vld [vmem:[#allocation11 + $0x5a8] ss:$16 sps:$4 sm:$0xff]  }
 0x330   :  { %v3901_v52 = vpop.f32.mrf.mxu1  ;;  %5721 = vmatprep.subr.bf16.mxu0 %v7683_v49  ;;  %v7752_v45 = vld [vmem:[#allocation11 + $0x38c] ss:$16 sps:$4 sm:$0xff]   ;;  %v7750_v49 = vld [vmem:[#allocation11 + $0x388] ss:$16 sps:$4 sm:$0xff]  }
 0x331   :  { %v3960_v20 = vmax.f32 %v3952_v10, 0.0  ;;  %v8392_v3 = vpack.c.bf16 %v3959_v57, %v3959_v57  ;;  %v7755_v47 = vld [vmem:[#allocation11 + $0x58c] ss:$16 sps:$4 sm:$0xff]   ;;  %v7753_v58 = vld [vmem:[#allocation11 + $0x588] ss:$16 sps:$4 sm:$0xff]  }
 0x332   :  { %v7758_v51 = vld [vmem:[#allocation11 + $0x36c] ss:$16 sps:$4 sm:$0xff]   ;;  %v7756_v37 = vld [vmem:[#allocation11 + $0x368] ss:$16 sps:$4 sm:$0xff]  }
 0x333   :  { %v8390_v48 = vpack.c.bf16 %v3960_v20, %v3960_v20  ;;  %5722 = vmatpush2.bf16.msra.mxu0 %v7681_v56  ;;  %v7761_v30 = vld [vmem:[#allocation11 + $0x56c] ss:$16 sps:$4 sm:$0xff]   ;;  %v7759_v10 = vld [vmem:[#allocation11 + $0x568] ss:$16 sps:$4 sm:$0xff]  }
 0x334   :  { %5773 = vmatprep.subr.bf16.mxu0 %v7689_v61  ;;  %v7764_v52 = vld [vmem:[#allocation11 + $0x34c] ss:$16 sps:$4 sm:$0xff]   ;;  %v7762_v57 = vld [vmem:[#allocation11 + $0x348] ss:$16 sps:$4 sm:$0xff]  }
 0x335   :  { %5682 = vmatprep.mubr.bf16.mxu1 %v8390_v48  ;;  %v7767_v56 = vld [vmem:[#allocation11 + $0x54c] ss:$16 sps:$4 sm:$0xff]   ;;  %v7765_v61 = vld [vmem:[#allocation11 + $0x548] ss:$16 sps:$4 sm:$0xff]  }
 0x336   :  { %5724 = vmatmul.mubr.bf16.vlgmr.msra.gmra.mxu0 %v8353_v63  ;;  %5683 = vmatmul.mubr.bf16.vlgmr.msra.gmra.mxu1 %v8392_v3  ;;  %v7704_v63 = vld [vmem:[#allocation11 + $0x28c] ss:$16 sps:$4 sm:$0xff]  }
 0x337   :  { %5733 = vmatpush1.bf16.msra.mxu1 %v7684_v31  ;;  %5774 = vmatpush1.bf16.msra.mxu0 %v7687_v19  ;;  %v7770_v31 = vld [vmem:[#allocation11 + $0x32c] ss:$16 sps:$4 sm:$0xff]  }
 0x338   :  { %5805 = vmatprep.mubr.bf16.mxu0 %v8377_v62  ;;  %5764 = vmatprep.mubr.bf16.mxu1 %v8365_v28  ;;  %v7710_v62 = vld [vmem:[#allocation11 + $0x26c] ss:$16 sps:$4 sm:$0xff]  }
 0x339   :  { %5734 = vmatprep.subr.bf16.mxu1 %v7692_v4  ;;  %5775 = vmatprep.subr.bf16.mxu0 %v7695_v5  ;;  %v7713_v28 = vld [vmem:[#allocation11 + $0x46c] ss:$16 sps:$4 sm:$0xff]   ;;  %v7768_v5 = vld [vmem:[#allocation11 + $0x328] ss:$16 sps:$4 sm:$0xff]  }
 0x33a   :  { %v7773_v19 = vld [vmem:[#allocation11 + $0x52c] ss:$16 sps:$4 sm:$0xff]  }
 0x33b   :  { %5735 = vmatpush1.bf16.msra.mxu1 %v7690_v6  ;;  %5776 = vmatpush1.bf16.msra.mxu0 %v7693_v7  ;;  %v7771_v6 = vld [vmem:[#allocation11 + $0x528] ss:$16 sps:$4 sm:$0xff]  }
 0x33c   :  { %5736 = vmatprep.subr.bf16.mxu1 %v7698_v8  ;;  %5777 = vmatprep.subr.bf16.mxu0 %v7701_v38  ;;  %v7776_v8 = vld [vmem:[#allocation11 + $0x30c] ss:$16 sps:$4 sm:$0xff]  }
 0x33d   :  { %v7779_v38 = vld [vmem:[#allocation11 + $0x50c] ss:$16 sps:$4 sm:$0xff]  }
 0x33f   :  { %5737 = vmatpush1.bf16.msra.mxu1 %v7696_v9  ;;  %5778 = vmatpush1.bf16.msra.mxu0 %v7699_v40  ;;  %v8402_v9 = vld [vmem:[%s8444_s6] sm:$0xf] }
 0x340   :  { %5738 = vmatprep.subr.bf16.mxu1 %v7704_v63  ;;  %5779 = vmatprep.subr.bf16.mxu0 %v7707_v12  ;;  %v7774_v63 = vld [vmem:[#allocation11 + $0x308] ss:$16 sps:$4 sm:$0xff]  }
 0x341   :  { %v7777_v12 = vld [vmem:[#allocation11 + $0x508] ss:$16 sps:$4 sm:$0xff]  }
 0x343   :  { %5739 = vmatpush1.bf16.msra.mxu1 %v7702_v13  ;;  %5780 = vmatpush1.bf16.msra.mxu0 %v7705_v60  ;;  %v7782_v13 = vld [vmem:[#allocation11 + $0x6ec] ss:$16 sps:$4 sm:$0xff]  }
 0x344   :  { %5740 = vmatprep.subr.bf16.mxu1 %v7710_v62  ;;  %5781 = vmatprep.subr.bf16.mxu0 %v7713_v28  ;;  %v7830_v60 = vld [vmem:[#allocation13 + $0x74] ss:$8 sps:$4 sm:$0xff]   ;;  %v4230_v62 = vrot.slane %v8402_v9, %v8347_v36  ;;  %v4234_v28 = vrot.slane %v8402_v9, %v8328_v54 }
 0x347   :  { %5741 = vmatpush1.bf16.msra.mxu1 %v7708_v11  ;;  %5782 = vmatpush1.bf16.msra.mxu0 %v7711_v14  ;;  %v7780_v11 = vld [vmem:[#allocation11 + $0x6e8] ss:$16 sps:$4 sm:$0xff]   ;;  %v7785_v14 = vld [vmem:[#allocation11 + $0x6cc] ss:$16 sps:$4 sm:$0xff]  }
 0x348   :  { %5742 = vmatprep.subr.bf16.mxu1 %v7716_v15  ;;  %5783 = vmatprep.subr.bf16.mxu0 %v7719_v17  ;;  %v7828_v15 = vld [vmem:[#allocation13 + $0x70] ss:$8 sps:$4 sm:$0xff]  }
 0x34b   :  { %5743 = vmatpush1.bf16.msra.mxu1 %v7714_v18  ;;  %5784 = vmatpush1.bf16.msra.mxu0 %v7717_v22  ;;  %v7833_v18 = vld [vmem:[#allocation13 + $0x64] ss:$8 sps:$4 sm:$0xff]  }
 0x34c   :  { %5744 = vmatprep.subr.bf16.mxu1 %v7722_v23  ;;  %5785 = vmatprep.subr.bf16.mxu0 %v7725_v24 }
 0x34f   :  { %5745 = vmatpush1.bf16.msra.mxu1 %v7720_v26  ;;  %5786 = vmatpush1.bf16.msra.mxu0 %v7723_v27  ;;  %v7783_v26 = vld [vmem:[#allocation11 + $0x6c8] ss:$16 sps:$4 sm:$0xff]  }
 0x350   :  { %5746 = vmatprep.subr.bf16.mxu1 %v7728_v21  ;;  %5787 = vmatprep.subr.bf16.mxu0 %v7731_v53  ;;  %v7788_v21 = vld [vmem:[#allocation11 + $0x6ac] ss:$16 sps:$4 sm:$0xff]   ;;  %v7831_v53 = vld [vmem:[#allocation13 + $0x60] ss:$8 sps:$4 sm:$0xff]  }
 0x353   :  { %5747 = vmatpush1.bf16.msra.mxu1 %v7726_v46  ;;  %5788 = vmatpush1.bf16.msra.mxu0 %v7729_v33  ;;  %v7836_v33 = vld [vmem:[#allocation13 + $0x54] ss:$8 sps:$4 sm:$0xff]  }
 0x354   :  { %5748 = vmatprep.subr.bf16.mxu1 %v7734_v50  ;;  %5789 = vmatprep.subr.bf16.mxu0 %v7737_v34  ;;  %v7791_v34 = vld [vmem:[#allocation11 + $0x68c] ss:$16 sps:$4 sm:$0xff]  }
 0x357   :  { %5749 = vmatpush2.bf16.msra.mxu1 %v7732_v35  ;;  %5790 = vmatpush2.bf16.msra.mxu0 %v7735_v0  ;;  %v7834_v35 = vld [vmem:[#allocation13 + $0x50] ss:$8 sps:$4 sm:$0xff]  }
 0x358   :  { %5750 = vmatprep.subr.bf16.mxu1 %v7740_v39  ;;  %5791 = vmatprep.subr.bf16.mxu0 %v7743_v41  ;;  %v7789_v0 = vld [vmem:[#allocation11 + $0x688] ss:$16 sps:$4 sm:$0xff]   ;;  %v7794_v39 = vld [vmem:[#allocation11 + $0x66c] ss:$16 sps:$4 sm:$0xff]  }
 0x359   :  { %v7837_v41 = vld [vmem:[#allocation13 + $0x40] ss:$8 sps:$4 sm:$0xff]  }
 0x35b   :  { %5751 = vmatpush2.bf16.msra.mxu1 %v7738_v1  ;;  %5792 = vmatpush2.bf16.msra.mxu0 %v7741_v42  ;;  %v7842_v1 = vld [vmem:[#allocation13 + $0x34] ss:$8 sps:$4 sm:$0xff]   ;;  %v7792_v42 = vld [vmem:[#allocation11 + $0x668] ss:$16 sps:$4 sm:$0xff]  }
 0x35c   :  { %5752 = vmatprep.subr.bf16.mxu1 %v7746_v43  ;;  %5793 = vmatprep.subr.bf16.mxu0 %v7749_v44  ;;  %v7797_v43 = vld [vmem:[#allocation11 + $0x64c] ss:$16 sps:$4 sm:$0xff]   ;;  %v7840_v44 = vld [vmem:[#allocation13 + $0x30] ss:$8 sps:$4 sm:$0xff]  }
 0x35f   :  { %5753 = vmatpush2.bf16.msra.mxu1 %v7744_v55  ;;  %5794 = vmatpush2.bf16.msra.mxu0 %v7747_v29  ;;  %v7845_v55 = vld [vmem:[#allocation13 + $0x24] ss:$8 sps:$4 sm:$0xff]   ;;  %v7795_v29 = vld [vmem:[#allocation11 + $0x648] ss:$16 sps:$4 sm:$0xff]  }
 0x360   :  { %5754 = vmatprep.subr.bf16.mxu1 %v7752_v45  ;;  %5795 = vmatprep.subr.bf16.mxu0 %v7755_v47  ;;  %v7800_v45 = vld [vmem:[#allocation11 + $0x62c] ss:$16 sps:$4 sm:$0xff]   ;;  %v7843_v47 = vld [vmem:[#allocation13 + $0x20] ss:$8 sps:$4 sm:$0xff]  }
 0x363   :  { %5755 = vmatpush2.bf16.msra.mxu1 %v7750_v49  ;;  %5796 = vmatpush2.bf16.msra.mxu0 %v7753_v58  ;;  %v7848_v49 = vld [vmem:[#allocation13 + $0x14] ss:$8 sps:$4 sm:$0xff]   ;;  %v7798_v58 = vld [vmem:[#allocation11 + $0x628] ss:$16 sps:$4 sm:$0xff]  }
 0x364   :  { %5756 = vmatprep.subr.bf16.mxu1 %v7758_v51  ;;  %5797 = vmatprep.subr.bf16.mxu0 %v7761_v30  ;;  %v7803_v51 = vld [vmem:[#allocation11 + $0x60c] ss:$16 sps:$4 sm:$0xff]   ;;  %v7846_v30 = vld [vmem:[#allocation13 + $0x10] ss:$8 sps:$4 sm:$0xff]  }
 0x367   :  { %5757 = vmatpush2.bf16.msra.mxu1 %v7756_v37  ;;  %5798 = vmatpush2.bf16.msra.mxu0 %v7759_v10  ;;  %v7851_v37 = vld [vmem:[#allocation13 + $0x4] ss:$8 sps:$4 sm:$0xff]   ;;  %v7801_v10 = vld [vmem:[#allocation11 + $0x608] ss:$16 sps:$4 sm:$0xff]  }
 0x368   :  { %v5561_v20 = vpop.f32.mrf.mxu0  ;;  %5758 = vmatprep.subr.bf16.mxu1 %v7764_v52  ;;  %5799 = vmatprep.subr.bf16.mxu0 %v7767_v56  ;;  %v7806_v52 = vld [vmem:[#allocation11 + $0x7ec] ss:$16 sps:$4 sm:$0xff]   ;;  %v7849_v56 = vld [vmem:[#allocation13] ss:$8 sps:$4 sm:$0xff]  }
 0x369   :  { %v5562_v17 = vadd.f32 %v5561_v20, %v4230_v62  ;;  %v7809_v20 = vld [vmem:[#allocation11 + $0x7cc] ss:$16 sps:$4 sm:$0xff]  }
 0x36a   :  { %v5563_v4 = vpop.f32.mrf.mxu0  ;;  %v7866_v62 = vld [vmem:[#allocation13 + $0xb4] ss:$8 sps:$4 sm:$0xff]  }
 0x36b   :  { %5759 = vmatpush2.bf16.msra.mxu1 %v7762_v57  ;;  %5800 = vmatpush2.bf16.msra.mxu0 %v7765_v61  ;;  %v5564_v23 = vadd.f32 %v5563_v4, %v4234_v28  ;;  %v7854_v57 = vld [vmem:[#allocation13 + $0xf4] ss:$8 sps:$4 sm:$0xff]   ;;  %v7804_v61 = vld [vmem:[#allocation11 + $0x7e8] ss:$16 sps:$4 sm:$0xff]  }
 0x36c   :  { %v5565_v7 = vpop.f32.mrf.mxu0  ;;  %5760 = vmatprep.subr.bf16.mxu1 %v7770_v31  ;;  %5801 = vmatprep.subr.bf16.mxu0 %v7773_v19  ;;  %v7852_v31 = vld [vmem:[#allocation13 + $0xf0] ss:$8 sps:$4 sm:$0xff]   ;;  %v7857_v19 = vld [vmem:[#allocation13 + $0xe4] ss:$8 sps:$4 sm:$0xff]  }
 0x36d   :  { %v7807_v4 = vld [vmem:[#allocation11 + $0x7c8] ss:$16 sps:$4 sm:$0xff]   ;;  %v7860_v7 = vld [vmem:[#allocation13 + $0xd4] ss:$8 sps:$4 sm:$0xff]  }
 0x36e   :  { %v5566_v40 = vpop.f32.mrf.mxu0  ;;  %v7816_v28 = vld [vmem:[#allocation11 + $0x768] ss:$16 sps:$4 sm:$0xff]  }
 0x36f   :  { %5761 = vmatpush2.bf16.msra.mxu1 %v7768_v5  ;;  %5802 = vmatpush2.bf16.msra.mxu0 %v7771_v6  ;;  %v7812_v5 = vld [vmem:[#allocation11 + $0x7ac] ss:$16 sps:$4 sm:$0xff]   ;;  %v7855_v6 = vld [vmem:[#allocation13 + $0xe0] ss:$8 sps:$4 sm:$0xff]   ;;  %v7858_v40 = vld [vmem:[#allocation13 + $0xd0] ss:$8 sps:$4 sm:$0xff]  }
 0x370   :  { %5762 = vmatprep.subr.bf16.mxu1 %v7776_v8  ;;  %5803 = vmatprep.subr.bf16.mxu0 %v7779_v38  ;;  %v7810_v8 = vld [vmem:[#allocation11 + $0x7a8] ss:$16 sps:$4 sm:$0xff]   ;;  %v7815_v38 = vld [vmem:[#allocation11 + $0x78c] ss:$16 sps:$4 sm:$0xff]  }
 0x373   :  { %5763 = vmatpush2.bf16.msra.mxu1 %v7774_v63  ;;  %5804 = vmatpush2.bf16.msra.mxu0 %v7777_v12  ;;  %v7863_v63 = vld [vmem:[#allocation13 + $0xc4] ss:$8 sps:$4 sm:$0xff]   ;;  %v7813_v12 = vld [vmem:[#allocation11 + $0x788] ss:$16 sps:$4 sm:$0xff]  }
 0x374   :  { %5814 = vmatprep.subr.bf16.mxu1 %v7782_v13  ;;  %6259 = vmatprep.subr.bf16.mxu0 %v7830_v60  ;;  %v7818_v13 = vld [vmem:[#allocation11 + $0x76c] ss:$16 sps:$4 sm:$0xff]   ;;  %v7861_v60 = vld [vmem:[#allocation13 + $0xc0] ss:$8 sps:$4 sm:$0xff]  }
 0x376   :  { %5765 = vmatmul.mubr.bf16.vlgmr.msra.gmra.mxu1 %v8367_v32  ;;  %5806 = vmatmul.mubr.bf16.vlgmr.msra.gmra.mxu0 %v8379_v2  ;;  %v5602_v22 = vpop.f32.mrf.mxu1  ;;  %v7786_v2 = vld [vmem:[#allocation11 + $0x6a8] ss:$16 sps:$4 sm:$0xff]  }
 0x377   :  { %v8410_v24 = vadd.f32 %v5602_v22, %v5562_v17  ;;  %5815 = vmatpush1.bf16.msra.mxu1 %v7780_v11  ;;  %5846 = vmatprep.mubr.bf16.mxu1 %v8390_v48  ;;  %v7839_v48 = vld [vmem:[#allocation13 + $0x44] ss:$8 sps:$4 sm:$0xff]   ;;  %v7819_v17 = vld [vmem:[#allocation11 + $0x748] ss:$16 sps:$4 sm:$0xff]  }
 0x378   :  { %v5604_v27 = vpop.f32.mrf.mxu1  ;;  %5816 = vmatprep.subr.bf16.mxu1 %v7785_v14  ;;  %6260 = vmatpush1.bf16.msra.mxu0 %v7828_v15  ;;  %v7821_v11 = vld [vmem:[#allocation11 + $0x74c] ss:$16 sps:$4 sm:$0xff]   ;;  %v7864_v14 = vld [vmem:[#allocation13 + $0xb0] ss:$8 sps:$4 sm:$0xff]   ;;  %v7867_v22 = vld [vmem:[#allocation13 + $0xa0] ss:$8 sps:$4 sm:$0xff]  }
 0x379   :  { %v8413_v46 = vadd.f32 %v5604_v27, %v5564_v23  ;;  %6261 = vmatprep.subr.bf16.mxu0 %v7833_v18  ;;  %v7869_v15 = vld [vmem:[#allocation13 + $0xa4] ss:$8 sps:$4 sm:$0xff]   ;;  %v7872_v23 = vld [vmem:[#allocation13 + $0x94] ss:$8 sps:$4 sm:$0xff]  }
 0x37a   :  { %v5606_v32 = vpop.f32.mrf.mxu1  ;;  %v7824_v18 = vld [vmem:[#allocation11 + $0x72c] ss:$16 sps:$4 sm:$0xff]  }
 0x37b   :  { %5817 = vmatpush1.bf16.msra.mxu1 %v7783_v26  ;;  %v7822_v26 = vld [vmem:[#allocation11 + $0x728] ss:$16 sps:$4 sm:$0xff]   ;;  %v7827_v27 = vld [vmem:[#allocation11 + $0x70c] ss:$16 sps:$4 sm:$0xff]  }
 0x37c   :  { %v5607_v50 = vpop.f32.mrf.mxu1  ;;  %5818 = vmatprep.subr.bf16.mxu1 %v7788_v21  ;;  %6262 = vmatpush1.bf16.msra.mxu0 %v7831_v53  ;;  %v7870_v21 = vld [vmem:[#allocation13 + $0x90] ss:$8 sps:$4 sm:$0xff]   ;;  %v7875_v53 = vld [vmem:[#allocation13 + $0x84] ss:$8 sps:$4 sm:$0xff]   ;;  %v7873_v32 = vld [vmem:[#allocation13 + $0x80] ss:$8 sps:$4 sm:$0xff]  }
 0x37d   :  { %6263 = vmatprep.subr.bf16.mxu0 %v7836_v33  ;;  %v7825_v33 = vld [vmem:[#allocation11 + $0x708] ss:$16 sps:$4 sm:$0xff]  }
 0x37f   :  { %5819 = vmatpush1.bf16.msra.mxu1 %v7786_v2 }
 0x380   :  { %5820 = vmatprep.subr.bf16.mxu1 %v7791_v34  ;;  %6264 = vmatpush1.bf16.msra.mxu0 %v7834_v35 }
 0x381   :  { %6265 = vmatprep.subr.bf16.mxu0 %v7839_v48 }
 0x383   :  { %5821 = vmatpush1.bf16.msra.mxu1 %v7789_v0  ;;  %v7876_v0 = vld [vmem:[#allocation13 + $0x170] ss:$8 sps:$4 sm:$0xff]  }
 0x384   :  { %5822 = vmatprep.subr.bf16.mxu1 %v7794_v39  ;;  %6266 = vmatpush1.bf16.msra.mxu0 %v7837_v41  ;;  %v7878_v39 = vld [vmem:[#allocation13 + $0x174] ss:$8 sps:$4 sm:$0xff]   ;;  %v7881_v41 = vld [vmem:[#allocation13 + $0x164] ss:$8 sps:$4 sm:$0xff]  }
 0x385   :  { %6267 = vmatprep.subr.bf16.mxu0 %v7842_v1  ;;  %v7879_v1 = vld [vmem:[#allocation13 + $0x160] ss:$8 sps:$4 sm:$0xff]  }
 0x387   :  { %5823 = vmatpush1.bf16.msra.mxu1 %v7792_v42  ;;  %v7884_v42 = vld [vmem:[#allocation13 + $0x154] ss:$8 sps:$4 sm:$0xff]  }
 0x388   :  { %5824 = vmatprep.subr.bf16.mxu1 %v7797_v43  ;;  %6268 = vmatpush1.bf16.msra.mxu0 %v7840_v44  ;;  %v7882_v43 = vld [vmem:[#allocation13 + $0x150] ss:$8 sps:$4 sm:$0xff]   ;;  %v7887_v44 = vld [vmem:[#allocation13 + $0x144] ss:$8 sps:$4 sm:$0xff]  }
 0x389   :  { %6269 = vmatprep.subr.bf16.mxu0 %v7845_v55  ;;  %v7888_v55 = vld [vmem:[#allocation13 + $0x130] ss:$8 sps:$4 sm:$0xff]  }
 0x38b   :  { %5825 = vmatpush1.bf16.msra.mxu1 %v7795_v29  ;;  %v7893_v29 = vld [vmem:[#allocation13 + $0x124] ss:$8 sps:$4 sm:$0xff]  }
 0x38c   :  { %5826 = vmatprep.subr.bf16.mxu1 %v7800_v45  ;;  %6270 = vmatpush1.bf16.msra.mxu0 %v7843_v47  ;;  %v7891_v45 = vld [vmem:[#allocation13 + $0x120] ss:$8 sps:$4 sm:$0xff]   ;;  %v7896_v47 = vld [vmem:[#allocation13 + $0x114] ss:$8 sps:$4 sm:$0xff]  }
 0x38d   :  { %6271 = vmatprep.subr.bf16.mxu0 %v7848_v49  ;;  %v7894_v49 = vld [vmem:[#allocation13 + $0x110] ss:$8 sps:$4 sm:$0xff]  }
 0x38f   :  { %5827 = vmatpush1.bf16.msra.mxu1 %v7798_v58  ;;  %v7899_v58 = vld [vmem:[#allocation13 + $0x104] ss:$8 sps:$4 sm:$0xff]  }
 0x390   :  { %5828 = vmatprep.subr.bf16.mxu1 %v7803_v51  ;;  %6272 = vmatpush1.bf16.msra.mxu0 %v7846_v30  ;;  %v7897_v51 = vld [vmem:[#allocation13 + $0x100] ss:$8 sps:$4 sm:$0xff]   ;;  %v7902_v30 = vld [vmem:[#allocation13 + $0x1f4] ss:$8 sps:$4 sm:$0xff]  }
 0x391   :  { %6273 = vmatprep.subr.bf16.mxu0 %v7851_v37  ;;  %v7900_v37 = vld [vmem:[#allocation13 + $0x1f0] ss:$8 sps:$4 sm:$0xff]  }
 0x393   :  { %5829 = vmatpush1.bf16.msra.mxu1 %v7801_v10  ;;  %v7905_v10 = vld [vmem:[#allocation13 + $0x1e4] ss:$8 sps:$4 sm:$0xff]  }
 0x394   :  { %5830 = vmatprep.subr.bf16.mxu1 %v7806_v52  ;;  %6274 = vmatpush1.bf16.msra.mxu0 %v7849_v56  ;;  %v7903_v52 = vld [vmem:[#allocation13 + $0x1e0] ss:$8 sps:$4 sm:$0xff]   ;;  %v7908_v56 = vld [vmem:[#allocation13 + $0x1d4] ss:$8 sps:$4 sm:$0xff]  }
 0x395   :  { %6275 = vmatprep.subr.bf16.mxu0 %v7854_v57  ;;  %v7906_v57 = vld [vmem:[#allocation13 + $0x1d0] ss:$8 sps:$4 sm:$0xff]  }
 0x397   :  { %5831 = vmatpush2.bf16.msra.mxu1 %v7804_v61  ;;  %v7911_v61 = vld [vmem:[#allocation13 + $0x1c4] ss:$8 sps:$4 sm:$0xff]  }
 0x398   :  { %5832 = vmatprep.subr.bf16.mxu1 %v7809_v20  ;;  %6276 = vmatpush2.bf16.msra.mxu0 %v7852_v31  ;;  %v7909_v20 = vld [vmem:[#allocation13 + $0x1c0] ss:$8 sps:$4 sm:$0xff]   ;;  %v7914_v31 = vld [vmem:[#allocation13 + $0x1b4] ss:$8 sps:$4 sm:$0xff]  }
 0x399   :  { %6277 = vmatprep.subr.bf16.mxu0 %v7857_v19  ;;  %v7912_v19 = vld [vmem:[#allocation13 + $0x1b0] ss:$8 sps:$4 sm:$0xff]  }
 0x39b   :  { %5833 = vmatpush2.bf16.msra.mxu1 %v7807_v4  ;;  %v7917_v4 = vld [vmem:[#allocation13 + $0x1a4] ss:$8 sps:$4 sm:$0xff]  }
 0x39c   :  { %5834 = vmatprep.subr.bf16.mxu1 %v7812_v5  ;;  %6278 = vmatpush2.bf16.msra.mxu0 %v7855_v6  ;;  %v7915_v5 = vld [vmem:[#allocation13 + $0x1a0] ss:$8 sps:$4 sm:$0xff]  }
 0x39d   :  { %6279 = vmatprep.subr.bf16.mxu0 %v7860_v7 }
 0x39f   :  { %5835 = vmatpush2.bf16.msra.mxu1 %v7810_v8 }
 0x3a0   :  { %5836 = vmatprep.subr.bf16.mxu1 %v7815_v38  ;;  %6280 = vmatpush2.bf16.msra.mxu0 %v7858_v40  ;;  %v7920_v40 = vld [vmem:[#allocation13 + $0x194] ss:$8 sps:$4 sm:$0xff]  }
 0x3a1   :  { %6281 = vmatprep.subr.bf16.mxu0 %v7863_v63 }
 0x3a3   :  { %5837 = vmatpush2.bf16.msra.mxu1 %v7813_v12 }
 0x3a4   :  { %5838 = vmatprep.subr.bf16.mxu1 %v7818_v13  ;;  %6282 = vmatpush2.bf16.msra.mxu0 %v7861_v60  ;;  %v7918_v13 = vld [vmem:[#allocation13 + $0x190] ss:$8 sps:$4 sm:$0xff]  }
 0x3a5   :  { %6283 = vmatprep.subr.bf16.mxu0 %v7866_v62 }
 0x3a7   :  { %5839 = vmatpush2.bf16.msra.mxu1 %v7816_v28 }
 0x3a8   :  { %5840 = vmatprep.subr.bf16.mxu1 %v7821_v11  ;;  %6284 = vmatpush2.bf16.msra.mxu0 %v7864_v14 }
 0x3a9   :  { %6285 = vmatprep.subr.bf16.mxu0 %v7869_v15  ;;  %v7923_v15 = vld [vmem:[#allocation13 + $0x184] ss:$8 sps:$4 sm:$0xff]  }
 0x3ab   :  { %5841 = vmatpush2.bf16.msra.mxu1 %v7819_v17 }
 0x3ac   :  { %5842 = vmatprep.subr.bf16.mxu1 %v7824_v18  ;;  %6286 = vmatpush2.bf16.msra.mxu0 %v7867_v22  ;;  %v7921_v22 = vld [vmem:[#allocation13 + $0x180] ss:$8 sps:$4 sm:$0xff]  }
 0x3ad   :  { %6287 = vmatprep.subr.bf16.mxu0 %v7872_v23 }
 0x3af   :  { %5843 = vmatpush2.bf16.msra.mxu1 %v7822_v26  ;;  %v4238_v26 = vrot.slane %v8402_v9, %v3915_v16  ;;  %v7929_v16 = vld [vmem:[#allocation14 + $0x28] sm:$0xff]  }
 0x3b0   :  { %5844 = vmatprep.subr.bf16.mxu1 %v7827_v27  ;;  %6288 = vmatpush2.bf16.msra.mxu0 %v7870_v21 }
 0x3b1   :  { %6289 = vmatprep.subr.bf16.mxu0 %v7875_v53 }
 0x3b3   :  { %5845 = vmatpush2.bf16.msra.mxu1 %v7825_v33 }
 0x3b4   :  { %6290 = vmatpush2.bf16.msra.mxu0 %v7873_v32  ;;  %6300 = vmatprep.subr.bf16.mxu1 %v7878_v39  ;;  %v7924_v39 = vld [vmem:[#allocation14 + $0x78] sm:$0xff]  }
 0x3b5   :  { %7397 = vmatprep.subr.bf16.mxu0 %v7924_v39 }
 0x3b6   :  { %5847 = vmatmul.mubr.bf16.vlgmr.msra.gmra.mxu1 %v8392_v3  ;;  %v5643_v2 = vpop.f32.mrf.mxu0  ;;  %v7885_v3 = vld [vmem:[#allocation13 + $0x140] ss:$8 sps:$4 sm:$0xff]  }
 0x3b7   :  { %v8417_v50 = vadd.f32 %v5643_v2, %v8410_v24  ;;  %6301 = vmatpush1.bf16.msra.mxu1 %v7876_v0  ;;  %v7890_v24 = vld [vmem:[#allocation13 + $0x134] ss:$8 sps:$4 sm:$0xff]  }
 0x3b8   :  { %v5645_v34 = vpop.f32.mrf.mxu0  ;;  %6302 = vmatprep.subr.bf16.mxu1 %v7881_v41  ;;  %v7925_v41 = vld [vmem:[#allocation14 + $0x38] sm:$0xff]  }
 0x3b9   :  { %v5646_v8 = vadd.f32 %v5645_v34, %v8413_v46 }
 0x3ba   :  { %v5647_v35 = vpop.f32.mrf.mxu0 }
 0x3bb   :  { %6303 = vmatpush1.bf16.msra.mxu1 %v7879_v1  ;;  %v7926_v1 = vld [vmem:[#allocation14 + $0x70] sm:$0xff]  }
 0x3bc   :  { %v5648_v48 = vpop.f32.mrf.mxu0  ;;  %6304 = vmatprep.subr.bf16.mxu1 %v7884_v42  ;;  %v7927_v42 = vld [vmem:[#allocation14 + $0x30] sm:$0xff]  }
 0x3bf   :  { %6305 = vmatpush1.bf16.msra.mxu1 %v7882_v43  ;;  %v7928_v43 = vld [vmem:[#allocation14 + $0x68] sm:$0xff]  }
 0x3c0   :  { %6306 = vmatprep.subr.bf16.mxu1 %v7887_v44  ;;  %v7930_v44 = vld [vmem:[#allocation14 + $0x60] sm:$0xff]  }
 0x3c3   :  { %6307 = vmatpush1.bf16.msra.mxu1 %v7885_v3  ;;  %v7931_v3 = vld [vmem:[#allocation14 + $0x20] sm:$0xff]  }
 0x3c4   :  { %6308 = vmatprep.subr.bf16.mxu1 %v7890_v24  ;;  %v7932_v24 = vld [vmem:[#allocation14 + $0x58] sm:$0xff]  }
 0x3c7   :  { %6309 = vmatpush1.bf16.msra.mxu1 %v7888_v55  ;;  %v7933_v55 = vld [vmem:[#allocation14 + $0x18] sm:$0xff]  }
 0x3c8   :  { %6310 = vmatprep.subr.bf16.mxu1 %v7893_v29  ;;  %v7934_v29 = vld [vmem:[#allocation14 + $0x50] sm:$0xff]  }
 0x3cb   :  { %6311 = vmatpush1.bf16.msra.mxu1 %v7891_v45  ;;  %v7935_v45 = vld [vmem:[#allocation14 + $0x10] sm:$0xff]  }
 0x3cc   :  { %6312 = vmatprep.subr.bf16.mxu1 %v7896_v47  ;;  %v4242_v47 = vrot.slane %v8402_v9, %v3919_v59  ;;  %v7938_v9 = vld [vmem:[#allocation14 + $0x40] sm:$0xff]  }
 0x3cf   :  { %6313 = vmatpush1.bf16.msra.mxu1 %v7894_v49 }
 0x3d0   :  { %6314 = vmatprep.subr.bf16.mxu1 %v7899_v58 }
 0x3d3   :  { %6315 = vmatpush1.bf16.msra.mxu1 %v7897_v51 }
 0x3d4   :  { %6316 = vmatprep.subr.bf16.mxu1 %v7902_v30 }
 0x3d7   :  { %6317 = vmatpush2.bf16.msra.mxu1 %v7900_v37 }
 0x3d8   :  { %6318 = vmatprep.subr.bf16.mxu1 %v7905_v10 }
 0x3db   :  { %6319 = vmatpush2.bf16.msra.mxu1 %v7903_v52 }
 0x3dc   :  { %6320 = vmatprep.subr.bf16.mxu1 %v7908_v56 }
 0x3df   :  { %6321 = vmatpush2.bf16.msra.mxu1 %v7906_v57 }
 0x3e0   :  { %6322 = vmatprep.subr.bf16.mxu1 %v7911_v61 }
 0x3e3   :  { %6323 = vmatpush2.bf16.msra.mxu1 %v7909_v20 }
 0x3e4   :  { %6324 = vmatprep.subr.bf16.mxu1 %v7914_v31 }
 0x3e7   :  { %6325 = vmatpush2.bf16.msra.mxu1 %v7912_v19 }
 0x3e8   :  { %6326 = vmatprep.subr.bf16.mxu1 %v7917_v4 }
 0x3eb   :  { %6327 = vmatpush2.bf16.msra.mxu1 %v7915_v5  ;;  %v7936_v5 = vld [vmem:[#allocation14 + $0x48] sm:$0xff]  }
 0x3ec   :  { %6328 = vmatprep.subr.bf16.mxu1 %v7920_v40 }
 0x3ef   :  { %6329 = vmatpush2.bf16.msra.mxu1 %v7918_v13 }
 0x3f0   :  { %6330 = vmatprep.subr.bf16.mxu1 %v7923_v15 }
 0x3f3   :  { %6331 = vmatpush2.bf16.msra.mxu1 %v7921_v22 }
 0x3f6   :  { %v5725_v6 = vpop.f32.mrf.mxu0  ;;  %v5684_v7 = vpop.f32.mrf.mxu1 }
 0x3f7   :  { %v5685_v38 = vadd.f32 %v5684_v7, %v8417_v50  ;;  %v5726_v27 = vadd.f32 %v5725_v6, %v4238_v26  ;;  %v7937_v6 = vld [vmem:[#allocation14 + $0x8] sm:$0xff]  }
 0x3f8   :  { %v5727_v63 = vpop.f32.mrf.mxu0  ;;  %v5686_v12 = vpop.f32.mrf.mxu1 }
 0x3f9   :  { %v5687_v60 = vadd.f32 %v5686_v12, %v5646_v8  ;;  %v5855_v62 = vmax.f32 %v5685_v38, 0.0  ;;  %v5728_v49 = vadd.f32 %v5727_v63, %v4242_v47  ;;  %v7939_v8 = vld [vmem:[#allocation14] sm:$0xff]   ;;  %v5927_v38 = vld [vmem:[%s8446_s8] sm:$0x3] }
 0x3fa   :  { %v5729_v28 = vpop.f32.mrf.mxu0  ;;  %v5688_v11 = vpop.f32.mrf.mxu1  ;;  %v5932_v40 = vrot.slane %v5927_v38, %v8347_v36  ;;  %v5936_v63 = vrot.slane %v5927_v38, %v8328_v54  ;;  %v7380_v36 = vld [vmem:[%s8448_s10] ss:$0 sm:$0xff] }
 0x3fb   :  { %v5856_v14 = vmax.f32 %v5687_v60, 0.0  ;;  %v5859_v46 = vpack.c.bf16 %v5855_v62, %v5855_v62 }
 0x3fc   :  { %v5730_v17 = vpop.f32.mrf.mxu0  ;;  %v5689_v18 = vpop.f32.mrf.mxu1 }
 0x3fd   :  { %v5860_v23 = vpack.c.bf16 %v5856_v14, %v5856_v14 }
 0x3ff   :  { %6291 = vmatprep.mubr.bf16.mxu0 %v5860_v23 }
 0x400   :  { %6292 = vmatmul.mubr.bf16.vlgmr.msra.gmra.mxu0 %v5859_v46 }
 0x401   :  { %7398 = vmatpush3.bf16.msra.mxu0 %v7925_v41 }
 0x402   :  { %7399 = vmatprep.subr.bf16.mxu0 %v7926_v1 }
 0x405   :  { %7400 = vmatpush3.bf16.msra.mxu0 %v7927_v42 }
 0x406   :  { %7401 = vmatprep.subr.bf16.mxu0 %v7928_v43 }
 0x409   :  { %7402 = vmatpush3.bf16.msra.mxu0 %v7929_v16 }
 0x40a   :  { %7403 = vmatprep.subr.bf16.mxu0 %v7930_v44 }
 0x40d   :  { %7404 = vmatpush3.bf16.msra.mxu0 %v7931_v3 }
 0x40e   :  { %7405 = vmatprep.subr.bf16.mxu0 %v7932_v24 }
 0x411   :  { %7406 = vmatpush3.bf16.msra.mxu0 %v7933_v55 }
 0x412   :  { %7407 = vmatprep.subr.bf16.mxu0 %v7934_v29 }
 0x415   :  { %7408 = vmatpush3.bf16.msra.mxu0 %v7935_v45 }
 0x416   :  { %7409 = vmatprep.subr.bf16.mxu0 %v7936_v5 }
 0x419   :  { %7410 = vmatpush3.bf16.msra.mxu0 %v7937_v6 }
 0x41a   :  { %7411 = vmatprep.subr.bf16.mxu0 %v7938_v9 }
 0x41d   :  { %7412 = vmatpush3.bf16.msra.mxu0 %v7939_v8 }
 0x436   :  { %v5766_v21 = vpop.f32.mrf.mxu1  ;;  %v5807_v53 = vpop.f32.mrf.mxu0 }
 0x437   :  { %v5767_v33 = vadd.f32 %v5766_v21, %v5726_v27 }
 0x438   :  { %v5768_v32 = vpop.f32.mrf.mxu1  ;;  %v5809_v2 = vpop.f32.mrf.mxu0 }
 0x439   :  { %v5808_v50 = vadd.f32 %v5807_v53, %v5767_v33  ;;  %v5769_v58 = vadd.f32 %v5768_v32, %v5728_v49 }
 0x43a   :  { %v5770_v34 = vpop.f32.mrf.mxu1  ;;  %v5811_v35 = vpop.f32.mrf.mxu0 }
 0x43b   :  { %v5810_v30 = vadd.f32 %v5809_v2, %v5769_v58 }
 0x43c   :  { %v5771_v48 = vpop.f32.mrf.mxu1  ;;  %v5812_v0 = vpop.f32.mrf.mxu0 }
 0x476   :  { %v5848_v51 = vpop.f32.mrf.mxu1 }
 0x477   :  { %v5849_v37 = vadd.f32 %v5848_v51, %v5808_v50 }
 0x478   :  { %v5850_v10 = vpop.f32.mrf.mxu1 }
 0x479   :  { %v5851_v52 = vadd.f32 %v5850_v10, %v5810_v30  ;;  %v5857_v56 = vmax.f32 %v5849_v37, 0.0 }
 0x47a   :  { %v5852_v57 = vpop.f32.mrf.mxu1 }
 0x47b   :  { %v5858_v61 = vmax.f32 %v5851_v52, 0.0  ;;  %v5861_v19 = vpack.c.bf16 %v5857_v56, %v5857_v56 }
 0x47c   :  { %v5853_v20 = vpop.f32.mrf.mxu1 }
 0x47d   :  { %v5862_v31 = vpack.c.bf16 %v5858_v61, %v5858_v61 }
 0x47f   :  { %6332 = vmatprep.mubr.bf16.mxu1 %v5862_v31 }
 0x480   :  { %6333 = vmatmul.mubr.bf16.vlgmr.msra.gmra.mxu1 %v5861_v19 }
 0x4c0   :  { %v6293_v4 = vpop.f32.mrf.mxu0 }
 0x4c1   :  { %v6294_v12 = vadd.f32 %v6293_v4, %v5932_v40 }
 0x4c2   :  { %v6295_v25 = vpop.f32.mrf.mxu0 }
 0x4c3   :  { %v6296_v60 = vadd.f32 %v6295_v25, %v5936_v63 }
 0x4c4   :  { %v6297_v59 = vpop.f32.mrf.mxu0 }
 0x4c6   :  { %v6298_v7 = vpop.f32.mrf.mxu0 }
 0x540   :  { %v6334_v13 = vpop.f32.mrf.mxu1 }
 0x541   :  { %v6335_v62 = vadd.f32 %v6334_v13, %v6294_v12 }
 0x542   :  { %v6336_v28 = vpop.f32.mrf.mxu1 }
 0x543   :  { %v6337_v11 = vadd.f32 %v6336_v28, %v6296_v60  ;;  %v6341_v14 = vmax.f32 %v6335_v62, 0.0 }
 0x544   :  { %v6338_v15 = vpop.f32.mrf.mxu1 }
 0x545   :  { %v6342_v17 = vmax.f32 %v6337_v11, 0.0  ;;  %v6343_v23 = vpack.c.bf16 %v6341_v14, %v6341_v14 }
 0x546   :  { %v6339_v18 = vpop.f32.mrf.mxu1 }
 0x547   :  { %v6344_v22 = vpack.c.bf16 %v6342_v17, %v6342_v17 }
 0x549   :  { %6512 = vmatprep.mubr.bf16.mxu0 %v6344_v22 }
 0x54a   :  { %6513 = vmatmul.mubr.bf16.vlgmr.msra.gmra.mxu0 %v6343_v23 }
 0x60a   :  { %v7413_v46 = vpop.f32.mrf.mxu0 }
 0x60c   :  { %v7414_v54 = vpop.f32.mrf.mxu0 }
 0x60d   :  { %v7415_v26 = vadd.f32 %v7414_v54, %v7413_v46 }
 0x60e   :  { %v7416_v27 = vpop.f32.mrf.mxu0 }
 0x60f   :  { %v6515_v21 = vadd.f32 %v7415_v26, %v7380_v36 }
 0x610   :  { %v7417_v53 = vpop.f32.mrf.mxu0 }
 0x611   :  { %6520 = vst [vmem:[#allocation16] sm:$0xff] %v6515_v21 }
 0x612   :  { %8111 = shalt.err (!%p8108_p2)
}
 0x613   :  { %6530 = dma.vmem_to_hbm [thread:$0]  %s6528_s22, 128, %s8449_s11, [#allocation4]  }
 0x614   :  { %8130 = dma.done.wait [#allocation4], 128  }
 0x615   :  { %8131 = vsyncadd [#allocation4], 4294967168 }
 0x616   :  { %6534 = vsyncpa [#allocation3], 1 }
 0x617   :  { %6535 = vsyncpa [#allocation6], 1 }
 0x618   :  { %6536 = vsyncpa [#allocation9], 1 }
 0x619   :  { %6537 = vsyncpa [#allocation12], 1 }
 0x61a   :  { %6538 = vsyncpa [#allocation15], 1 }
 0x61b   :  { %6539 = vsyncpa [#allocation4], 1 }

</bundles_post_ra>
